<compile_context>
chip_gen: v7x
topology: tpu7x:2x2x1
jax: 0.10.0
libtpu: 0.0.40
codegen_flags: <defaults>
</compile_context>

<pallas_src>
import functools

import jax
import jax.numpy as jnp
from jax.experimental import pallas as pl
from jax.experimental.pallas import tpu as pltpu


# ---------------------------------------------------------------------------
# Fused forward kernel: one batch tile (tb samples) per grid step.
# ---------------------------------------------------------------------------
def _fused_forward_kernel(
    x_ref,        # (tb, 28, 28)   input images (single channel)
    w1bd_ref,     # (25, 24, 240)  conv1 block-diagonal weights per (kh, kw)
    b1_ref,       # (1, 120)       conv1 bias tiled over pooled width
    selr1_ref,    # (2, 12, 24)    pool1 row selection (dy = 0, 1)
    selc1_ref,    # (2, 240, 120)  pool1 col selection (dx = 0, 1)
    w2bd_ref,     # (25, 80, 160)  conv2 block-diagonal weights per (kh, kw)
    b2_ref,       # (1, 80)
    selr2_ref,    # (2, 4, 8)
    selc2_ref,    # (2, 160, 80)
    wfc1_ref,     # (4, 80, 50)    fc1 weights reordered to [yo, xo*20+co, n]
    bfc1_ref,     # (1, 50)
    wfc2_ref,     # (50, 10)
    bfc2_ref,     # (1, 10)
    out_ref,      # (tb, 1, 10)
    *,
    tb,
):
    f32 = jnp.float32

    for s in range(tb):
        img = x_ref[s]                                               # (28, 28)

        # conv1 (valid 5x5, Cin=1, Cout=10) -> o1[y, x*10 + co]
        o1 = jnp.zeros((24, 240), f32)
        for k in range(25):
            i, j = k // 5, k % 5
            sl = img[i:i + 24, j:j + 24]                             # (24, 24)
            o1 = o1 + jnp.dot(sl, w1bd_ref[k], preferred_element_type=f32)

        # 2x2 max-pool (selection matmuls) + bias + relu -> p1[yo, xo*10 + c]
        r0 = jnp.dot(selr1_ref[0], o1, preferred_element_type=f32)   # (12, 240)
        r1 = jnp.dot(selr1_ref[1], o1, preferred_element_type=f32)
        p1 = jnp.maximum(
            jnp.maximum(jnp.dot(r0, selc1_ref[0], preferred_element_type=f32),
                        jnp.dot(r0, selc1_ref[1], preferred_element_type=f32)),
            jnp.maximum(jnp.dot(r1, selc1_ref[0], preferred_element_type=f32),
                        jnp.dot(r1, selc1_ref[1], preferred_element_type=f32)))
        p1 = jnp.maximum(p1 + b1_ref[...], 0.0)                      # (12, 120)

        # conv2 (valid 5x5, Cin=10, Cout=20) -> o2[y, x*20 + co]
        o2 = jnp.zeros((8, 160), f32)
        for k in range(25):
            i, j = k // 5, k % 5
            sl = p1[i:i + 8, j * 10:j * 10 + 80]                     # (8, 80)
            o2 = o2 + jnp.dot(sl, w2bd_ref[k], preferred_element_type=f32)
        # TODO(synk): Dropout(p=0.5) is identity in eval mode; training-mode RNG mask not implemented.

        # 2x2 max-pool + bias + relu -> p2[yo, xo*20 + co]
        r0 = jnp.dot(selr2_ref[0], o2, preferred_element_type=f32)   # (4, 160)
        r1 = jnp.dot(selr2_ref[1], o2, preferred_element_type=f32)
        p2 = jnp.maximum(
            jnp.maximum(jnp.dot(r0, selc2_ref[0], preferred_element_type=f32),
                        jnp.dot(r0, selc2_ref[1], preferred_element_type=f32)),
            jnp.maximum(jnp.dot(r1, selc2_ref[0], preferred_element_type=f32),
                        jnp.dot(r1, selc2_ref[1], preferred_element_type=f32)))
        p2 = jnp.maximum(p2 + b2_ref[...], 0.0)                      # (4, 80)

        # fc1 + relu (full contraction over p2, in PyTorch NCHW flatten order)
        h = bfc1_ref[...]                                            # (1, 50)
        for yo in range(4):
            h = h + jnp.dot(p2[yo:yo + 1, :], wfc1_ref[yo],
                            preferred_element_type=f32)
        h = jnp.maximum(h, 0.0)

        # fc2 + log_softmax (exp/log on the EUP)
        logits = jnp.dot(h, wfc2_ref[...], preferred_element_type=f32) + bfc2_ref[...]
        m = jnp.max(logits, axis=-1, keepdims=True)
        lse = m + jnp.log(jnp.sum(jnp.exp(logits - m), axis=-1, keepdims=True))
        out_ref[s] = (logits - lse).astype(out_ref.dtype)


# ---------------------------------------------------------------------------
# Parameters: PyTorch-layout init + one-time repack into kernel layouts.
# ---------------------------------------------------------------------------
def init_params(key):
    ks = jax.random.split(key, 8)

    def u(k, shape, fan_in):
        bound = 1.0 / jnp.sqrt(float(fan_in))
        return jax.random.uniform(k, shape, jnp.float32, -bound, bound)

    return {
        "conv1_w": u(ks[0], (10, 1, 5, 5), 1 * 25),
        "conv1_b": u(ks[1], (10,), 1 * 25),
        "conv2_w": u(ks[2], (20, 10, 5, 5), 10 * 25),
        "conv2_b": u(ks[3], (20,), 10 * 25),
        "fc1_w": u(ks[4], (50, 320), 320),   # PyTorch Linear: (out, in)
        "fc1_b": u(ks[5], (50,), 320),
        "fc2_w": u(ks[6], (10, 50), 50),
        "fc2_b": u(ks[7], (10,), 50),
    }


def _pool_selectors(h_out, w_out, c):
    """0/1 matrices so 2x2 max-pool = max_{dy,dx} (selr[dy] @ X @ selc[dx])."""
    f32 = jnp.float32
    rows_in, cols_in = 2 * h_out, 2 * w_out
    selr = jnp.stack([
        (jnp.arange(rows_in)[None, :] ==
         2 * jnp.arange(h_out)[:, None] + dy).astype(f32)
        for dy in (0, 1)])                                   # (2, h_out, 2*h_out)
    eye_c = jnp.eye(c, dtype=f32)
    selc = jnp.stack([
        jnp.kron((jnp.arange(cols_in)[:, None] ==
                  2 * jnp.arange(w_out)[None, :] + dx).astype(f32), eye_c)
        for dx in (0, 1)])                                   # (2, 2*w_out*c, w_out*c)
    return selr, selc


def prepare_params(params):
    """One-time repack of PyTorch-layout params into MXU-friendly layouts."""
    f32 = jnp.float32
    # conv1: (10,1,5,5) -> 25 block-diagonal (24, 240) matrices
    w1 = params["conv1_w"].astype(f32)[:, 0].reshape(10, 25).T        # (25, 10)
    eye24 = jnp.eye(24, dtype=f32)
    w1bd = jax.vmap(lambda r: jnp.kron(eye24, r[None, :]))(w1)        # (25, 24, 240)
    # conv2: (20,10,5,5) -> 25 block-diagonal (80, 160) matrices
    w2 = params["conv2_w"].astype(f32).reshape(20, 10, 25).transpose(2, 1, 0)  # (25,10,20)
    eye8 = jnp.eye(8, dtype=f32)
    w2bd = jax.vmap(lambda m: jnp.kron(eye8, m))(w2)                  # (25, 80, 160)
    selr1, selc1 = _pool_selectors(12, 12, 10)
    selr2, selc2 = _pool_selectors(4, 4, 20)
    # fc1: (50, 320) -> [yo, xo*20+co, n] so the kernel never has to flatten.
    wfc1 = (params["fc1_w"].astype(f32).reshape(50, 20, 4, 4)
            .transpose(2, 3, 1, 0).reshape(4, 80, 50))
    return {
        "w1bd": w1bd,
        "b1t": jnp.tile(params["conv1_b"].astype(f32), 12)[None, :],  # (1, 120)
        "selr1": selr1, "selc1": selc1,
        "w2bd": w2bd,
        "b2t": jnp.tile(params["conv2_b"].astype(f32), 4)[None, :],   # (1, 80)
        "selr2": selr2, "selc2": selc2,
        "wfc1": wfc1,
        "bfc1": params["fc1_b"].astype(f32)[None, :],                 # (1, 50)
        "wfc2": params["fc2_w"].astype(f32).T,                        # (50, 10)
        "bfc2": params["fc2_b"].astype(f32)[None, :],                 # (1, 10)
    }


# ---------------------------------------------------------------------------
# Forward pass (single fused pallas_call, grid over batch)
# ---------------------------------------------------------------------------
def _pick_batch_block(batch):
    for tb in (8, 4, 2, 1):
        if batch % tb == 0 and batch // tb >= 2:
            return tb
    return batch


def my_network_forward(prepped, x_nchw):
    """x_nchw: (B, 1, 28, 28) float32 -> log-probabilities (B, 10)."""
    batch = x_nchw.shape[0]
    assert x_nchw.shape[1:] == (1, 28, 28)
    x = x_nchw.reshape(batch, 28, 28).astype(jnp.float32)   # drop Cin=1 (free)
    tb = _pick_batch_block(batch)
    grid = (batch // tb,)

    def whole(arr):
        nd = arr.ndim
        return pl.BlockSpec(arr.shape, lambda b, _nd=nd: (0,) * _nd)

    weights = (prepped["w1bd"], prepped["b1t"], prepped["selr1"], prepped["selc1"],
               prepped["w2bd"], prepped["b2t"], prepped["selr2"], prepped["selc2"],
               prepped["wfc1"], prepped["bfc1"], prepped["wfc2"], prepped["bfc2"])

    out = pl.pallas_call(
        functools.partial(_fused_forward_kernel, tb=tb),
        out_shape=jax.ShapeDtypeStruct((batch, 1, 10), jnp.float32),
        grid=grid,
        in_specs=[pl.BlockSpec((tb, 28, 28), lambda b: (b, 0, 0))]
                 + [whole(w) for w in weights],
        out_specs=pl.BlockSpec((tb, 1, 10), lambda b: (b, 0, 0)),
        compiler_params=pltpu.CompilerParams(
            dimension_semantics=("parallel",)),
    )(x, *weights)
    return out.reshape(batch, 10)


# ---------------------------------------------------------------------------
# Pure-JAX reference (for correctness checking only)
# ---------------------------------------------------------------------------
def reference_forward(params, x_nchw):
    hp = jax.lax.Precision.HIGHEST
    dn = ("NCHW", "OIHW", "NCHW")
    x = jax.lax.conv_general_dilated(x_nchw, params["conv1_w"], (1, 1), "VALID",
                                     dimension_numbers=dn, precision=hp)
    x = x + params["conv1_b"][None, :, None, None]
    x = jax.lax.reduce_window(x, -jnp.inf, jax.lax.max,
                              (1, 1, 2, 2), (1, 1, 2, 2), "VALID")
    x = jnp.maximum(x, 0.0)
    x = jax.lax.conv_general_dilated(x, params["conv2_w"], (1, 1), "VALID",
                                     dimension_numbers=dn, precision=hp)
    x = x + params["conv2_b"][None, :, None, None]
    x = jax.lax.reduce_window(x, -jnp.inf, jax.lax.max,
                              (1, 1, 2, 2), (1, 1, 2, 2), "VALID")
    x = jnp.maximum(x, 0.0)
    x = x.reshape(x.shape[0], -1)                            # PyTorch NCHW flatten
    x = jnp.maximum(jnp.dot(x, params["fc1_w"].T, precision=hp) + params["fc1_b"], 0.0)
    x = jnp.dot(x, params["fc2_w"].T, precision=hp) + params["fc2_b"]
    return jax.nn.log_softmax(x, axis=-1)


if __name__ == "__main__":
    key = jax.random.PRNGKey(0)
    pkey, xkey = jax.random.split(key)
    params = init_params(pkey)
    prepped = prepare_params(params)          # one-time weight repack

    # MNIST-shaped input (28x28 is required so the flatten yields 320 features).
    x = jax.random.normal(xkey, (2, 1, 28, 28), jnp.float32)

    out = jax.block_until_ready(my_network_forward(prepped, x))
    assert out.shape == (2, 10)
    # log-softmax rows should exponentiate-and-sum to ~1
    assert jnp.allclose(jnp.sum(jnp.exp(out), axis=-1), 1.0, atol=1e-4)
    # match the pure-JAX reference forward
    max_err = jnp.max(jnp.abs(out - reference_forward(params, x)))
    assert max_err < 5e-2, f"mismatch vs reference: {max_err}"
    print("KERNEL_OK")
</pallas_src>

<mosaic_0001>
module attributes {stable_mosaic.version = 11 : i64} {
  func.func @_fused_forward_kernel(%arg0: i32, %arg1: memref<1x28x28xf32, #tpu.memory_space<vmem>>, %arg2: memref<25x24x240xf32, #tpu.memory_space<vmem>>, %arg3: memref<1x120xf32, #tpu.memory_space<vmem>>, %arg4: memref<2x12x24xf32, #tpu.memory_space<vmem>>, %arg5: memref<2x240x120xf32, #tpu.memory_space<vmem>>, %arg6: memref<25x80x160xf32, #tpu.memory_space<vmem>>, %arg7: memref<1x80xf32, #tpu.memory_space<vmem>>, %arg8: memref<2x4x8xf32, #tpu.memory_space<vmem>>, %arg9: memref<2x160x80xf32, #tpu.memory_space<vmem>>, %arg10: memref<4x80x50xf32, #tpu.memory_space<vmem>>, %arg11: memref<1x50xf32, #tpu.memory_space<vmem>>, %arg12: memref<50x10xf32, #tpu.memory_space<vmem>>, %arg13: memref<1x10xf32, #tpu.memory_space<vmem>>, %arg14: memref<1x1x10xf32, #tpu.memory_space<vmem>>) attributes {dimension_semantics = [#tpu.dimension_semantics<parallel>], iteration_bounds = array<i64: 2>, scalar_prefetch = 0 : i64, scratch_operands = 0 : i64, tpu.core_type = #tpu.core_type<tc>, window_params = [{transform_indices = @transform_0, window_bounds = array<i64: 1, 28, 28>}, {pipeline_mode = #tpu.pipeline_mode<synchronous>, transform_indices = @transform_1, window_bounds = array<i64: 25, 24, 240>}, {pipeline_mode = #tpu.pipeline_mode<synchronous>, transform_indices = @transform_2, window_bounds = array<i64: 1, 120>}, {pipeline_mode = #tpu.pipeline_mode<synchronous>, transform_indices = @transform_3, window_bounds = array<i64: 2, 12, 24>}, {pipeline_mode = #tpu.pipeline_mode<synchronous>, transform_indices = @transform_4, window_bounds = array<i64: 2, 240, 120>}, {pipeline_mode = #tpu.pipeline_mode<synchronous>, transform_indices = @transform_5, window_bounds = array<i64: 25, 80, 160>}, {pipeline_mode = #tpu.pipeline_mode<synchronous>, transform_indices = @transform_6, window_bounds = array<i64: 1, 80>}, {pipeline_mode = #tpu.pipeline_mode<synchronous>, transform_indices = @transform_7, window_bounds = array<i64: 2, 4, 8>}, {pipeline_mode = #tpu.pipeline_mode<synchronous>, transform_indices = @transform_8, window_bounds = array<i64: 2, 160, 80>}, {pipeline_mode = #tpu.pipeline_mode<synchronous>, transform_indices = @transform_9, window_bounds = array<i64: 4, 80, 50>}, {pipeline_mode = #tpu.pipeline_mode<synchronous>, transform_indices = @transform_10, window_bounds = array<i64: 1, 50>}, {pipeline_mode = #tpu.pipeline_mode<synchronous>, transform_indices = @transform_11, window_bounds = array<i64: 50, 10>}, {pipeline_mode = #tpu.pipeline_mode<synchronous>, transform_indices = @transform_12, window_bounds = array<i64: 1, 10>}, {transform_indices = @transform_13, window_bounds = array<i64: 1, 1, 10>}]} {
    %c0 = arith.constant 0 : index
    %c0_0 = arith.constant 0 : index
    %c0_1 = arith.constant 0 : index
    %0 = vector.load %arg1[%c0, %c0_0, %c0_1] : memref<1x28x28xf32, #tpu.memory_space<vmem>>, vector<1x28x28xf32>
    %1 = vector.shape_cast %0 : vector<1x28x28xf32> to vector<28x28xf32>
    %cst = arith.constant 0.000000e+00 : f32
    %2 = vector.broadcast %cst : f32 to vector<24x240xf32>
    %3 = vector.extract_strided_slice %1 {offsets = [0, 0], sizes = [24, 24], strides = [1, 1]} : vector<28x28xf32> to vector<24x24xf32>
    %c0_2 = arith.constant 0 : index
    %c0_3 = arith.constant 0 : index
    %c0_4 = arith.constant 0 : index
    %4 = vector.load %arg2[%c0_2, %c0_3, %c0_4] : memref<25x24x240xf32, #tpu.memory_space<vmem>>, vector<1x24x240xf32>
    %5 = vector.shape_cast %4 : vector<1x24x240xf32> to vector<24x240xf32>
    %cst_5 = arith.constant dense<0.000000e+00> : vector<24x240xf32>
    %6 = tpu.matmul %3, %5, %cst_5 {dimension_numbers = #tpu.dot_dimension_numbers<[1], [0], [0], [1], [0, 0, 1, 1], [], []>} : vector<24x24xf32>, vector<24x240xf32>, vector<24x240xf32> -> vector<24x240xf32>
    %7 = arith.addf %2, %6 : vector<24x240xf32>
    %8 = vector.extract_strided_slice %1 {offsets = [0, 1], sizes = [24, 24], strides = [1, 1]} : vector<28x28xf32> to vector<24x24xf32>
    %c1 = arith.constant 1 : index
    %c0_6 = arith.constant 0 : index
    %c0_7 = arith.constant 0 : index
    %9 = vector.load %arg2[%c1, %c0_6, %c0_7] : memref<25x24x240xf32, #tpu.memory_space<vmem>>, vector<1x24x240xf32>
    %10 = vector.shape_cast %9 : vector<1x24x240xf32> to vector<24x240xf32>
    %cst_8 = arith.constant dense<0.000000e+00> : vector<24x240xf32>
    %11 = tpu.matmul %8, %10, %cst_8 {dimension_numbers = #tpu.dot_dimension_numbers<[1], [0], [0], [1], [0, 0, 1, 1], [], []>} : vector<24x24xf32>, vector<24x240xf32>, vector<24x240xf32> -> vector<24x240xf32>
    %12 = arith.addf %7, %11 : vector<24x240xf32>
    %13 = vector.extract_strided_slice %1 {offsets = [0, 2], sizes = [24, 24], strides = [1, 1]} : vector<28x28xf32> to vector<24x24xf32>
    %c2 = arith.constant 2 : index
    %c0_9 = arith.constant 0 : index
    %c0_10 = arith.constant 0 : index
    %14 = vector.load %arg2[%c2, %c0_9, %c0_10] : memref<25x24x240xf32, #tpu.memory_space<vmem>>, vector<1x24x240xf32>
    %15 = vector.shape_cast %14 : vector<1x24x240xf32> to vector<24x240xf32>
    %cst_11 = arith.constant dense<0.000000e+00> : vector<24x240xf32>
    %16 = tpu.matmul %13, %15, %cst_11 {dimension_numbers = #tpu.dot_dimension_numbers<[1], [0], [0], [1], [0, 0, 1, 1], [], []>} : vector<24x24xf32>, vector<24x240xf32>, vector<24x240xf32> -> vector<24x240xf32>
    %17 = arith.addf %12, %16 : vector<24x240xf32>
    %18 = vector.extract_strided_slice %1 {offsets = [0, 3], sizes = [24, 24], strides = [1, 1]} : vector<28x28xf32> to vector<24x24xf32>
    %c3 = arith.constant 3 : index
    %c0_12 = arith.constant 0 : index
    %c0_13 = arith.constant 0 : index
    %19 = vector.load %arg2[%c3, %c0_12, %c0_13] : memref<25x24x240xf32, #tpu.memory_space<vmem>>, vector<1x24x240xf32>
    %20 = vector.shape_cast %19 : vector<1x24x240xf32> to vector<24x240xf32>
    %cst_14 = arith.constant dense<0.000000e+00> : vector<24x240xf32>
    %21 = tpu.matmul %18, %20, %cst_14 {dimension_numbers = #tpu.dot_dimension_numbers<[1], [0], [0], [1], [0, 0, 1, 1], [], []>} : vector<24x24xf32>, vector<24x240xf32>, vector<24x240xf32> -> vector<24x240xf32>
    %22 = arith.addf %17, %21 : vector<24x240xf32>
    %23 = vector.extract_strided_slice %1 {offsets = [0, 4], sizes = [24, 24], strides = [1, 1]} : vector<28x28xf32> to vector<24x24xf32>
    %c4 = arith.constant 4 : index
    %c0_15 = arith.constant 0 : index
    %c0_16 = arith.constant 0 : index
    %24 = vector.load %arg2[%c4, %c0_15, %c0_16] : memref<25x24x240xf32, #tpu.memory_space<vmem>>, vector<1x24x240xf32>
    %25 = vector.shape_cast %24 : vector<1x24x240xf32> to vector<24x240xf32>
    %cst_17 = arith.constant dense<0.000000e+00> : vector<24x240xf32>
    %26 = tpu.matmul %23, %25, %cst_17 {dimension_numbers = #tpu.dot_dimension_numbers<[1], [0], [0], [1], [0, 0, 1, 1], [], []>} : vector<24x24xf32>, vector<24x240xf32>, vector<24x240xf32> -> vector<24x240xf32>
    %27 = arith.addf %22, %26 : vector<24x240xf32>
    %28 = vector.extract_strided_slice %1 {offsets = [1, 0], sizes = [24, 24], strides = [1, 1]} : vector<28x28xf32> to vector<24x24xf32>
    %c5 = arith.constant 5 : index
    %c0_18 = arith.constant 0 : index
    %c0_19 = arith.constant 0 : index
    %29 = vector.load %arg2[%c5, %c0_18, %c0_19] : memref<25x24x240xf32, #tpu.memory_space<vmem>>, vector<1x24x240xf32>
    %30 = vector.shape_cast %29 : vector<1x24x240xf32> to vector<24x240xf32>
    %cst_20 = arith.constant dense<0.000000e+00> : vector<24x240xf32>
    %31 = tpu.matmul %28, %30, %cst_20 {dimension_numbers = #tpu.dot_dimension_numbers<[1], [0], [0], [1], [0, 0, 1, 1], [], []>} : vector<24x24xf32>, vector<24x240xf32>, vector<24x240xf32> -> vector<24x240xf32>
    %32 = arith.addf %27, %31 : vector<24x240xf32>
    %33 = vector.extract_strided_slice %1 {offsets = [1, 1], sizes = [24, 24], strides = [1, 1]} : vector<28x28xf32> to vector<24x24xf32>
    %c6 = arith.constant 6 : index
    %c0_21 = arith.constant 0 : index
    %c0_22 = arith.constant 0 : index
    %34 = vector.load %arg2[%c6, %c0_21, %c0_22] : memref<25x24x240xf32, #tpu.memory_space<vmem>>, vector<1x24x240xf32>
    %35 = vector.shape_cast %34 : vector<1x24x240xf32> to vector<24x240xf32>
    %cst_23 = arith.constant dense<0.000000e+00> : vector<24x240xf32>
    %36 = tpu.matmul %33, %35, %cst_23 {dimension_numbers = #tpu.dot_dimension_numbers<[1], [0], [0], [1], [0, 0, 1, 1], [], []>} : vector<24x24xf32>, vector<24x240xf32>, vector<24x240xf32> -> vector<24x240xf32>
    %37 = arith.addf %32, %36 : vector<24x240xf32>
    %38 = vector.extract_strided_slice %1 {offsets = [1, 2], sizes = [24, 24], strides = [1, 1]} : vector<28x28xf32> to vector<24x24xf32>
    %c7 = arith.constant 7 : index
    %c0_24 = arith.constant 0 : index
    %c0_25 = arith.constant 0 : index
    %39 = vector.load %arg2[%c7, %c0_24, %c0_25] : memref<25x24x240xf32, #tpu.memory_space<vmem>>, vector<1x24x240xf32>
    %40 = vector.shape_cast %39 : vector<1x24x240xf32> to vector<24x240xf32>
    %cst_26 = arith.constant dense<0.000000e+00> : vector<24x240xf32>
    %41 = tpu.matmul %38, %40, %cst_26 {dimension_numbers = #tpu.dot_dimension_numbers<[1], [0], [0], [1], [0, 0, 1, 1], [], []>} : vector<24x24xf32>, vector<24x240xf32>, vector<24x240xf32> -> vector<24x240xf32>
    %42 = arith.addf %37, %41 : vector<24x240xf32>
    %43 = vector.extract_strided_slice %1 {offsets = [1, 3], sizes = [24, 24], strides = [1, 1]} : vector<28x28xf32> to vector<24x24xf32>
    %c8 = arith.constant 8 : index
    %c0_27 = arith.constant 0 : index
    %c0_28 = arith.constant 0 : index
    %44 = vector.load %arg2[%c8, %c0_27, %c0_28] : memref<25x24x240xf32, #tpu.memory_space<vmem>>, vector<1x24x240xf32>
    %45 = vector.shape_cast %44 : vector<1x24x240xf32> to vector<24x240xf32>
    %cst_29 = arith.constant dense<0.000000e+00> : vector<24x240xf32>
    %46 = tpu.matmul %43, %45, %cst_29 {dimension_numbers = #tpu.dot_dimension_numbers<[1], [0], [0], [1], [0, 0, 1, 1], [], []>} : vector<24x24xf32>, vector<24x240xf32>, vector<24x240xf32> -> vector<24x240xf32>
    %47 = arith.addf %42, %46 : vector<24x240xf32>
    %48 = vector.extract_strided_slice %1 {offsets = [1, 4], sizes = [24, 24], strides = [1, 1]} : vector<28x28xf32> to vector<24x24xf32>
    %c9 = arith.constant 9 : index
    %c0_30 = arith.constant 0 : index
    %c0_31 = arith.constant 0 : index
    %49 = vector.load %arg2[%c9, %c0_30, %c0_31] : memref<25x24x240xf32, #tpu.memory_space<vmem>>, vector<1x24x240xf32>
    %50 = vector.shape_cast %49 : vector<1x24x240xf32> to vector<24x240xf32>
    %cst_32 = arith.constant dense<0.000000e+00> : vector<24x240xf32>
    %51 = tpu.matmul %48, %50, %cst_32 {dimension_numbers = #tpu.dot_dimension_numbers<[1], [0], [0], [1], [0, 0, 1, 1], [], []>} : vector<24x24xf32>, vector<24x240xf32>, vector<24x240xf32> -> vector<24x240xf32>
    %52 = arith.addf %47, %51 : vector<24x240xf32>
    %53 = vector.extract_strided_slice %1 {offsets = [2, 0], sizes = [24, 24], strides = [1, 1]} : vector<28x28xf32> to vector<24x24xf32>
    %c10 = arith.constant 10 : index
    %c0_33 = arith.constant 0 : index
    %c0_34 = arith.constant 0 : index
    %54 = vector.load %arg2[%c10, %c0_33, %c0_34] : memref<25x24x240xf32, #tpu.memory_space<vmem>>, vector<1x24x240xf32>
    %55 = vector.shape_cast %54 : vector<1x24x240xf32> to vector<24x240xf32>
    %cst_35 = arith.constant dense<0.000000e+00> : vector<24x240xf32>
    %56 = tpu.matmul %53, %55, %cst_35 {dimension_numbers = #tpu.dot_dimension_numbers<[1], [0], [0], [1], [0, 0, 1, 1], [], []>} : vector<24x24xf32>, vector<24x240xf32>, vector<24x240xf32> -> vector<24x240xf32>
    %57 = arith.addf %52, %56 : vector<24x240xf32>
    %58 = vector.extract_strided_slice %1 {offsets = [2, 1], sizes = [24, 24], strides = [1, 1]} : vector<28x28xf32> to vector<24x24xf32>
    %c11 = arith.constant 11 : index
    %c0_36 = arith.constant 0 : index
    %c0_37 = arith.constant 0 : index
    %59 = vector.load %arg2[%c11, %c0_36, %c0_37] : memref<25x24x240xf32, #tpu.memory_space<vmem>>, vector<1x24x240xf32>
    %60 = vector.shape_cast %59 : vector<1x24x240xf32> to vector<24x240xf32>
    %cst_38 = arith.constant dense<0.000000e+00> : vector<24x240xf32>
    %61 = tpu.matmul %58, %60, %cst_38 {dimension_numbers = #tpu.dot_dimension_numbers<[1], [0], [0], [1], [0, 0, 1, 1], [], []>} : vector<24x24xf32>, vector<24x240xf32>, vector<24x240xf32> -> vector<24x240xf32>
    %62 = arith.addf %57, %61 : vector<24x240xf32>
    %63 = vector.extract_strided_slice %1 {offsets = [2, 2], sizes = [24, 24], strides = [1, 1]} : vector<28x28xf32> to vector<24x24xf32>
    %c12 = arith.constant 12 : index
    %c0_39 = arith.constant 0 : index
    %c0_40 = arith.constant 0 : index
    %64 = vector.load %arg2[%c12, %c0_39, %c0_40] : memref<25x24x240xf32, #tpu.memory_space<vmem>>, vector<1x24x240xf32>
    %65 = vector.shape_cast %64 : vector<1x24x240xf32> to vector<24x240xf32>
    %cst_41 = arith.constant dense<0.000000e+00> : vector<24x240xf32>
    %66 = tpu.matmul %63, %65, %cst_41 {dimension_numbers = #tpu.dot_dimension_numbers<[1], [0], [0], [1], [0, 0, 1, 1], [], []>} : vector<24x24xf32>, vector<24x240xf32>, vector<24x240xf32> -> vector<24x240xf32>
    %67 = arith.addf %62, %66 : vector<24x240xf32>
    %68 = vector.extract_strided_slice %1 {offsets = [2, 3], sizes = [24, 24], strides = [1, 1]} : vector<28x28xf32> to vector<24x24xf32>
    %c13 = arith.constant 13 : index
    %c0_42 = arith.constant 0 : index
    %c0_43 = arith.constant 0 : index
    %69 = vector.load %arg2[%c13, %c0_42, %c0_43] : memref<25x24x240xf32, #tpu.memory_space<vmem>>, vector<1x24x240xf32>
    %70 = vector.shape_cast %69 : vector<1x24x240xf32> to vector<24x240xf32>
    %cst_44 = arith.constant dense<0.000000e+00> : vector<24x240xf32>
    %71 = tpu.matmul %68, %70, %cst_44 {dimension_numbers = #tpu.dot_dimension_numbers<[1], [0], [0], [1], [0, 0, 1, 1], [], []>} : vector<24x24xf32>, vector<24x240xf32>, vector<24x240xf32> -> vector<24x240xf32>
    %72 = arith.addf %67, %71 : vector<24x240xf32>
    %73 = vector.extract_strided_slice %1 {offsets = [2, 4], sizes = [24, 24], strides = [1, 1]} : vector<28x28xf32> to vector<24x24xf32>
    %c14 = arith.constant 14 : index
    %c0_45 = arith.constant 0 : index
    %c0_46 = arith.constant 0 : index
    %74 = vector.load %arg2[%c14, %c0_45, %c0_46] : memref<25x24x240xf32, #tpu.memory_space<vmem>>, vector<1x24x240xf32>
    %75 = vector.shape_cast %74 : vector<1x24x240xf32> to vector<24x240xf32>
    %cst_47 = arith.constant dense<0.000000e+00> : vector<24x240xf32>
    %76 = tpu.matmul %73, %75, %cst_47 {dimension_numbers = #tpu.dot_dimension_numbers<[1], [0], [0], [1], [0, 0, 1, 1], [], []>} : vector<24x24xf32>, vector<24x240xf32>, vector<24x240xf32> -> vector<24x240xf32>
    %77 = arith.addf %72, %76 : vector<24x240xf32>
    %78 = vector.extract_strided_slice %1 {offsets = [3, 0], sizes = [24, 24], strides = [1, 1]} : vector<28x28xf32> to vector<24x24xf32>
    %c15 = arith.constant 15 : index
    %c0_48 = arith.constant 0 : index
    %c0_49 = arith.constant 0 : index
    %79 = vector.load %arg2[%c15, %c0_48, %c0_49] : memref<25x24x240xf32, #tpu.memory_space<vmem>>, vector<1x24x240xf32>
    %80 = vector.shape_cast %79 : vector<1x24x240xf32> to vector<24x240xf32>
    %cst_50 = arith.constant dense<0.000000e+00> : vector<24x240xf32>
    %81 = tpu.matmul %78, %80, %cst_50 {dimension_numbers = #tpu.dot_dimension_numbers<[1], [0], [0], [1], [0, 0, 1, 1], [], []>} : vector<24x24xf32>, vector<24x240xf32>, vector<24x240xf32> -> vector<24x240xf32>
    %82 = arith.addf %77, %81 : vector<24x240xf32>
    %83 = vector.extract_strided_slice %1 {offsets = [3, 1], sizes = [24, 24], strides = [1, 1]} : vector<28x28xf32> to vector<24x24xf32>
    %c16 = arith.constant 16 : index
    %c0_51 = arith.constant 0 : index
    %c0_52 = arith.constant 0 : index
    %84 = vector.load %arg2[%c16, %c0_51, %c0_52] : memref<25x24x240xf32, #tpu.memory_space<vmem>>, vector<1x24x240xf32>
    %85 = vector.shape_cast %84 : vector<1x24x240xf32> to vector<24x240xf32>
    %cst_53 = arith.constant dense<0.000000e+00> : vector<24x240xf32>
    %86 = tpu.matmul %83, %85, %cst_53 {dimension_numbers = #tpu.dot_dimension_numbers<[1], [0], [0], [1], [0, 0, 1, 1], [], []>} : vector<24x24xf32>, vector<24x240xf32>, vector<24x240xf32> -> vector<24x240xf32>
    %87 = arith.addf %82, %86 : vector<24x240xf32>
    %88 = vector.extract_strided_slice %1 {offsets = [3, 2], sizes = [24, 24], strides = [1, 1]} : vector<28x28xf32> to vector<24x24xf32>
    %c17 = arith.constant 17 : index
    %c0_54 = arith.constant 0 : index
    %c0_55 = arith.constant 0 : index
    %89 = vector.load %arg2[%c17, %c0_54, %c0_55] : memref<25x24x240xf32, #tpu.memory_space<vmem>>, vector<1x24x240xf32>
    %90 = vector.shape_cast %89 : vector<1x24x240xf32> to vector<24x240xf32>
    %cst_56 = arith.constant dense<0.000000e+00> : vector<24x240xf32>
    %91 = tpu.matmul %88, %90, %cst_56 {dimension_numbers = #tpu.dot_dimension_numbers<[1], [0], [0], [1], [0, 0, 1, 1], [], []>} : vector<24x24xf32>, vector<24x240xf32>, vector<24x240xf32> -> vector<24x240xf32>
    %92 = arith.addf %87, %91 : vector<24x240xf32>
    %93 = vector.extract_strided_slice %1 {offsets = [3, 3], sizes = [24, 24], strides = [1, 1]} : vector<28x28xf32> to vector<24x24xf32>
    %c18 = arith.constant 18 : index
    %c0_57 = arith.constant 0 : index
    %c0_58 = arith.constant 0 : index
    %94 = vector.load %arg2[%c18, %c0_57, %c0_58] : memref<25x24x240xf32, #tpu.memory_space<vmem>>, vector<1x24x240xf32>
    %95 = vector.shape_cast %94 : vector<1x24x240xf32> to vector<24x240xf32>
    %cst_59 = arith.constant dense<0.000000e+00> : vector<24x240xf32>
    %96 = tpu.matmul %93, %95, %cst_59 {dimension_numbers = #tpu.dot_dimension_numbers<[1], [0], [0], [1], [0, 0, 1, 1], [], []>} : vector<24x24xf32>, vector<24x240xf32>, vector<24x240xf32> -> vector<24x240xf32>
    %97 = arith.addf %92, %96 : vector<24x240xf32>
    %98 = vector.extract_strided_slice %1 {offsets = [3, 4], sizes = [24, 24], strides = [1, 1]} : vector<28x28xf32> to vector<24x24xf32>
    %c19 = arith.constant 19 : index
    %c0_60 = arith.constant 0 : index
    %c0_61 = arith.constant 0 : index
    %99 = vector.load %arg2[%c19, %c0_60, %c0_61] : memref<25x24x240xf32, #tpu.memory_space<vmem>>, vector<1x24x240xf32>
    %100 = vector.shape_cast %99 : vector<1x24x240xf32> to vector<24x240xf32>
    %cst_62 = arith.constant dense<0.000000e+00> : vector<24x240xf32>
    %101 = tpu.matmul %98, %100, %cst_62 {dimension_numbers = #tpu.dot_dimension_numbers<[1], [0], [0], [1], [0, 0, 1, 1], [], []>} : vector<24x24xf32>, vector<24x240xf32>, vector<24x240xf32> -> vector<24x240xf32>
    %102 = arith.addf %97, %101 : vector<24x240xf32>
    %103 = vector.extract_strided_slice %1 {offsets = [4, 0], sizes = [24, 24], strides = [1, 1]} : vector<28x28xf32> to vector<24x24xf32>
    %c20 = arith.constant 20 : index
    %c0_63 = arith.constant 0 : index
    %c0_64 = arith.constant 0 : index
    %104 = vector.load %arg2[%c20, %c0_63, %c0_64] : memref<25x24x240xf32, #tpu.memory_space<vmem>>, vector<1x24x240xf32>
    %105 = vector.shape_cast %104 : vector<1x24x240xf32> to vector<24x240xf32>
    %cst_65 = arith.constant dense<0.000000e+00> : vector<24x240xf32>
    %106 = tpu.matmul %103, %105, %cst_65 {dimension_numbers = #tpu.dot_dimension_numbers<[1], [0], [0], [1], [0, 0, 1, 1], [], []>} : vector<24x24xf32>, vector<24x240xf32>, vector<24x240xf32> -> vector<24x240xf32>
    %107 = arith.addf %102, %106 : vector<24x240xf32>
    %108 = vector.extract_strided_slice %1 {offsets = [4, 1], sizes = [24, 24], strides = [1, 1]} : vector<28x28xf32> to vector<24x24xf32>
    %c21 = arith.constant 21 : index
    %c0_66 = arith.constant 0 : index
    %c0_67 = arith.constant 0 : index
    %109 = vector.load %arg2[%c21, %c0_66, %c0_67] : memref<25x24x240xf32, #tpu.memory_space<vmem>>, vector<1x24x240xf32>
    %110 = vector.shape_cast %109 : vector<1x24x240xf32> to vector<24x240xf32>
    %cst_68 = arith.constant dense<0.000000e+00> : vector<24x240xf32>
    %111 = tpu.matmul %108, %110, %cst_68 {dimension_numbers = #tpu.dot_dimension_numbers<[1], [0], [0], [1], [0, 0, 1, 1], [], []>} : vector<24x24xf32>, vector<24x240xf32>, vector<24x240xf32> -> vector<24x240xf32>
    %112 = arith.addf %107, %111 : vector<24x240xf32>
    %113 = vector.extract_strided_slice %1 {offsets = [4, 2], sizes = [24, 24], strides = [1, 1]} : vector<28x28xf32> to vector<24x24xf32>
    %c22 = arith.constant 22 : index
    %c0_69 = arith.constant 0 : index
    %c0_70 = arith.constant 0 : index
    %114 = vector.load %arg2[%c22, %c0_69, %c0_70] : memref<25x24x240xf32, #tpu.memory_space<vmem>>, vector<1x24x240xf32>
    %115 = vector.shape_cast %114 : vector<1x24x240xf32> to vector<24x240xf32>
    %cst_71 = arith.constant dense<0.000000e+00> : vector<24x240xf32>
    %116 = tpu.matmul %113, %115, %cst_71 {dimension_numbers = #tpu.dot_dimension_numbers<[1], [0], [0], [1], [0, 0, 1, 1], [], []>} : vector<24x24xf32>, vector<24x240xf32>, vector<24x240xf32> -> vector<24x240xf32>
    %117 = arith.addf %112, %116 : vector<24x240xf32>
    %118 = vector.extract_strided_slice %1 {offsets = [4, 3], sizes = [24, 24], strides = [1, 1]} : vector<28x28xf32> to vector<24x24xf32>
    %c23 = arith.constant 23 : index
    %c0_72 = arith.constant 0 : index
    %c0_73 = arith.constant 0 : index
    %119 = vector.load %arg2[%c23, %c0_72, %c0_73] : memref<25x24x240xf32, #tpu.memory_space<vmem>>, vector<1x24x240xf32>
    %120 = vector.shape_cast %119 : vector<1x24x240xf32> to vector<24x240xf32>
    %cst_74 = arith.constant dense<0.000000e+00> : vector<24x240xf32>
    %121 = tpu.matmul %118, %120, %cst_74 {dimension_numbers = #tpu.dot_dimension_numbers<[1], [0], [0], [1], [0, 0, 1, 1], [], []>} : vector<24x24xf32>, vector<24x240xf32>, vector<24x240xf32> -> vector<24x240xf32>
    %122 = arith.addf %117, %121 : vector<24x240xf32>
    %123 = vector.extract_strided_slice %1 {offsets = [4, 4], sizes = [24, 24], strides = [1, 1]} : vector<28x28xf32> to vector<24x24xf32>
    %c24 = arith.constant 24 : index
    %c0_75 = arith.constant 0 : index
    %c0_76 = arith.constant 0 : index
    %124 = vector.load %arg2[%c24, %c0_75, %c0_76] : memref<25x24x240xf32, #tpu.memory_space<vmem>>, vector<1x24x240xf32>
    %125 = vector.shape_cast %124 : vector<1x24x240xf32> to vector<24x240xf32>
    %cst_77 = arith.constant dense<0.000000e+00> : vector<24x240xf32>
    %126 = tpu.matmul %123, %125, %cst_77 {dimension_numbers = #tpu.dot_dimension_numbers<[1], [0], [0], [1], [0, 0, 1, 1], [], []>} : vector<24x24xf32>, vector<24x240xf32>, vector<24x240xf32> -> vector<24x240xf32>
    %127 = arith.addf %122, %126 : vector<24x240xf32>
    %c0_78 = arith.constant 0 : index
    %c0_79 = arith.constant 0 : index
    %c0_80 = arith.constant 0 : index
    %128 = vector.load %arg4[%c0_78, %c0_79, %c0_80] : memref<2x12x24xf32, #tpu.memory_space<vmem>>, vector<1x12x24xf32>
    %129 = vector.shape_cast %128 : vector<1x12x24xf32> to vector<12x24xf32>
    %cst_81 = arith.constant dense<0.000000e+00> : vector<12x240xf32>
    %130 = tpu.matmul %129, %127, %cst_81 {dimension_numbers = #tpu.dot_dimension_numbers<[1], [0], [0], [1], [0, 0, 1, 1], [], []>} : vector<12x24xf32>, vector<24x240xf32>, vector<12x240xf32> -> vector<12x240xf32>
    %c1_82 = arith.constant 1 : index
    %c0_83 = arith.constant 0 : index
    %c0_84 = arith.constant 0 : index
    %131 = vector.load %arg4[%c1_82, %c0_83, %c0_84] : memref<2x12x24xf32, #tpu.memory_space<vmem>>, vector<1x12x24xf32>
    %132 = vector.shape_cast %131 : vector<1x12x24xf32> to vector<12x24xf32>
    %cst_85 = arith.constant dense<0.000000e+00> : vector<12x240xf32>
    %133 = tpu.matmul %132, %127, %cst_85 {dimension_numbers = #tpu.dot_dimension_numbers<[1], [0], [0], [1], [0, 0, 1, 1], [], []>} : vector<12x24xf32>, vector<24x240xf32>, vector<12x240xf32> -> vector<12x240xf32>
    %c0_86 = arith.constant 0 : index
    %c0_87 = arith.constant 0 : index
    %c0_88 = arith.constant 0 : index
    %134 = vector.load %arg5[%c0_86, %c0_87, %c0_88] : memref<2x240x120xf32, #tpu.memory_space<vmem>>, vector<1x240x120xf32>
    %135 = vector.shape_cast %134 : vector<1x240x120xf32> to vector<240x120xf32>
    %cst_89 = arith.constant dense<0.000000e+00> : vector<12x120xf32>
    %136 = tpu.matmul %130, %135, %cst_89 {dimension_numbers = #tpu.dot_dimension_numbers<[1], [0], [0], [1], [0, 0, 1, 1], [], []>} : vector<12x240xf32>, vector<240x120xf32>, vector<12x120xf32> -> vector<12x120xf32>
    %c1_90 = arith.constant 1 : index
    %c0_91 = arith.constant 0 : index
    %c0_92 = arith.constant 0 : index
    %137 = vector.load %arg5[%c1_90, %c0_91, %c0_92] : memref<2x240x120xf32, #tpu.memory_space<vmem>>, vector<1x240x120xf32>
    %138 = vector.shape_cast %137 : vector<1x240x120xf32> to vector<240x120xf32>
    %cst_93 = arith.constant dense<0.000000e+00> : vector<12x120xf32>
    %139 = tpu.matmul %130, %138, %cst_93 {dimension_numbers = #tpu.dot_dimension_numbers<[1], [0], [0], [1], [0, 0, 1, 1], [], []>} : vector<12x240xf32>, vector<240x120xf32>, vector<12x120xf32> -> vector<12x120xf32>
    %140 = arith.maximumf %136, %139 : vector<12x120xf32>
    %c0_94 = arith.constant 0 : index
    %c0_95 = arith.constant 0 : index
    %c0_96 = arith.constant 0 : index
    %141 = vector.load %arg5[%c0_94, %c0_95, %c0_96] : memref<2x240x120xf32, #tpu.memory_space<vmem>>, vector<1x240x120xf32>
    %142 = vector.shape_cast %141 : vector<1x240x120xf32> to vector<240x120xf32>
    %cst_97 = arith.constant dense<0.000000e+00> : vector<12x120xf32>
    %143 = tpu.matmul %133, %142, %cst_97 {dimension_numbers = #tpu.dot_dimension_numbers<[1], [0], [0], [1], [0, 0, 1, 1], [], []>} : vector<12x240xf32>, vector<240x120xf32>, vector<12x120xf32> -> vector<12x120xf32>
    %c1_98 = arith.constant 1 : index
    %c0_99 = arith.constant 0 : index
    %c0_100 = arith.constant 0 : index
    %144 = vector.load %arg5[%c1_98, %c0_99, %c0_100] : memref<2x240x120xf32, #tpu.memory_space<vmem>>, vector<1x240x120xf32>
    %145 = vector.shape_cast %144 : vector<1x240x120xf32> to vector<240x120xf32>
    %cst_101 = arith.constant dense<0.000000e+00> : vector<12x120xf32>
    %146 = tpu.matmul %133, %145, %cst_101 {dimension_numbers = #tpu.dot_dimension_numbers<[1], [0], [0], [1], [0, 0, 1, 1], [], []>} : vector<12x240xf32>, vector<240x120xf32>, vector<12x120xf32> -> vector<12x120xf32>
    %147 = arith.maximumf %143, %146 : vector<12x120xf32>
    %148 = arith.maximumf %140, %147 : vector<12x120xf32>
    %c0_102 = arith.constant 0 : index
    %c0_103 = arith.constant 0 : index
    %149 = vector.load %arg3[%c0_102, %c0_103] : memref<1x120xf32, #tpu.memory_space<vmem>>, vector<1x120xf32>
    %150 = vector.broadcast %149 : vector<1x120xf32> to vector<12x120xf32>
    %151 = arith.addf %148, %150 : vector<12x120xf32>
    %cst_104 = arith.constant 0.000000e+00 : f32
    %152 = vector.broadcast %cst_104 : f32 to vector<12x120xf32>
    %153 = arith.maximumf %151, %152 : vector<12x120xf32>
    %cst_105 = arith.constant 0.000000e+00 : f32
    %154 = vector.broadcast %cst_105 : f32 to vector<8x160xf32>
    %155 = vector.extract_strided_slice %153 {offsets = [0, 0], sizes = [8, 80], strides = [1, 1]} : vector<12x120xf32> to vector<8x80xf32>
    %c0_106 = arith.constant 0 : index
    %c0_107 = arith.constant 0 : index
    %c0_108 = arith.constant 0 : index
    %156 = vector.load %arg6[%c0_106, %c0_107, %c0_108] : memref<25x80x160xf32, #tpu.memory_space<vmem>>, vector<1x80x160xf32>
    %157 = vector.shape_cast %156 : vector<1x80x160xf32> to vector<80x160xf32>
    %cst_109 = arith.constant dense<0.000000e+00> : vector<8x160xf32>
    %158 = tpu.matmul %155, %157, %cst_109 {dimension_numbers = #tpu.dot_dimension_numbers<[1], [0], [0], [1], [0, 0, 1, 1], [], []>} : vector<8x80xf32>, vector<80x160xf32>, vector<8x160xf32> -> vector<8x160xf32>
    %159 = arith.addf %154, %158 : vector<8x160xf32>
    %160 = vector.extract_strided_slice %153 {offsets = [0, 10], sizes = [8, 80], strides = [1, 1]} : vector<12x120xf32> to vector<8x80xf32>
    %c1_110 = arith.constant 1 : index
    %c0_111 = arith.constant 0 : index
    %c0_112 = arith.constant 0 : index
    %161 = vector.load %arg6[%c1_110, %c0_111, %c0_112] : memref<25x80x160xf32, #tpu.memory_space<vmem>>, vector<1x80x160xf32>
    %162 = vector.shape_cast %161 : vector<1x80x160xf32> to vector<80x160xf32>
    %cst_113 = arith.constant dense<0.000000e+00> : vector<8x160xf32>
    %163 = tpu.matmul %160, %162, %cst_113 {dimension_numbers = #tpu.dot_dimension_numbers<[1], [0], [0], [1], [0, 0, 1, 1], [], []>} : vector<8x80xf32>, vector<80x160xf32>, vector<8x160xf32> -> vector<8x160xf32>
    %164 = arith.addf %159, %163 : vector<8x160xf32>
    %165 = vector.extract_strided_slice %153 {offsets = [0, 20], sizes = [8, 80], strides = [1, 1]} : vector<12x120xf32> to vector<8x80xf32>
    %c2_114 = arith.constant 2 : index
    %c0_115 = arith.constant 0 : index
    %c0_116 = arith.constant 0 : index
    %166 = vector.load %arg6[%c2_114, %c0_115, %c0_116] : memref<25x80x160xf32, #tpu.memory_space<vmem>>, vector<1x80x160xf32>
    %167 = vector.shape_cast %166 : vector<1x80x160xf32> to vector<80x160xf32>
    %cst_117 = arith.constant dense<0.000000e+00> : vector<8x160xf32>
    %168 = tpu.matmul %165, %167, %cst_117 {dimension_numbers = #tpu.dot_dimension_numbers<[1], [0], [0], [1], [0, 0, 1, 1], [], []>} : vector<8x80xf32>, vector<80x160xf32>, vector<8x160xf32> -> vector<8x160xf32>
    %169 = arith.addf %164, %168 : vector<8x160xf32>
    %170 = vector.extract_strided_slice %153 {offsets = [0, 30], sizes = [8, 80], strides = [1, 1]} : vector<12x120xf32> to vector<8x80xf32>
    %c3_118 = arith.constant 3 : index
    %c0_119 = arith.constant 0 : index
    %c0_120 = arith.constant 0 : index
    %171 = vector.load %arg6[%c3_118, %c0_119, %c0_120] : memref<25x80x160xf32, #tpu.memory_space<vmem>>, vector<1x80x160xf32>
    %172 = vector.shape_cast %171 : vector<1x80x160xf32> to vector<80x160xf32>
    %cst_121 = arith.constant dense<0.000000e+00> : vector<8x160xf32>
    %173 = tpu.matmul %170, %172, %cst_121 {dimension_numbers = #tpu.dot_dimension_numbers<[1], [0], [0], [1], [0, 0, 1, 1], [], []>} : vector<8x80xf32>, vector<80x160xf32>, vector<8x160xf32> -> vector<8x160xf32>
    %174 = arith.addf %169, %173 : vector<8x160xf32>
    %175 = vector.extract_strided_slice %153 {offsets = [0, 40], sizes = [8, 80], strides = [1, 1]} : vector<12x120xf32> to vector<8x80xf32>
    %c4_122 = arith.constant 4 : index
    %c0_123 = arith.constant 0 : index
    %c0_124 = arith.constant 0 : index
    %176 = vector.load %arg6[%c4_122, %c0_123, %c0_124] : memref<25x80x160xf32, #tpu.memory_space<vmem>>, vector<1x80x160xf32>
    %177 = vector.shape_cast %176 : vector<1x80x160xf32> to vector<80x160xf32>
    %cst_125 = arith.constant dense<0.000000e+00> : vector<8x160xf32>
    %178 = tpu.matmul %175, %177, %cst_125 {dimension_numbers = #tpu.dot_dimension_numbers<[1], [0], [0], [1], [0, 0, 1, 1], [], []>} : vector<8x80xf32>, vector<80x160xf32>, vector<8x160xf32> -> vector<8x160xf32>
    %179 = arith.addf %174, %178 : vector<8x160xf32>
    %180 = vector.extract_strided_slice %153 {offsets = [1, 0], sizes = [8, 80], strides = [1, 1]} : vector<12x120xf32> to vector<8x80xf32>
    %c5_126 = arith.constant 5 : index
    %c0_127 = arith.constant 0 : index
    %c0_128 = arith.constant 0 : index
    %181 = vector.load %arg6[%c5_126, %c0_127, %c0_128] : memref<25x80x160xf32, #tpu.memory_space<vmem>>, vector<1x80x160xf32>
    %182 = vector.shape_cast %181 : vector<1x80x160xf32> to vector<80x160xf32>
    %cst_129 = arith.constant dense<0.000000e+00> : vector<8x160xf32>
    %183 = tpu.matmul %180, %182, %cst_129 {dimension_numbers = #tpu.dot_dimension_numbers<[1], [0], [0], [1], [0, 0, 1, 1], [], []>} : vector<8x80xf32>, vector<80x160xf32>, vector<8x160xf32> -> vector<8x160xf32>
    %184 = arith.addf %179, %183 : vector<8x160xf32>
    %185 = vector.extract_strided_slice %153 {offsets = [1, 10], sizes = [8, 80], strides = [1, 1]} : vector<12x120xf32> to vector<8x80xf32>
    %c6_130 = arith.constant 6 : index
    %c0_131 = arith.constant 0 : index
    %c0_132 = arith.constant 0 : index
    %186 = vector.load %arg6[%c6_130, %c0_131, %c0_132] : memref<25x80x160xf32, #tpu.memory_space<vmem>>, vector<1x80x160xf32>
    %187 = vector.shape_cast %186 : vector<1x80x160xf32> to vector<80x160xf32>
    %cst_133 = arith.constant dense<0.000000e+00> : vector<8x160xf32>
    %188 = tpu.matmul %185, %187, %cst_133 {dimension_numbers = #tpu.dot_dimension_numbers<[1], [0], [0], [1], [0, 0, 1, 1], [], []>} : vector<8x80xf32>, vector<80x160xf32>, vector<8x160xf32> -> vector<8x160xf32>
    %189 = arith.addf %184, %188 : vector<8x160xf32>
    %190 = vector.extract_strided_slice %153 {offsets = [1, 20], sizes = [8, 80], strides = [1, 1]} : vector<12x120xf32> to vector<8x80xf32>
    %c7_134 = arith.constant 7 : index
    %c0_135 = arith.constant 0 : index
    %c0_136 = arith.constant 0 : index
    %191 = vector.load %arg6[%c7_134, %c0_135, %c0_136] : memref<25x80x160xf32, #tpu.memory_space<vmem>>, vector<1x80x160xf32>
    %192 = vector.shape_cast %191 : vector<1x80x160xf32> to vector<80x160xf32>
    %cst_137 = arith.constant dense<0.000000e+00> : vector<8x160xf32>
    %193 = tpu.matmul %190, %192, %cst_137 {dimension_numbers = #tpu.dot_dimension_numbers<[1], [0], [0], [1], [0, 0, 1, 1], [], []>} : vector<8x80xf32>, vector<80x160xf32>, vector<8x160xf32> -> vector<8x160xf32>
    %194 = arith.addf %189, %193 : vector<8x160xf32>
    %195 = vector.extract_strided_slice %153 {offsets = [1, 30], sizes = [8, 80], strides = [1, 1]} : vector<12x120xf32> to vector<8x80xf32>
    %c8_138 = arith.constant 8 : index
    %c0_139 = arith.constant 0 : index
    %c0_140 = arith.constant 0 : index
    %196 = vector.load %arg6[%c8_138, %c0_139, %c0_140] : memref<25x80x160xf32, #tpu.memory_space<vmem>>, vector<1x80x160xf32>
    %197 = vector.shape_cast %196 : vector<1x80x160xf32> to vector<80x160xf32>
    %cst_141 = arith.constant dense<0.000000e+00> : vector<8x160xf32>
    %198 = tpu.matmul %195, %197, %cst_141 {dimension_numbers = #tpu.dot_dimension_numbers<[1], [0], [0], [1], [0, 0, 1, 1], [], []>} : vector<8x80xf32>, vector<80x160xf32>, vector<8x160xf32> -> vector<8x160xf32>
    %199 = arith.addf %194, %198 : vector<8x160xf32>
    %200 = vector.extract_strided_slice %153 {offsets = [1, 40], sizes = [8, 80], strides = [1, 1]} : vector<12x120xf32> to vector<8x80xf32>
    %c9_142 = arith.constant 9 : index
    %c0_143 = arith.constant 0 : index
    %c0_144 = arith.constant 0 : index
    %201 = vector.load %arg6[%c9_142, %c0_143, %c0_144] : memref<25x80x160xf32, #tpu.memory_space<vmem>>, vector<1x80x160xf32>
    %202 = vector.shape_cast %201 : vector<1x80x160xf32> to vector<80x160xf32>
    %cst_145 = arith.constant dense<0.000000e+00> : vector<8x160xf32>
    %203 = tpu.matmul %200, %202, %cst_145 {dimension_numbers = #tpu.dot_dimension_numbers<[1], [0], [0], [1], [0, 0, 1, 1], [], []>} : vector<8x80xf32>, vector<80x160xf32>, vector<8x160xf32> -> vector<8x160xf32>
    %204 = arith.addf %199, %203 : vector<8x160xf32>
    %205 = vector.extract_strided_slice %153 {offsets = [2, 0], sizes = [8, 80], strides = [1, 1]} : vector<12x120xf32> to vector<8x80xf32>
    %c10_146 = arith.constant 10 : index
    %c0_147 = arith.constant 0 : index
    %c0_148 = arith.constant 0 : index
    %206 = vector.load %arg6[%c10_146, %c0_147, %c0_148] : memref<25x80x160xf32, #tpu.memory_space<vmem>>, vector<1x80x160xf32>
    %207 = vector.shape_cast %206 : vector<1x80x160xf32> to vector<80x160xf32>
    %cst_149 = arith.constant dense<0.000000e+00> : vector<8x160xf32>
    %208 = tpu.matmul %205, %207, %cst_149 {dimension_numbers = #tpu.dot_dimension_numbers<[1], [0], [0], [1], [0, 0, 1, 1], [], []>} : vector<8x80xf32>, vector<80x160xf32>, vector<8x160xf32> -> vector<8x160xf32>
    %209 = arith.addf %204, %208 : vector<8x160xf32>
    %210 = vector.extract_strided_slice %153 {offsets = [2, 10], sizes = [8, 80], strides = [1, 1]} : vector<12x120xf32> to vector<8x80xf32>
    %c11_150 = arith.constant 11 : index
    %c0_151 = arith.constant 0 : index
    %c0_152 = arith.constant 0 : index
    %211 = vector.load %arg6[%c11_150, %c0_151, %c0_152] : memref<25x80x160xf32, #tpu.memory_space<vmem>>, vector<1x80x160xf32>
    %212 = vector.shape_cast %211 : vector<1x80x160xf32> to vector<80x160xf32>
    %cst_153 = arith.constant dense<0.000000e+00> : vector<8x160xf32>
    %213 = tpu.matmul %210, %212, %cst_153 {dimension_numbers = #tpu.dot_dimension_numbers<[1], [0], [0], [1], [0, 0, 1, 1], [], []>} : vector<8x80xf32>, vector<80x160xf32>, vector<8x160xf32> -> vector<8x160xf32>
    %214 = arith.addf %209, %213 : vector<8x160xf32>
    %215 = vector.extract_strided_slice %153 {offsets = [2, 20], sizes = [8, 80], strides = [1, 1]} : vector<12x120xf32> to vector<8x80xf32>
    %c12_154 = arith.constant 12 : index
    %c0_155 = arith.constant 0 : index
    %c0_156 = arith.constant 0 : index
    %216 = vector.load %arg6[%c12_154, %c0_155, %c0_156] : memref<25x80x160xf32, #tpu.memory_space<vmem>>, vector<1x80x160xf32>
    %217 = vector.shape_cast %216 : vector<1x80x160xf32> to vector<80x160xf32>
    %cst_157 = arith.constant dense<0.000000e+00> : vector<8x160xf32>
    %218 = tpu.matmul %215, %217, %cst_157 {dimension_numbers = #tpu.dot_dimension_numbers<[1], [0], [0], [1], [0, 0, 1, 1], [], []>} : vector<8x80xf32>, vector<80x160xf32>, vector<8x160xf32> -> vector<8x160xf32>
    %219 = arith.addf %214, %218 : vector<8x160xf32>
    %220 = vector.extract_strided_slice %153 {offsets = [2, 30], sizes = [8, 80], strides = [1, 1]} : vector<12x120xf32> to vector<8x80xf32>
    %c13_158 = arith.constant 13 : index
    %c0_159 = arith.constant 0 : index
    %c0_160 = arith.constant 0 : index
    %221 = vector.load %arg6[%c13_158, %c0_159, %c0_160] : memref<25x80x160xf32, #tpu.memory_space<vmem>>, vector<1x80x160xf32>
    %222 = vector.shape_cast %221 : vector<1x80x160xf32> to vector<80x160xf32>
    %cst_161 = arith.constant dense<0.000000e+00> : vector<8x160xf32>
    %223 = tpu.matmul %220, %222, %cst_161 {dimension_numbers = #tpu.dot_dimension_numbers<[1], [0], [0], [1], [0, 0, 1, 1], [], []>} : vector<8x80xf32>, vector<80x160xf32>, vector<8x160xf32> -> vector<8x160xf32>
    %224 = arith.addf %219, %223 : vector<8x160xf32>
    %225 = vector.extract_strided_slice %153 {offsets = [2, 40], sizes = [8, 80], strides = [1, 1]} : vector<12x120xf32> to vector<8x80xf32>
    %c14_162 = arith.constant 14 : index
    %c0_163 = arith.constant 0 : index
    %c0_164 = arith.constant 0 : index
    %226 = vector.load %arg6[%c14_162, %c0_163, %c0_164] : memref<25x80x160xf32, #tpu.memory_space<vmem>>, vector<1x80x160xf32>
    %227 = vector.shape_cast %226 : vector<1x80x160xf32> to vector<80x160xf32>
    %cst_165 = arith.constant dense<0.000000e+00> : vector<8x160xf32>
    %228 = tpu.matmul %225, %227, %cst_165 {dimension_numbers = #tpu.dot_dimension_numbers<[1], [0], [0], [1], [0, 0, 1, 1], [], []>} : vector<8x80xf32>, vector<80x160xf32>, vector<8x160xf32> -> vector<8x160xf32>
    %229 = arith.addf %224, %228 : vector<8x160xf32>
    %230 = vector.extract_strided_slice %153 {offsets = [3, 0], sizes = [8, 80], strides = [1, 1]} : vector<12x120xf32> to vector<8x80xf32>
    %c15_166 = arith.constant 15 : index
    %c0_167 = arith.constant 0 : index
    %c0_168 = arith.constant 0 : index
    %231 = vector.load %arg6[%c15_166, %c0_167, %c0_168] : memref<25x80x160xf32, #tpu.memory_space<vmem>>, vector<1x80x160xf32>
    %232 = vector.shape_cast %231 : vector<1x80x160xf32> to vector<80x160xf32>
    %cst_169 = arith.constant dense<0.000000e+00> : vector<8x160xf32>
    %233 = tpu.matmul %230, %232, %cst_169 {dimension_numbers = #tpu.dot_dimension_numbers<[1], [0], [0], [1], [0, 0, 1, 1], [], []>} : vector<8x80xf32>, vector<80x160xf32>, vector<8x160xf32> -> vector<8x160xf32>
    %234 = arith.addf %229, %233 : vector<8x160xf32>
    %235 = vector.extract_strided_slice %153 {offsets = [3, 10], sizes = [8, 80], strides = [1, 1]} : vector<12x120xf32> to vector<8x80xf32>
    %c16_170 = arith.constant 16 : index
    %c0_171 = arith.constant 0 : index
    %c0_172 = arith.constant 0 : index
    %236 = vector.load %arg6[%c16_170, %c0_171, %c0_172] : memref<25x80x160xf32, #tpu.memory_space<vmem>>, vector<1x80x160xf32>
    %237 = vector.shape_cast %236 : vector<1x80x160xf32> to vector<80x160xf32>
    %cst_173 = arith.constant dense<0.000000e+00> : vector<8x160xf32>
    %238 = tpu.matmul %235, %237, %cst_173 {dimension_numbers = #tpu.dot_dimension_numbers<[1], [0], [0], [1], [0, 0, 1, 1], [], []>} : vector<8x80xf32>, vector<80x160xf32>, vector<8x160xf32> -> vector<8x160xf32>
    %239 = arith.addf %234, %238 : vector<8x160xf32>
    %240 = vector.extract_strided_slice %153 {offsets = [3, 20], sizes = [8, 80], strides = [1, 1]} : vector<12x120xf32> to vector<8x80xf32>
    %c17_174 = arith.constant 17 : index
    %c0_175 = arith.constant 0 : index
    %c0_176 = arith.constant 0 : index
    %241 = vector.load %arg6[%c17_174, %c0_175, %c0_176] : memref<25x80x160xf32, #tpu.memory_space<vmem>>, vector<1x80x160xf32>
    %242 = vector.shape_cast %241 : vector<1x80x160xf32> to vector<80x160xf32>
    %cst_177 = arith.constant dense<0.000000e+00> : vector<8x160xf32>
    %243 = tpu.matmul %240, %242, %cst_177 {dimension_numbers = #tpu.dot_dimension_numbers<[1], [0], [0], [1], [0, 0, 1, 1], [], []>} : vector<8x80xf32>, vector<80x160xf32>, vector<8x160xf32> -> vector<8x160xf32>
    %244 = arith.addf %239, %243 : vector<8x160xf32>
    %245 = vector.extract_strided_slice %153 {offsets = [3, 30], sizes = [8, 80], strides = [1, 1]} : vector<12x120xf32> to vector<8x80xf32>
    %c18_178 = arith.constant 18 : index
    %c0_179 = arith.constant 0 : index
    %c0_180 = arith.constant 0 : index
    %246 = vector.load %arg6[%c18_178, %c0_179, %c0_180] : memref<25x80x160xf32, #tpu.memory_space<vmem>>, vector<1x80x160xf32>
    %247 = vector.shape_cast %246 : vector<1x80x160xf32> to vector<80x160xf32>
    %cst_181 = arith.constant dense<0.000000e+00> : vector<8x160xf32>
    %248 = tpu.matmul %245, %247, %cst_181 {dimension_numbers = #tpu.dot_dimension_numbers<[1], [0], [0], [1], [0, 0, 1, 1], [], []>} : vector<8x80xf32>, vector<80x160xf32>, vector<8x160xf32> -> vector<8x160xf32>
    %249 = arith.addf %244, %248 : vector<8x160xf32>
    %250 = vector.extract_strided_slice %153 {offsets = [3, 40], sizes = [8, 80], strides = [1, 1]} : vector<12x120xf32> to vector<8x80xf32>
    %c19_182 = arith.constant 19 : index
    %c0_183 = arith.constant 0 : index
    %c0_184 = arith.constant 0 : index
    %251 = vector.load %arg6[%c19_182, %c0_183, %c0_184] : memref<25x80x160xf32, #tpu.memory_space<vmem>>, vector<1x80x160xf32>
    %252 = vector.shape_cast %251 : vector<1x80x160xf32> to vector<80x160xf32>
    %cst_185 = arith.constant dense<0.000000e+00> : vector<8x160xf32>
    %253 = tpu.matmul %250, %252, %cst_185 {dimension_numbers = #tpu.dot_dimension_numbers<[1], [0], [0], [1], [0, 0, 1, 1], [], []>} : vector<8x80xf32>, vector<80x160xf32>, vector<8x160xf32> -> vector<8x160xf32>
    %254 = arith.addf %249, %253 : vector<8x160xf32>
    %255 = vector.extract_strided_slice %153 {offsets = [4, 0], sizes = [8, 80], strides = [1, 1]} : vector<12x120xf32> to vector<8x80xf32>
    %c20_186 = arith.constant 20 : index
    %c0_187 = arith.constant 0 : index
    %c0_188 = arith.constant 0 : index
    %256 = vector.load %arg6[%c20_186, %c0_187, %c0_188] : memref<25x80x160xf32, #tpu.memory_space<vmem>>, vector<1x80x160xf32>
    %257 = vector.shape_cast %256 : vector<1x80x160xf32> to vector<80x160xf32>
    %cst_189 = arith.constant dense<0.000000e+00> : vector<8x160xf32>
    %258 = tpu.matmul %255, %257, %cst_189 {dimension_numbers = #tpu.dot_dimension_numbers<[1], [0], [0], [1], [0, 0, 1, 1], [], []>} : vector<8x80xf32>, vector<80x160xf32>, vector<8x160xf32> -> vector<8x160xf32>
    %259 = arith.addf %254, %258 : vector<8x160xf32>
    %260 = vector.extract_strided_slice %153 {offsets = [4, 10], sizes = [8, 80], strides = [1, 1]} : vector<12x120xf32> to vector<8x80xf32>
    %c21_190 = arith.constant 21 : index
    %c0_191 = arith.constant 0 : index
    %c0_192 = arith.constant 0 : index
    %261 = vector.load %arg6[%c21_190, %c0_191, %c0_192] : memref<25x80x160xf32, #tpu.memory_space<vmem>>, vector<1x80x160xf32>
    %262 = vector.shape_cast %261 : vector<1x80x160xf32> to vector<80x160xf32>
    %cst_193 = arith.constant dense<0.000000e+00> : vector<8x160xf32>
    %263 = tpu.matmul %260, %262, %cst_193 {dimension_numbers = #tpu.dot_dimension_numbers<[1], [0], [0], [1], [0, 0, 1, 1], [], []>} : vector<8x80xf32>, vector<80x160xf32>, vector<8x160xf32> -> vector<8x160xf32>
    %264 = arith.addf %259, %263 : vector<8x160xf32>
    %265 = vector.extract_strided_slice %153 {offsets = [4, 20], sizes = [8, 80], strides = [1, 1]} : vector<12x120xf32> to vector<8x80xf32>
    %c22_194 = arith.constant 22 : index
    %c0_195 = arith.constant 0 : index
    %c0_196 = arith.constant 0 : index
    %266 = vector.load %arg6[%c22_194, %c0_195, %c0_196] : memref<25x80x160xf32, #tpu.memory_space<vmem>>, vector<1x80x160xf32>
    %267 = vector.shape_cast %266 : vector<1x80x160xf32> to vector<80x160xf32>
    %cst_197 = arith.constant dense<0.000000e+00> : vector<8x160xf32>
    %268 = tpu.matmul %265, %267, %cst_197 {dimension_numbers = #tpu.dot_dimension_numbers<[1], [0], [0], [1], [0, 0, 1, 1], [], []>} : vector<8x80xf32>, vector<80x160xf32>, vector<8x160xf32> -> vector<8x160xf32>
    %269 = arith.addf %264, %268 : vector<8x160xf32>
    %270 = vector.extract_strided_slice %153 {offsets = [4, 30], sizes = [8, 80], strides = [1, 1]} : vector<12x120xf32> to vector<8x80xf32>
    %c23_198 = arith.constant 23 : index
    %c0_199 = arith.constant 0 : index
    %c0_200 = arith.constant 0 : index
    %271 = vector.load %arg6[%c23_198, %c0_199, %c0_200] : memref<25x80x160xf32, #tpu.memory_space<vmem>>, vector<1x80x160xf32>
    %272 = vector.shape_cast %271 : vector<1x80x160xf32> to vector<80x160xf32>
    %cst_201 = arith.constant dense<0.000000e+00> : vector<8x160xf32>
    %273 = tpu.matmul %270, %272, %cst_201 {dimension_numbers = #tpu.dot_dimension_numbers<[1], [0], [0], [1], [0, 0, 1, 1], [], []>} : vector<8x80xf32>, vector<80x160xf32>, vector<8x160xf32> -> vector<8x160xf32>
    %274 = arith.addf %269, %273 : vector<8x160xf32>
    %275 = vector.extract_strided_slice %153 {offsets = [4, 40], sizes = [8, 80], strides = [1, 1]} : vector<12x120xf32> to vector<8x80xf32>
    %c24_202 = arith.constant 24 : index
    %c0_203 = arith.constant 0 : index
    %c0_204 = arith.constant 0 : index
    %276 = vector.load %arg6[%c24_202, %c0_203, %c0_204] : memref<25x80x160xf32, #tpu.memory_space<vmem>>, vector<1x80x160xf32>
    %277 = vector.shape_cast %276 : vector<1x80x160xf32> to vector<80x160xf32>
    %cst_205 = arith.constant dense<0.000000e+00> : vector<8x160xf32>
    %278 = tpu.matmul %275, %277, %cst_205 {dimension_numbers = #tpu.dot_dimension_numbers<[1], [0], [0], [1], [0, 0, 1, 1], [], []>} : vector<8x80xf32>, vector<80x160xf32>, vector<8x160xf32> -> vector<8x160xf32>
    %279 = arith.addf %274, %278 : vector<8x160xf32>
    %c0_206 = arith.constant 0 : index
    %c0_207 = arith.constant 0 : index
    %c0_208 = arith.constant 0 : index
    %280 = vector.load %arg8[%c0_206, %c0_207, %c0_208] : memref<2x4x8xf32, #tpu.memory_space<vmem>>, vector<1x4x8xf32>
    %281 = vector.shape_cast %280 : vector<1x4x8xf32> to vector<4x8xf32>
    %cst_209 = arith.constant dense<0.000000e+00> : vector<4x160xf32>
    %282 = tpu.matmul %281, %279, %cst_209 {dimension_numbers = #tpu.dot_dimension_numbers<[1], [0], [0], [1], [0, 0, 1, 1], [], []>} : vector<4x8xf32>, vector<8x160xf32>, vector<4x160xf32> -> vector<4x160xf32>
    %c1_210 = arith.constant 1 : index
    %c0_211 = arith.constant 0 : index
    %c0_212 = arith.constant 0 : index
    %283 = vector.load %arg8[%c1_210, %c0_211, %c0_212] : memref<2x4x8xf32, #tpu.memory_space<vmem>>, vector<1x4x8xf32>
    %284 = vector.shape_cast %283 : vector<1x4x8xf32> to vector<4x8xf32>
    %cst_213 = arith.constant dense<0.000000e+00> : vector<4x160xf32>
    %285 = tpu.matmul %284, %279, %cst_213 {dimension_numbers = #tpu.dot_dimension_numbers<[1], [0], [0], [1], [0, 0, 1, 1], [], []>} : vector<4x8xf32>, vector<8x160xf32>, vector<4x160xf32> -> vector<4x160xf32>
    %c0_214 = arith.constant 0 : index
    %c0_215 = arith.constant 0 : index
    %c0_216 = arith.constant 0 : index
    %286 = vector.load %arg9[%c0_214, %c0_215, %c0_216] : memref<2x160x80xf32, #tpu.memory_space<vmem>>, vector<1x160x80xf32>
    %287 = vector.shape_cast %286 : vector<1x160x80xf32> to vector<160x80xf32>
    %cst_217 = arith.constant dense<0.000000e+00> : vector<4x80xf32>
    %288 = tpu.matmul %282, %287, %cst_217 {dimension_numbers = #tpu.dot_dimension_numbers<[1], [0], [0], [1], [0, 0, 1, 1], [], []>} : vector<4x160xf32>, vector<160x80xf32>, vector<4x80xf32> -> vector<4x80xf32>
    %c1_218 = arith.constant 1 : index
    %c0_219 = arith.constant 0 : index
    %c0_220 = arith.constant 0 : index
    %289 = vector.load %arg9[%c1_218, %c0_219, %c0_220] : memref<2x160x80xf32, #tpu.memory_space<vmem>>, vector<1x160x80xf32>
    %290 = vector.shape_cast %289 : vector<1x160x80xf32> to vector<160x80xf32>
    %cst_221 = arith.constant dense<0.000000e+00> : vector<4x80xf32>
    %291 = tpu.matmul %282, %290, %cst_221 {dimension_numbers = #tpu.dot_dimension_numbers<[1], [0], [0], [1], [0, 0, 1, 1], [], []>} : vector<4x160xf32>, vector<160x80xf32>, vector<4x80xf32> -> vector<4x80xf32>
    %292 = arith.maximumf %288, %291 : vector<4x80xf32>
    %c0_222 = arith.constant 0 : index
    %c0_223 = arith.constant 0 : index
    %c0_224 = arith.constant 0 : index
    %293 = vector.load %arg9[%c0_222, %c0_223, %c0_224] : memref<2x160x80xf32, #tpu.memory_space<vmem>>, vector<1x160x80xf32>
    %294 = vector.shape_cast %293 : vector<1x160x80xf32> to vector<160x80xf32>
    %cst_225 = arith.constant dense<0.000000e+00> : vector<4x80xf32>
    %295 = tpu.matmul %285, %294, %cst_225 {dimension_numbers = #tpu.dot_dimension_numbers<[1], [0], [0], [1], [0, 0, 1, 1], [], []>} : vector<4x160xf32>, vector<160x80xf32>, vector<4x80xf32> -> vector<4x80xf32>
    %c1_226 = arith.constant 1 : index
    %c0_227 = arith.constant 0 : index
    %c0_228 = arith.constant 0 : index
    %296 = vector.load %arg9[%c1_226, %c0_227, %c0_228] : memref<2x160x80xf32, #tpu.memory_space<vmem>>, vector<1x160x80xf32>
    %297 = vector.shape_cast %296 : vector<1x160x80xf32> to vector<160x80xf32>
    %cst_229 = arith.constant dense<0.000000e+00> : vector<4x80xf32>
    %298 = tpu.matmul %285, %297, %cst_229 {dimension_numbers = #tpu.dot_dimension_numbers<[1], [0], [0], [1], [0, 0, 1, 1], [], []>} : vector<4x160xf32>, vector<160x80xf32>, vector<4x80xf32> -> vector<4x80xf32>
    %299 = arith.maximumf %295, %298 : vector<4x80xf32>
    %300 = arith.maximumf %292, %299 : vector<4x80xf32>
    %c0_230 = arith.constant 0 : index
    %c0_231 = arith.constant 0 : index
    %301 = vector.load %arg7[%c0_230, %c0_231] : memref<1x80xf32, #tpu.memory_space<vmem>>, vector<1x80xf32>
    %302 = vector.broadcast %301 : vector<1x80xf32> to vector<4x80xf32>
    %303 = arith.addf %300, %302 : vector<4x80xf32>
    %cst_232 = arith.constant 0.000000e+00 : f32
    %304 = vector.broadcast %cst_232 : f32 to vector<4x80xf32>
    %305 = arith.maximumf %303, %304 : vector<4x80xf32>
    %c0_233 = arith.constant 0 : index
    %c0_234 = arith.constant 0 : index
    %306 = vector.load %arg11[%c0_233, %c0_234] : memref<1x50xf32, #tpu.memory_space<vmem>>, vector<1x50xf32>
    %307 = vector.extract_strided_slice %305 {offsets = [0, 0], sizes = [1, 80], strides = [1, 1]} : vector<4x80xf32> to vector<1x80xf32>
    %c0_235 = arith.constant 0 : index
    %c0_236 = arith.constant 0 : index
    %c0_237 = arith.constant 0 : index
    %308 = vector.load %arg10[%c0_235, %c0_236, %c0_237] : memref<4x80x50xf32, #tpu.memory_space<vmem>>, vector<1x80x50xf32>
    %309 = vector.shape_cast %308 : vector<1x80x50xf32> to vector<80x50xf32>
    %cst_238 = arith.constant dense<0.000000e+00> : vector<1x50xf32>
    %310 = tpu.matmul %307, %309, %cst_238 {dimension_numbers = #tpu.dot_dimension_numbers<[1], [0], [0], [1], [0, 0, 1, 1], [], []>} : vector<1x80xf32>, vector<80x50xf32>, vector<1x50xf32> -> vector<1x50xf32>
    %311 = arith.addf %306, %310 : vector<1x50xf32>
    %312 = vector.extract_strided_slice %305 {offsets = [1, 0], sizes = [1, 80], strides = [1, 1]} : vector<4x80xf32> to vector<1x80xf32>
    %c1_239 = arith.constant 1 : index
    %c0_240 = arith.constant 0 : index
    %c0_241 = arith.constant 0 : index
    %313 = vector.load %arg10[%c1_239, %c0_240, %c0_241] : memref<4x80x50xf32, #tpu.memory_space<vmem>>, vector<1x80x50xf32>
    %314 = vector.shape_cast %313 : vector<1x80x50xf32> to vector<80x50xf32>
    %cst_242 = arith.constant dense<0.000000e+00> : vector<1x50xf32>
    %315 = tpu.matmul %312, %314, %cst_242 {dimension_numbers = #tpu.dot_dimension_numbers<[1], [0], [0], [1], [0, 0, 1, 1], [], []>} : vector<1x80xf32>, vector<80x50xf32>, vector<1x50xf32> -> vector<1x50xf32>
    %316 = arith.addf %311, %315 : vector<1x50xf32>
    %317 = vector.extract_strided_slice %305 {offsets = [2, 0], sizes = [1, 80], strides = [1, 1]} : vector<4x80xf32> to vector<1x80xf32>
    %c2_243 = arith.constant 2 : index
    %c0_244 = arith.constant 0 : index
    %c0_245 = arith.constant 0 : index
    %318 = vector.load %arg10[%c2_243, %c0_244, %c0_245] : memref<4x80x50xf32, #tpu.memory_space<vmem>>, vector<1x80x50xf32>
    %319 = vector.shape_cast %318 : vector<1x80x50xf32> to vector<80x50xf32>
    %cst_246 = arith.constant dense<0.000000e+00> : vector<1x50xf32>
    %320 = tpu.matmul %317, %319, %cst_246 {dimension_numbers = #tpu.dot_dimension_numbers<[1], [0], [0], [1], [0, 0, 1, 1], [], []>} : vector<1x80xf32>, vector<80x50xf32>, vector<1x50xf32> -> vector<1x50xf32>
    %321 = arith.addf %316, %320 : vector<1x50xf32>
    %322 = vector.extract_strided_slice %305 {offsets = [3, 0], sizes = [1, 80], strides = [1, 1]} : vector<4x80xf32> to vector<1x80xf32>
    %c3_247 = arith.constant 3 : index
    %c0_248 = arith.constant 0 : index
    %c0_249 = arith.constant 0 : index
    %323 = vector.load %arg10[%c3_247, %c0_248, %c0_249] : memref<4x80x50xf32, #tpu.memory_space<vmem>>, vector<1x80x50xf32>
    %324 = vector.shape_cast %323 : vector<1x80x50xf32> to vector<80x50xf32>
    %cst_250 = arith.constant dense<0.000000e+00> : vector<1x50xf32>
    %325 = tpu.matmul %322, %324, %cst_250 {dimension_numbers = #tpu.dot_dimension_numbers<[1], [0], [0], [1], [0, 0, 1, 1], [], []>} : vector<1x80xf32>, vector<80x50xf32>, vector<1x50xf32> -> vector<1x50xf32>
    %326 = arith.addf %321, %325 : vector<1x50xf32>
    %cst_251 = arith.constant 0.000000e+00 : f32
    %327 = vector.broadcast %cst_251 : f32 to vector<1x50xf32>
    %328 = arith.maximumf %326, %327 : vector<1x50xf32>
    %c0_252 = arith.constant 0 : index
    %c0_253 = arith.constant 0 : index
    %329 = vector.load %arg12[%c0_252, %c0_253] : memref<50x10xf32, #tpu.memory_space<vmem>>, vector<50x10xf32>
    %cst_254 = arith.constant dense<0.000000e+00> : vector<1x10xf32>
    %330 = tpu.matmul %328, %329, %cst_254 {dimension_numbers = #tpu.dot_dimension_numbers<[1], [0], [0], [1], [0, 0, 1, 1], [], []>} : vector<1x50xf32>, vector<50x10xf32>, vector<1x10xf32> -> vector<1x10xf32>
    %c0_255 = arith.constant 0 : index
    %c0_256 = arith.constant 0 : index
    %331 = vector.load %arg13[%c0_255, %c0_256] : memref<1x10xf32, #tpu.memory_space<vmem>>, vector<1x10xf32>
    %332 = arith.addf %330, %331 : vector<1x10xf32>
    %cst_257 = arith.constant dense<0xFF800000> : vector<1xf32>
    %333 = vector.multi_reduction <maximumf>, %332, %cst_257 [1] : vector<1x10xf32> to vector<1xf32>
    %334 = vector.shape_cast %333 : vector<1xf32> to vector<1x1xf32>
    %335 = vector.broadcast %334 : vector<1x1xf32> to vector<1x10xf32>
    %336 = arith.subf %332, %335 : vector<1x10xf32>
    %337 = math.exp %336 : vector<1x10xf32>
    %cst_258 = arith.constant dense<0.000000e+00> : vector<1xf32>
    %338 = vector.multi_reduction <add>, %337, %cst_258 [1] : vector<1x10xf32> to vector<1xf32>
    %339 = vector.shape_cast %338 : vector<1xf32> to vector<1x1xf32>
    %340 = math.log %339 : vector<1x1xf32>
    %341 = arith.addf %334, %340 : vector<1x1xf32>
    %342 = vector.broadcast %341 : vector<1x1xf32> to vector<1x10xf32>
    %343 = arith.subf %332, %342 : vector<1x10xf32>
    %c0_259 = arith.constant 0 : index
    %c0_260 = arith.constant 0 : index
    %c0_261 = arith.constant 0 : index
    %344 = vector.load %arg14[%c0_259, %c0_260, %c0_261] : memref<1x1x10xf32, #tpu.memory_space<vmem>>, vector<1x1x10xf32>
    %345 = vector.shape_cast %344 : vector<1x1x10xf32> to vector<1x10xf32>
    %346 = vector.shape_cast %343 : vector<1x10xf32> to vector<1x1x10xf32>
    tpu.vector_store %arg14[%c0_259, %c0_260, %c0_261], %346 {strides = array<i32>} : memref<1x1x10xf32, #tpu.memory_space<vmem>>, vector<1x1x10xf32>,
    return
  }
  func.func @transform_0(%arg0: i32) -> (i32, i32, i32) {
    %c0_i32 = arith.constant 0 : i32
    %c0_i32_0 = arith.constant 0 : i32
    %c0_i32_1 = arith.constant 0 : i32
    return %arg0, %c0_i32, %c0_i32_0 : i32, i32, i32
  }
  func.func @transform_1(%arg0: i32) -> (i32, i32, i32) {
    %c0_i32 = arith.constant 0 : i32
    %c0_i32_0 = arith.constant 0 : i32
    %c0_i32_1 = arith.constant 0 : i32
    %c0_i32_2 = arith.constant 0 : i32
    return %c0_i32, %c0_i32_0, %c0_i32_1 : i32, i32, i32
  }
  func.func @transform_2(%arg0: i32) -> (i32, i32) {
    %c0_i32 = arith.constant 0 : i32
    %c0_i32_0 = arith.constant 0 : i32
    %c0_i32_1 = arith.constant 0 : i32
    return %c0_i32, %c0_i32_0 : i32, i32
  }
  func.func @transform_3(%arg0: i32) -> (i32, i32, i32) {
    %c0_i32 = arith.constant 0 : i32
    %c0_i32_0 = arith.constant 0 : i32
    %c0_i32_1 = arith.constant 0 : i32
    %c0_i32_2 = arith.constant 0 : i32
    return %c0_i32, %c0_i32_0, %c0_i32_1 : i32, i32, i32
  }
  func.func @transform_4(%arg0: i32) -> (i32, i32, i32) {
    %c0_i32 = arith.constant 0 : i32
    %c0_i32_0 = arith.constant 0 : i32
    %c0_i32_1 = arith.constant 0 : i32
    %c0_i32_2 = arith.constant 0 : i32
    return %c0_i32, %c0_i32_0, %c0_i32_1 : i32, i32, i32
  }
  func.func @transform_5(%arg0: i32) -> (i32, i32, i32) {
    %c0_i32 = arith.constant 0 : i32
    %c0_i32_0 = arith.constant 0 : i32
    %c0_i32_1 = arith.constant 0 : i32
    %c0_i32_2 = arith.constant 0 : i32
    return %c0_i32, %c0_i32_0, %c0_i32_1 : i32, i32, i32
  }
  func.func @transform_6(%arg0: i32) -> (i32, i32) {
    %c0_i32 = arith.constant 0 : i32
    %c0_i32_0 = arith.constant 0 : i32
    %c0_i32_1 = arith.constant 0 : i32
    return %c0_i32, %c0_i32_0 : i32, i32
  }
  func.func @transform_7(%arg0: i32) -> (i32, i32, i32) {
    %c0_i32 = arith.constant 0 : i32
    %c0_i32_0 = arith.constant 0 : i32
    %c0_i32_1 = arith.constant 0 : i32
    %c0_i32_2 = arith.constant 0 : i32
    return %c0_i32, %c0_i32_0, %c0_i32_1 : i32, i32, i32
  }
  func.func @transform_8(%arg0: i32) -> (i32, i32, i32) {
    %c0_i32 = arith.constant 0 : i32
    %c0_i32_0 = arith.constant 0 : i32
    %c0_i32_1 = arith.constant 0 : i32
    %c0_i32_2 = arith.constant 0 : i32
    return %c0_i32, %c0_i32_0, %c0_i32_1 : i32, i32, i32
  }
  func.func @transform_9(%arg0: i32) -> (i32, i32, i32) {
    %c0_i32 = arith.constant 0 : i32
    %c0_i32_0 = arith.constant 0 : i32
    %c0_i32_1 = arith.constant 0 : i32
    %c0_i32_2 = arith.constant 0 : i32
    return %c0_i32, %c0_i32_0, %c0_i32_1 : i32, i32, i32
  }
  func.func @transform_10(%arg0: i32) -> (i32, i32) {
    %c0_i32 = arith.constant 0 : i32
    %c0_i32_0 = arith.constant 0 : i32
    %c0_i32_1 = arith.constant 0 : i32
    return %c0_i32, %c0_i32_0 : i32, i32
  }
  func.func @transform_11(%arg0: i32) -> (i32, i32) {
    %c0_i32 = arith.constant 0 : i32
    %c0_i32_0 = arith.constant 0 : i32
    %c0_i32_1 = arith.constant 0 : i32
    return %c0_i32, %c0_i32_0 : i32, i32
  }
  func.func @transform_12(%arg0: i32) -> (i32, i32) {
    %c0_i32 = arith.constant 0 : i32
    %c0_i32_0 = arith.constant 0 : i32
    %c0_i32_1 = arith.constant 0 : i32
    return %c0_i32, %c0_i32_0 : i32, i32
  }
  func.func @transform_13(%arg0: i32) -> (i32, i32, i32) {
    %c0_i32 = arith.constant 0 : i32
    %c0_i32_0 = arith.constant 0 : i32
    %c0_i32_1 = arith.constant 0 : i32
    return %arg0, %c0_i32, %c0_i32_0 : i32, i32, i32
  }
}

</mosaic_0001>

<bundles_post_ra>
// kernel: tpu_custom_call.1
= control target key start
LH: loop header
LB: loop body
LE: loop exit
PB: predicated region body
PF: predicated region fallthrough
CT: control target
= control target key end

     0   :  { %s10812_s0 = inlined_call_operand.vmem [shape: f32[2,28,28], index: 0, kind: input, shape index: {}]   ;;  %s10813_s1 = inlined_call_operand.hbm [shape: f32[25,24,240], index: 1, kind: input, shape index: {}]   ;;  %s10814_s2 = inlined_call_operand.hbm [shape: f32[1,120], index: 2, kind: input, shape index: {}]   ;;  %s10815_s3 = inlined_call_operand.vmem [shape: f32[2,12,24], index: 3, kind: input, shape index: {}]   ;;  %s10816_s4 = inlined_call_operand.hbm [shape: f32[2,240,120], index: 4, kind: input, shape index: {}]   ;;  %s10817_s5 = inlined_call_operand.hbm [shape: f32[25,80,160], index: 5, kind: input, shape index: {}]   ;;  %s10818_s6 = inlined_call_operand.hbm [shape: f32[1,80], index: 6, kind: input, shape index: {}]   ;;  %s10819_s7 = inlined_call_operand.hbm [shape: f32[2,4,8], index: 7, kind: input, shape index: {}]   ;;  %s10820_s8 = inlined_call_operand.hbm [shape: f32[2,160,80], index: 8, kind: input, shape index: {}]   ;;  %s10821_s9 = inlined_call_operand.vmem [shape: f32[4,80,50], index: 9, kind: input, shape index: {}]   ;;  %s10822_s10 = inlined_call_operand.hbm [shape: f32[1,50], index: 10, kind: input, shape index: {}]   ;;  %s10823_s11 = inlined_call_operand.vmem [shape: f32[50,10], index: 11, kind: input, shape index: {}]   ;;  %s10824_s12 = inlined_call_operand.hbm [shape: f32[1,10], index: 12, kind: input, shape index: {}]   ;;  %s10825_s13 = inlined_call_operand.hbm [shape: f32[2,1,10], index: 13, kind: output, shape index: {}]  }
   0x1   :  { %10841 = sst [smem:[#allocation32_spill]] %s10814_s2 }
   0x2   :  { %10842 = sst [smem:[#allocation33_spill]] %s10817_s5 }
   0x3   :  { %10843 = sst [smem:[#allocation34_spill]] %s10825_s13 }
   0x4   :  { %18 = vsyncpa [#allocation3], 0 }
   0x5   :  { %19 = vsyncpa [#allocation6], 0 }
   0x6   :  { %20 = vsyncpa [#allocation9], 0 }
   0x7   :  { %21 = vsyncpa [#allocation12], 0 }
   0x8   :  { %22 = vsyncpa [#allocation15], 0 }
   0x9   :  { %23 = vsyncpa [#allocation4], 0 }
   0xa   :  { %25 = vsyncpa [#allocation4 + $0x1], 0  ;;  %s9468_s25 = smov 0   ;;  %s9470_s26 = smov 0  }
   0xb   :  { %s9472_s27 = smov 0   ;;  %s9474_s28 = smov 0  }
   0xc LB: > { %10844 = sst [smem:[#allocation24_spill]] %s9357_s25  ;;  %s9489_s29 = sadd.s32 4294967295, %s9369_s28   ;;  %s9369_s28 = sphi %s9474_s28, %s10880_s28   ;;  %s9365_s27 = sphi %s9472_s27, %s10883_s27   ;;  %s9361_s26 = sphi %s9470_s26, %s10882_s26   ;;  %s9357_s25 = sphi %s9468_s25, %s10881_s25  }
   0xd   : > { %10845 = sst [smem:[#allocation25_spill]] %s9361_s26  ;;  %s7361_s30 = sadd.s32 4294967294, %s9369_s28  }
   0xe   : > { %10846 = sst [smem:[#allocation26_spill]] %s9365_s27  ;;  %s9493_s14 = sadd.s32 1, %s9369_s28  }
   0xf   : > { %10847 = sst [smem:[#allocation27_spill]] %s9369_s28  ;;  %s316_s15 = sadd.s32 1, %s9365_s27 }
  0x10   : > { %10848 = sst [smem:[#allocation28_spill]] %s9493_s14  ;;  %s313_s16 = ssub.s32 %s9369_s28, %s9493_s14 }
  0x11   : > { %p326_p0 = scmp.ne.s32.totalorder %s9365_s27, %s9361_s26  ;;  %p314_p1 = scmp.eq.s32.totalorder %s313_s16, 0 }
  0x12   : > { %p327_p2 = scmp.eq.s32.totalorder %s9489_s29, 1  ;;  %p332_p3 = scmp.ne.s32.totalorder %s9361_s26, %s9357_s25 }
  0x13   : > { %p333_p4 = scmp.eq.s32.totalorder %s7361_s30, 1  ;;  %p7362_p7 = scmp.ge.s32.totalorder %s9369_s28, 1 }
  0x14   : > { %s9504_s17 = scalar_select %p314_p1, %s9365_s27, %s316_s15  }
  0x15   : > { %p9506_p5 = por %p327_p2, %p326_p0  ;;  %p9510_p6 = por %p333_p4, %p332_p3 }
  0x16   : > { %10849 = sst [smem:[#allocation29_spill]] %s9504_s17  ;;  %p340_p8 = scmp.lt.s32.totalorder %s9369_s28, 3 }
  0x17   : > { %s10850_s18 = scalar_select %p9506_p5, 1, 0 }
  0x18   : > { %s10852_s19 = scalar_select %p9510_p6, 1, 0 }
  0x19   : > { %10851 = sst [smem:[#allocation30_spill]] %s10850_s18  ;;  %p10831_p9 = scmp.eq.s32.totalorder %s9489_s29, 0 }
  0x1a   : > { %10853 = sst [smem:[#allocation31_spill]] %s10852_s19  ;;  %p9517_p10 = pnand %p7362_p7, %p340_p8 }
  0x1b   : > { %s9371_s21 = smov [#allocation5]   ;;  %s9372_s24 = smov [#allocation8]  }
  0x1c   : > { %s10854_s20 = scalar_select %p9517_p10, 1, 0 }
  0x1d   : > { %s366_s22 = sshll.u32 %s9371_s21, 4  ;;  %p8922_p11 = pneg %p9517_p10  ;;  %s367_s22 = int_to_ptr.vmem [resolvable:$true] %s366_s22 }
  0x1e   : > { %s392_s30 = sshll.u32 %s9372_s24, 4  ;;  %s9373_s15 = smov [#allocation11]   ;;  %s9529_s30 = int_to_ptr.vmem [resolvable:$true] %s392_s30 }
  0x1f   : > { %p9525_p12 = pnand %p10831_p9, %p8922_p11  ;;  %s9531_s16 = sshll.u32 %s9373_s15, 4  ;;  %s417_s16 = int_to_ptr.vmem [resolvable:$true] %s9531_s16 }
  0x20   : > { %s10856_s2 = sld [smem:[#allocation32_spill]] }
  0x21   : > { %p9541_p0 = pneg %p9525_p12 }
  0x26   : > { %s9035_s21 = scalar_lea.hbm %s10856_s2, 16 }
  0x27   : > { %p9036_p13 = scmp.ne.s32.totalorder %s10856_s2, %s9035_s21  ;;  %p9042_p3 = scmp.lt.u32.totalorder %s9035_s21, %s10856_s2 }
  0x29   : > { %p9038_p1 = pnand %p9541_p0, %p9036_p13 }
  0x2b   : > { %p9039_p2 = pneg %p9038_p1 }
  0x2d   : > { %p9044_p4 = pnand %p9042_p3, %p9039_p2 }
  0x2f   : > { %9047 = shalt.err (!%p9044_p4)
}
  0x30   : > { %s9048_s27 = scalar_lea.vmem %s367_s22, 16  ;;  %s9055_s14 = scalar_lea.vmem %s367_s22, 32 }
  0x31   : > { %p9049_p7 = scmp.ne.s32.totalorder %s367_s22, %s9048_s27  ;;  %p9056_p9 = scmp.lt.s32.totalorder %s367_s22, %s367_s22 }
  0x32   : > { %p9057_p6 = scmp.lt.s32.totalorder %s9055_s14, %s9048_s27 }
  0x33   : > { %p9051_p8 = pnand %p9049_p7, %p9541_p0 }
  0x34   : > { %p9058_p5 = por %p9057_p6, %p9056_p9 }
  0x35   : > { %p9052_p11 = pneg %p9051_p8 }
  0x37   : > { %p9059_p10 = pnand %p9058_p5, %p9052_p11 }
  0x39   : > { %9062 = shalt.err (!%p9059_p10)
}
  0x3a   : > { %8928 = dma.hbm_to_vmem [thread:$0]  (!%p9525_p12), %s10856_s2, 16, %s367_s22, [#allocation6]  }
  0x3b   : > { %s10858_s5 = sld [smem:[#allocation33_spill]] }
  0x41   : > { %s9063_s15 = scalar_lea.hbm %s10858_s5, 64000 }
  0x42   : > { %p9064_p13 = scmp.ne.s32.totalorder %s10858_s5, %s9063_s15  ;;  %p9070_p5 = scmp.lt.u32.totalorder %s9063_s15, %s10858_s5 }
  0x44   : > { %p9066_p1 = pnand %p9064_p13, %p9541_p0 }
  0x46   : > { %p9067_p6 = pneg %p9066_p1 }
  0x48   : > { %p9072_p9 = pnand %p9070_p5, %p9067_p6 }
  0x4a   : > { %9075 = shalt.err (!%p9072_p9)
}
  0x4b   : > { %s9076_s22 = scalar_lea.vmem %s9529_s30, 64000  ;;  %p9084_p4 = scmp.lt.s32.totalorder %s9529_s30, %s9529_s30 }
  0x4c   : > { %p9077_p10 = scmp.ne.s32.totalorder %s9529_s30, %s9076_s22  ;;  %p9085_p7 = scmp.lt.s32.totalorder %s9076_s22, %s9076_s22 }
  0x4e   : > { %p9079_p2 = pnand %p9077_p10, %p9541_p0  ;;  %p9086_p8 = por %p9085_p7, %p9084_p4 }
  0x50   : > { %p9080_p3 = pneg %p9079_p2 }
  0x52   : > { %p9087_p11 = pnand %p9086_p8, %p9080_p3 }
  0x54   : > { %9090 = shalt.err (!%p9087_p11)
}
  0x55   : > { %s10836_s13 = smov 256   ;;  %s10837_s28 = smov 16  }
  0x56   : > { %8934 = dma.hbm_to_vmem [thread:$0]  (!%p9525_p12), %s10858_s5, 64000, %s9529_s30, [#allocation9], %s10836_s13, %s10836_s13, %s10837_s28  }
  0x57   : > { %s9091_s15 = scalar_lea.hbm %s10819_s7, 128 }
  0x58   : > { %p9092_p13 = scmp.ne.s32.totalorder %s10819_s7, %s9091_s15  ;;  %p9098_p5 = scmp.lt.u32.totalorder %s9091_s15, %s10819_s7 }
  0x5a   : > { %p9094_p1 = pnand %p9092_p13, %p9541_p0 }
  0x5c   : > { %p9095_p6 = pneg %p9094_p1 }
  0x5e   : > { %p9100_p9 = pnand %p9098_p5, %p9095_p6 }
  0x60   : > { %9103 = shalt.err (!%p9100_p9)
}
  0x61   : > { %s9104_s17 = scalar_lea.vmem %s417_s16, 128  ;;  %p9112_p4 = scmp.lt.s32.totalorder %s417_s16, %s417_s16 }
  0x62   : > { %p9105_p10 = scmp.ne.s32.totalorder %s417_s16, %s9104_s17  ;;  %p9113_p7 = scmp.lt.s32.totalorder %s9104_s17, %s9104_s17 }
  0x64   : > { %p9107_p2 = pnand %p9105_p10, %p9541_p0  ;;  %p9114_p8 = por %p9113_p7, %p9112_p4 }
  0x66   : > { %p9108_p3 = pneg %p9107_p2 }
  0x68   : > { %p9115_p11 = pnand %p9114_p8, %p9108_p3 }
  0x6a   : > { %9118 = shalt.err (!%p9115_p11)
}
  0x6b   : > { %s9376_s30 = smov 64   ;;  %s9377_s19 = smov 4  }
  0x6c   : > { %8940 = dma.hbm_to_vmem [thread:$0]  (!%p9525_p12), %s10819_s7, 128, %s417_s16, [#allocation12], %s9376_s30, %s9376_s30, %s9377_s19  }
  0x6d   : > { %s9378_s24 = smov [#allocation14]   ;;  %s9379_s27 = smov [#allocation2]  }
  0x6e   : > { %s446_s15 = sshll.u32 %s9378_s24, 4  ;;  %s352_s14 = sshll.u32 %s9379_s27, 4  ;;  %s447_s15 = int_to_ptr.vmem [resolvable:$true] %s446_s15  ;;  %s353_s14 = int_to_ptr.vmem [resolvable:$true] %s352_s14 }
  0x6f   : > { %s9119_s17 = scalar_lea.hbm %s10822_s10, 16 }
  0x70   : > { %p9120_p13 = scmp.ne.s32.totalorder %s10822_s10, %s9119_s17  ;;  %p9126_p5 = scmp.lt.u32.totalorder %s9119_s17, %s10822_s10 }
  0x72   : > { %p9122_p1 = pnand %p9120_p13, %p9541_p0 }
  0x74   : > { %p9123_p6 = pneg %p9122_p1 }
  0x76   : > { %p9128_p9 = pnand %p9126_p5, %p9123_p6 }
  0x78   : > { %9131 = shalt.err (!%p9128_p9)
}
  0x79   : > { %s9132_s16 = scalar_lea.vmem %s447_s15, 16  ;;  %s9139_s13 = scalar_lea.vmem %s447_s15, 32 }
  0x7a   : > { %p9133_p10 = scmp.ne.s32.totalorder %s447_s15, %s9132_s16  ;;  %p9140_p4 = scmp.lt.s32.totalorder %s447_s15, %s447_s15 }
  0x7b   : > { %p9141_p7 = scmp.lt.s32.totalorder %s9139_s13, %s9132_s16 }
  0x7c   : > { %p9135_p2 = pnand %p9133_p10, %p9541_p0 }
  0x7d   : > { %p9142_p8 = por %p9141_p7, %p9140_p4 }
  0x7e   : > { %p9136_p3 = pneg %p9135_p2 }
  0x80   : > { %p9143_p11 = pnand %p9142_p8, %p9136_p3 }
  0x82   : > { %9146 = shalt.err (!%p9143_p11)
}
  0x83   : > { %8946 = dma.hbm_to_vmem [thread:$0]  (!%p9525_p12), %s10822_s10, 16, %s447_s15, [#allocation15]  }
  0x84   : > { %s9147_s30 = scalar_lea.hbm %s10813_s1, 19200 }
  0x85   : > { %p9148_p13 = scmp.ne.s32.totalorder %s10813_s1, %s9147_s30  ;;  %p9154_p5 = scmp.lt.u32.totalorder %s9147_s30, %s10813_s1 }
  0x87   : > { %p9150_p1 = pnand %p9148_p13, %p9541_p0 }
  0x89   : > { %p9151_p6 = pneg %p9150_p1 }
  0x8b   : > { %p9156_p9 = pnand %p9154_p5, %p9151_p6 }
  0x8d   : > { %9159 = shalt.err (!%p9156_p9)
}
  0x8e   : > { %s9160_s27 = scalar_lea.vmem %s353_s14, 19200  ;;  %p9168_p4 = scmp.lt.s32.totalorder %s353_s14, %s353_s14 }
  0x8f   : > { %p9161_p10 = scmp.ne.s32.totalorder %s353_s14, %s9160_s27  ;;  %p9169_p7 = scmp.lt.s32.totalorder %s9160_s27, %s9160_s27 }
  0x91   : > { %p9163_p2 = pnand %p9161_p10, %p9541_p0  ;;  %p9170_p8 = por %p9169_p7, %p9168_p4 }
  0x93   : > { %p9164_p3 = pneg %p9163_p2 }
  0x95   : > { %p9171_p11 = pnand %p9170_p8, %p9164_p3 }
  0x97   : > { %9174 = shalt.err (!%p9171_p11)
}
  0x98   : > { %s10859_s15 = smov 16   ;;  %s10860_s22 = smov 256  }
  0x99   : > { %8925 = dma.hbm_to_vmem [thread:$0]  (!%p9525_p12), %s10813_s1, 19200, %s353_s14, [#allocation3], %s10860_s22, %s10860_s22, %s10859_s15  }
  0x9a   : > { %s9380_s13 = smov [#allocation7]   ;;  %s9175_s18 = scalar_lea.hbm %s10816_s4, 7680 }
  0x9b   : > { %s379_s5 = sshll.u32 %s9380_s13, 4  ;;  %p9176_p13 = scmp.ne.s32.totalorder %s10816_s4, %s9175_s18  ;;  %s380_s5 = int_to_ptr.vmem [resolvable:$true] %s379_s5 }
  0x9c   : > { %p9182_p5 = scmp.lt.u32.totalorder %s9175_s18, %s10816_s4 }
  0x9d   : > { %p9178_p1 = pnand %p9176_p13, %p9541_p0 }
  0x9f   : > { %p9179_p6 = pneg %p9178_p1 }
  0xa1   : > { %p9184_p9 = pnand %p9182_p5, %p9179_p6 }
  0xa3   : > { %9187 = shalt.err (!%p9184_p9)
}
  0xa4   : > { %s9188_s14 = scalar_lea.vmem %s380_s5, 7680  ;;  %p9196_p4 = scmp.lt.s32.totalorder %s380_s5, %s380_s5 }
  0xa5   : > { %p9189_p10 = scmp.ne.s32.totalorder %s380_s5, %s9188_s14  ;;  %p9197_p7 = scmp.lt.s32.totalorder %s9188_s14, %s9188_s14 }
  0xa7   : > { %p9191_p2 = pnand %p9189_p10, %p9541_p0  ;;  %p9198_p8 = por %p9197_p7, %p9196_p4 }
  0xa9   : > { %p9192_p3 = pneg %p9191_p2 }
  0xab   : > { %p9199_p11 = pnand %p9198_p8, %p9192_p3 }
  0xad   : > { %9202 = shalt.err (!%p9199_p11)
}
  0xae   : > { %s9381_s24 = smov 128   ;;  %s9382_s27 = smov 8  }
  0xaf   : > { %8931 = dma.hbm_to_vmem [thread:$0]  (!%p9525_p12), %s10816_s4, 7680, %s380_s5, [#allocation6], %s9381_s24, %s9381_s24, %s9382_s27  }
  0xb0   : > { %s9383_s17 = smov [#allocation10]   ;;  %s9384_s13 = smov [#allocation13]  }
  0xb1   : > { %s406_s16 = sshll.u32 %s9383_s17, 4  ;;  %s429_s28 = sshll.u32 %s9384_s13, 4  ;;  %s407_s16 = int_to_ptr.vmem [resolvable:$true] %s406_s16  ;;  %s9662_s28 = int_to_ptr.vmem [resolvable:$true] %s429_s28 }
  0xb2   : > { %s9203_s30 = scalar_lea.hbm %s10818_s6, 16 }
  0xb3   : > { %p9204_p13 = scmp.ne.s32.totalorder %s10818_s6, %s9203_s30  ;;  %p9210_p5 = scmp.lt.u32.totalorder %s9203_s30, %s10818_s6 }
  0xb5   : > { %p9206_p1 = pnand %p9204_p13, %p9541_p0 }
  0xb7   : > { %p9207_p6 = pneg %p9206_p1 }
  0xb9   : > { %p9212_p9 = pnand %p9210_p5, %p9207_p6 }
  0xbb   : > { %9215 = shalt.err (!%p9212_p9)
}
  0xbc   : > { %s9216_s14 = scalar_lea.vmem %s407_s16, 16  ;;  %s9223_s15 = scalar_lea.vmem %s407_s16, 32 }
  0xbd   : > { %p9217_p10 = scmp.ne.s32.totalorder %s407_s16, %s9216_s14  ;;  %p9224_p4 = scmp.lt.s32.totalorder %s407_s16, %s407_s16 }
  0xbe   : > { %p9225_p7 = scmp.lt.s32.totalorder %s9223_s15, %s9216_s14 }
  0xbf   : > { %p9219_p2 = pnand %p9217_p10, %p9541_p0 }
  0xc0   : > { %p9226_p8 = por %p9225_p7, %p9224_p4 }
  0xc1   : > { %p9220_p3 = pneg %p9219_p2 }
  0xc3   : > { %p9227_p11 = pnand %p9226_p8, %p9220_p3 }
  0xc5   : > { %9230 = shalt.err (!%p9227_p11)
}
  0xc6   : > { %8937 = dma.hbm_to_vmem [thread:$0]  (!%p9525_p12), %s10818_s6, 16, %s407_s16, [#allocation9]  }
  0xc7   : > { %s9231_s18 = scalar_lea.hbm %s10820_s8, 5120 }
  0xc8   : > { %p9232_p13 = scmp.ne.s32.totalorder %s10820_s8, %s9231_s18  ;;  %p9238_p5 = scmp.lt.u32.totalorder %s9231_s18, %s10820_s8 }
  0xca   : > { %p9234_p1 = pnand %p9232_p13, %p9541_p0 }
  0xcc   : > { %p9235_p6 = pneg %p9234_p1 }
  0xce   : > { %p9240_p9 = pnand %p9238_p5, %p9235_p6 }
  0xd0   : > { %9243 = shalt.err (!%p9240_p9)
}
  0xd1   : > { %s9244_s16 = scalar_lea.vmem %s9662_s28, 5120  ;;  %p9252_p4 = scmp.lt.s32.totalorder %s9662_s28, %s9662_s28 }
  0xd2   : > { %p9245_p10 = scmp.ne.s32.totalorder %s9662_s28, %s9244_s16  ;;  %p9253_p7 = scmp.lt.s32.totalorder %s9244_s16, %s9244_s16 }
  0xd4   : > { %p9247_p2 = pnand %p9245_p10, %p9541_p0  ;;  %p9254_p8 = por %p9253_p7, %p9252_p4 }
  0xd6   : > { %p9248_p3 = pneg %p9247_p2 }
  0xd8   : > { %p9255_p11 = pnand %p9254_p8, %p9248_p3 }
  0xda   : > { %9258 = shalt.err (!%p9255_p11)
}
  0xdb   : > { %8943 = dma.hbm_to_vmem [thread:$0]  (!%p9525_p12), %s10820_s8, 5120, %s9662_s28, [#allocation12], %s9381_s24, %s9381_s24, %s9382_s27  }
  0xdc   : > { %s9385_s15 = smov [#allocation16]   ;;  %s9259_s26 = scalar_lea.hbm %s10824_s12, 16 }
  0xdd   : > { %s460_s22 = sshll.u32 %s9385_s15, 4  ;;  %p9260_p13 = scmp.ne.s32.totalorder %s10824_s12, %s9259_s26  ;;  %s461_s22 = int_to_ptr.vmem [resolvable:$true] %s460_s22 }
  0xde   : > { %p9266_p5 = scmp.lt.u32.totalorder %s9259_s26, %s10824_s12 }
  0xdf   : > { %p9262_p1 = pnand %p9260_p13, %p9541_p0 }
  0xe1   : > { %p9263_p6 = pneg %p9262_p1 }
  0xe3   : > { %p9268_p9 = pnand %p9266_p5, %p9263_p6 }
  0xe5   : > { %9271 = shalt.err (!%p9268_p9)
}
  0xe6   : > { %s9272_s24 = scalar_lea.vmem %s461_s22, 16  ;;  %s9279_s27 = scalar_lea.vmem %s461_s22, 32 }
  0xe7   : > { %p9273_p10 = scmp.ne.s32.totalorder %s461_s22, %s9272_s24  ;;  %p9280_p4 = scmp.lt.s32.totalorder %s461_s22, %s461_s22 }
  0xe8   : > { %p9281_p7 = scmp.lt.s32.totalorder %s9279_s27, %s9272_s24 }
  0xe9   : > { %p9275_p2 = pnand %p9273_p10, %p9541_p0 }
  0xea   : > { %p9282_p8 = por %p9281_p7, %p9280_p4 }
  0xeb   : > { %p9276_p3 = pneg %p9275_p2 }
  0xed   : > { %p9283_p11 = pnand %p9282_p8, %p9276_p3 }
  0xef   : > { %9286 = shalt.err (!%p9283_p11)
}
  0xf0   : > { %8949 = dma.hbm_to_vmem [thread:$0]  (!%p9525_p12), %s10824_s12, 16, %s461_s22, [#allocation15]  }
  0xf1   : > { %p10861_p13 = scmp.ne.s32.totalorder %s10854_s20, 0 }
  0xf2   : > { %p10862_p1 = scmp.eq.s32.totalorder (!%p10861_p13), %s9489_s29, 0 }
  0xf3   : > { %481 = sbr.rel (%p10861_p13) target bundleno = 3601 (0xe11), region = 72 }
  0xfa   : > { %9332 = dma.done.wait (%p10862_p1), [#allocation3], 19200   ;;  %p10863_p0 = pmov %p10862_p1 }
  0xfc   : > { %9334 = vsyncadd (%p10863_p0), [#allocation3], 4294948096  ;;  %p10864_p6 = pmov %p10863_p0 }
  0xfd   : > { %p10865_p5 = pmov %p10863_p0 }
  0xfe   : > { %9336 = dma.done.wait (%p10864_p6), [#allocation6], 7696  }
  0xff   : > { %9338 = vsyncadd (%p10865_p5), [#allocation6], 4294959600  ;;  %p10866_p9 = pmov %p10863_p0 }
 0x100   : > { %p10867_p12 = pmov %p10863_p0 }
 0x101   : > { %9340 = dma.done.wait (%p10866_p9), [#allocation9], 64016  }
 0x102   : > { %9342 = vsyncadd (%p10867_p12), [#allocation9], 4294903280  ;;  %p10868_p10 = pmov %p10863_p0 }
 0x103   : > { %p10869_p2 = pmov %p10863_p0 }
 0x104   : > { %9344 = dma.done.wait (%p10868_p10), [#allocation12], 5248  }
 0x105   : > { %9346 = vsyncadd (%p10869_p2), [#allocation12], 4294962048  ;;  %p10870_p3 = pmov %p10863_p0 }
 0x106   : > { %p10871_p4 = pmov %p10863_p0 }
 0x107   : > { %9348 = dma.done.wait (%p10870_p3), [#allocation15], 32  }
 0x108   : > { %9350 = vsyncadd (%p10871_p4), [#allocation15], 4294967264  ;;  %p556_p7 = scmp.lt.s32.totalorder %s9489_s29, 1  ;;  %v9386_v0 = vmov 0.0   ;;  %s9387_s14 = smov 127   ;;  %v573_v4 = vld [vmem:[#allocation2 + $0x38] sm:$0xff] }
 0x109   : > { %658 = vmatprep.mubr.f32.mxu0 %v9386_v0  ;;  %3331 = vmatprep.mubr.f32.mxu1 %v9386_v0  ;;  %v575_v5 = vld [vmem:[#allocation2 + $0x48] sm:$0xff]  ;;  %v572_v6 = vld [vmem:[#allocation2 + $0x30] sm:$0xff]  ;;  %v574_v7 = vld [vmem:[#allocation2 + $0x40] sm:$0xff]  ;;  %s9388_s15 = smov 126   ;;  %s9389_s22 = smov 125   ;;  %vm1098_vm0 = vcmask 1046528  }
 0x10a   : > { %s557_s25 = scalar_select %p556_p7, %s9489_s29, 1  ;;  %v7708_v8 = vpack.c.bf16 %v575_v5, %v573_v4  ;;  %v7710_v9 = vpack.c.bf16 %v574_v7, %v572_v6  ;;  %v577_v10 = vld [vmem:[#allocation2 + $0x58] sm:$0xff]  ;;  %v566_v11 = vld [vmem:[#allocation2 + $0x8] sm:$0xff]  ;;  %v576_v13 = vld [vmem:[#allocation2 + $0x50] sm:$0xff]  ;;  %vm1640_vm1 = vcmask 1045504   ;;  %vm2182_vm2 = vcmask 1044480  }
 0x10b   : > { %v568_v12 = vld [vmem:[#allocation2 + $0x18] sm:$0xff]  ;;  %s9390_s17 = smov 124   ;;  %v565_v37 = vld [vmem:[#allocation2] sm:$0xff]  ;;  %v567_v38 = vld [vmem:[#allocation2 + $0x10] sm:$0xff]  ;;  %vm587_vm3 = vcmask 195584   ;;  %vm2724_vm4 = vcmask 1043456  }
 0x10c   : > { %s7546_s20 = sshll.u32 %s557_s25, 5  ;;  %7709 = vmatprep.subr.bf16.mxu0 %v7708_v8  ;;  %v7712_v14 = vpack.c.bf16 %v568_v12, %v566_v11  ;;  %v7714_v39 = vpack.c.bf16 %v567_v38, %v565_v37  ;;  %v570_v41 = vld [vmem:[#allocation2 + $0x28] sm:$0xff]  ;;  %v770_v43 = vld [vmem:[#allocation2 + $0x78] sm:$0xff]  ;;  %v569_v44 = vld [vmem:[#allocation2 + $0x20] sm:$0xff]  ;;  %vm3460_vm5 = vcmask 916480   ;;  %s9392_s28 = smov 98  }
 0x10d   : > { %s9755_s5 = scalar_lea.vmem %s10812_s0, %s7546_s20  ;;  %7711 = vmatpush1.bf16.msra.mxu0 %v7710_v9  ;;  %v768_v42 = vld [vmem:[#allocation2 + $0x68] sm:$0xff]  ;;  %v767_v48 = vld [vmem:[#allocation2 + $0x60] sm:$0xff]  ;;  %v769_v49 = vld [vmem:[#allocation2 + $0x70] sm:$0xff]  ;;  %s9393_s21 = smov 108   ;;  %vm3865_vm6 = vcmask 654336   ;;  %vm6272_vm7 = vcmask 64512  }
 0x10e   : > { %v9758_v1 = vld [vmem:[%s9755_s5] sm:$0xff]  ;;  %v9761_v2 = vld [vmem:[%s9755_s5 + $0x10] sm:$0xff]  ;;  %v9766_v3 = vld [vmem:[%s9755_s5 + $0x8] sm:$0xff]  ;;  %598 = vmatprep.subr.mxu0 %v577_v10  ;;  %v7716_v45 = vpack.c.bf16 %v770_v43, %v768_v42  ;;  %v7718_v53 = vpack.c.bf16 %v769_v49, %v767_v48  ;;  %s9394_s25 = smov 88   ;;  %s9395_s20 = smov 118   ;;  %vm6443_vm8 = vcmask 261120  }
 0x10f   : > { %581 = vrot.lane.b32.xlu0 %v9758_v1, %s9387_s14  ;;  %585 = vrot.lane.b32.xlu1 %v9761_v2, %s9387_s14  ;;  %v1099_v15 = vrot.slane %v9758_v1, 1  ;;  %v1100_v16 = vrot.slane %v9766_v3, 1  ;;  %v1102_v17 = vrot.slane %v9761_v2, 1  ;;  %v9790_v18 = vld [vmem:[%s9755_s5 + $0x18] sm:$0xf]  ;;  %v1641_v23 = vrot.slane %v9758_v1, 2 }
 0x110   : > { %v1104_v21 = vrot.slane %v9790_v18, 1  ;;  %v1642_v24 = vrot.slane %v9766_v3, 2  ;;  %v1644_v25 = vrot.slane %v9761_v2, 2  ;;  %v1646_v28 = vrot.slane %v9790_v18, 2  ;;  %v772_v55 = vld [vmem:[#allocation2 + $0x88] sm:$0xff]  ;;  %v876_v56 = vld [vmem:[#allocation2 + $0x98] sm:$0xff] }
 0x111   : > { %599 = vmatpush1.msra.mxu0 %v576_v13  ;;  %v9797_v19 = vsel %vm1098_vm0, %v1099_v15, %v1100_v16  ;;  %v9800_v20 = vsel %vm1098_vm0, %v1100_v16, %v1102_v17  ;;  %v2183_v30 = vrot.slane %v9758_v1, 3  ;;  %v2184_v31 = vrot.slane %v9766_v3, 3  ;;  %v878_v57 = vld [vmem:[#allocation2 + $0xa8] sm:$0xff]  ;;  %v771_v59 = vld [vmem:[#allocation2 + $0x80] sm:$0xff]  ;;  %v875_v63 = vld [vmem:[#allocation2 + $0x90] sm:$0xff]  ;;  %s10873_s23 = sld [smem:[#allocation30_spill]] }
 0x112   : > { %7713 = vmatprep.subr.bf16.mxu0 %v7712_v14  ;;  %v9808_v22 = vsel %vm1098_vm0, %v1102_v17, %v1104_v21  ;;  %v9834_v26 = vsel %vm1640_vm1, %v1641_v23, %v1642_v24  ;;  %v9837_v27 = vsel %vm1640_vm1, %v1642_v24, %v1644_v25  ;;  %v9845_v29 = vsel %vm1640_vm1, %v1644_v25, %v1646_v28  ;;  %v880_v5 = vld [vmem:[#allocation2 + $0xb8] sm:$0xff]  ;;  %v984_v6 = vld [vmem:[#allocation2 + $0xc8] sm:$0xff]  ;;  %v983_v11 = vld [vmem:[#allocation2 + $0xc0] sm:$0xff]  ;;  %s7543_s5 = sshll.u32 %s9489_s29, 4  ;;  %s10874_s13 = sld [smem:[#allocation34_spill]] }
 0x113   : > { %583 = vrot.lane.b32.xlu0 %v9766_v3, %s9387_s14  ;;  %773 = vrot.lane.b32.xlu1 %v9758_v1, %s9388_s15  ;;  %v2186_v32 = vrot.slane %v9761_v2, 3  ;;  %v9871_v33 = vsel %vm2182_vm2, %v2183_v30, %v2184_v31  ;;  %v2188_v35 = vrot.slane %v9790_v18, 3  ;;  %v2725_v50 = vrot.slane %v9758_v1, 4  ;;  %v986_v7 = vld [vmem:[#allocation2 + $0xd8] sm:$0xff]  ;;  %v985_v12 = vld [vmem:[#allocation2 + $0xd0] sm:$0xff]  ;;  %v988_v15 = vld [vmem:[#allocation2 + $0xe8] sm:$0xff] }
 0x114   : > { %v2726_v51 = vrot.slane %v9766_v3, 4  ;;  %v2728_v54 = vrot.slane %v9761_v2, 4  ;;  %v7720_v60 = vpack.c.bf16 %v878_v57, %v876_v56  ;;  %v2730_v61 = vrot.slane %v9790_v18, 4  ;;  %v1092_v16 = vld [vmem:[#allocation2 + $0xf8] sm:$0xff]  ;;  %v1094_v17 = vld [vmem:[#allocation2 + $0x108] sm:$0xff]  ;;  %v987_v21 = vld [vmem:[#allocation2 + $0xe0] sm:$0xff] }
 0x115   : > { %v9874_v34 = vsel %vm2182_vm2, %v2184_v31, %v2186_v32  ;;  %v9882_v36 = vsel %vm2182_vm2, %v2186_v32, %v2188_v35  ;;  %v7724_v9 = vpack.c.bf16 %v986_v7, %v984_v6  ;;  %v7726_v14 = vpack.c.bf16 %v985_v12, %v983_v11  ;;  %v1091_v25 = vld [vmem:[#allocation2 + $0xf0] sm:$0xff]  ;;  %v1093_v28 = vld [vmem:[#allocation2 + $0x100] sm:$0xff]  ;;  %v1096_v32 = vld [vmem:[#allocation2 + $0x118] sm:$0xff]  ;;  %s9397_s29 = smov [#allocation17]  }
 0x116   : > { %v9912_v52 = vsel %vm2724_vm4, %v2725_v50, %v2726_v51  ;;  %v9921_v58 = vsel %vm2724_vm4, %v2726_v51, %v2728_v54  ;;  %v9930_v62 = vsel %vm2724_vm4, %v2728_v54, %v2730_v61  ;;  %v7728_v23 = vpack.c.bf16 %v1094_v17, %v1092_v16  ;;  %v1203_v35 = vld [vmem:[#allocation2 + $0x128] sm:$0xff]  ;;  %v1205_v37 = vld [vmem:[#allocation2 + $0x138] sm:$0xff]  ;;  %v1202_v42 = vld [vmem:[#allocation2 + $0x120] sm:$0xff]  ;;  %s9291_s19 = sshll.u32 %s9397_s29, 4  ;;  %s9292_s19 = int_to_ptr.vmem [resolvable:$false] %s9291_s19 }
 0x117   : > { %775 = vrot.lane.b32.xlu0 %v9766_v3, %s9388_s15  ;;  %777 = vrot.lane.b32.xlu1 %v9761_v2, %s9388_s15  ;;  %v7730_v31 = vpack.c.bf16 %v1093_v28, %v1091_v25  ;;  %v1204_v43 = vld [vmem:[#allocation2 + $0x130] sm:$0xff]  ;;  %v1206_v48 = vld [vmem:[#allocation2 + $0x140] sm:$0xff]  ;;  %v1315_v54 = vld [vmem:[#allocation2 + $0x178] sm:$0xff]  ;;  %vm9396_vm9 = vmmov 0   ;;  %vm7116_vm10 = vcmask 1041408   ;;  %vm7112_vm11 = vcmask 408576  }
 0x118   : > { %v1310_v50 = vld [vmem:[#allocation2 + $0x150] sm:$0xff]  ;;  %v1312_v51 = vld [vmem:[#allocation2 + $0x160] sm:$0xff]  ;;  %v1421_v56 = vld [vmem:[#allocation2 + $0x198] sm:$0xff]  ;;  %vm7190_vm12 = vcmask 73728   ;;  %s10769_s26 = scalar_lea.hbm %s10874_s13, %s7543_s5  ;;  %p10875_p11 = scmp.ne.s32.totalorder %s10873_s23, 0 }
 0x119   : > { %v1420_v61 = vld [vmem:[#allocation2 + $0x190] sm:$0xff]  ;;  %v1422_v7 = vld [vmem:[#allocation2 + $0x1a0] sm:$0xff]  ;;  %s9293_s2 = scalar_lea.vmem %s9292_s19, 32 }
 0x11a   : > { %v1530_v17 = vld [vmem:[#allocation2 + $0x1d0] sm:$0xff] }
 0x11b   : > { %881 = vrot.lane.b32.xlu0 %v9758_v1, %s9389_s22  ;;  %883 = vrot.lane.b32.xlu1 %v9766_v3, %s9389_s22 }
 0x11f   : > { %885 = vrot.lane.b32.xlu0 %v9761_v2, %s9389_s22  ;;  %989 = vrot.lane.b32.xlu1 %v9758_v1, %s9390_s17 }
 0x123   : > { %991 = vrot.lane.b32.xlu0 %v9766_v3, %s9390_s17  ;;  %993 = vrot.lane.b32.xlu1 %v9761_v2, %s9390_s17 }
 0x127   : > { %1208 = vrot.lane.b32.xlu0 %v9797_v19, %s9387_s14  ;;  %1210 = vrot.lane.b32.xlu1 %v9800_v20, %s9387_s14 }
 0x12b   : > { %1212 = vrot.lane.b32.xlu0 %v9808_v22, %s9387_s14  ;;  %1316 = vrot.lane.b32.xlu1 %v9797_v19, %s9388_s15 }
 0x12f   : > { %1318 = vrot.lane.b32.xlu0 %v9800_v20, %s9388_s15  ;;  %1320 = vrot.lane.b32.xlu1 %v9808_v22, %s9388_s15 }
 0x133   : > { %1424 = vrot.lane.b32.xlu0 %v9797_v19, %s9389_s22  ;;  %1426 = vrot.lane.b32.xlu1 %v9800_v20, %s9389_s22 }
 0x137   : > { %1428 = vrot.lane.b32.xlu0 %v9808_v22, %s9389_s22  ;;  %1532 = vrot.lane.b32.xlu1 %v9797_v19, %s9390_s17 }
 0x13b   : > { %1534 = vrot.lane.b32.xlu0 %v9800_v20, %s9390_s17  ;;  %1536 = vrot.lane.b32.xlu1 %v9808_v22, %s9390_s17 }
 0x13f   : > { %1750 = vrot.lane.b32.xlu0 %v9834_v26, %s9387_s14  ;;  %1752 = vrot.lane.b32.xlu1 %v9837_v27, %s9387_s14 }
 0x143   : > { %1754 = vrot.lane.b32.xlu0 %v9845_v29, %s9387_s14  ;;  %1858 = vrot.lane.b32.xlu1 %v9834_v26, %s9388_s15 }
 0x147   : > { %1860 = vrot.lane.b32.xlu0 %v9837_v27, %s9388_s15  ;;  %1862 = vrot.lane.b32.xlu1 %v9845_v29, %s9388_s15 }
 0x14b   : > { %1966 = vrot.lane.b32.xlu0 %v9834_v26, %s9389_s22  ;;  %1968 = vrot.lane.b32.xlu1 %v9837_v27, %s9389_s22 }
 0x14f   : > { %1970 = vrot.lane.b32.xlu0 %v9845_v29, %s9389_s22  ;;  %2074 = vrot.lane.b32.xlu1 %v9834_v26, %s9390_s17 }
 0x153   : > { %2076 = vrot.lane.b32.xlu0 %v9837_v27, %s9390_s17  ;;  %2078 = vrot.lane.b32.xlu1 %v9845_v29, %s9390_s17 }
 0x157   : > { %2292 = vrot.lane.b32.xlu0 %v9871_v33, %s9387_s14  ;;  %2294 = vrot.lane.b32.xlu1 %v9874_v34, %s9387_s14 }
 0x15b   : > { %2296 = vrot.lane.b32.xlu0 %v9882_v36, %s9387_s14  ;;  %2400 = vrot.lane.b32.xlu1 %v9871_v33, %s9388_s15 }
 0x15f   : > { %2402 = vrot.lane.b32.xlu0 %v9874_v34, %s9388_s15  ;;  %2404 = vrot.lane.b32.xlu1 %v9882_v36, %s9388_s15 }
 0x163   : > { %2508 = vrot.lane.b32.xlu0 %v9871_v33, %s9389_s22  ;;  %2510 = vrot.lane.b32.xlu1 %v9874_v34, %s9389_s22 }
 0x167   : > { %2512 = vrot.lane.b32.xlu0 %v9882_v36, %s9389_s22  ;;  %2616 = vrot.lane.b32.xlu1 %v9871_v33, %s9390_s17 }
 0x16b   : > { %2618 = vrot.lane.b32.xlu0 %v9874_v34, %s9390_s17  ;;  %2620 = vrot.lane.b32.xlu1 %v9882_v36, %s9390_s17 }
 0x16f   : > { %2834 = vrot.lane.b32.xlu0 %v9912_v52, %s9387_s14  ;;  %2836 = vrot.lane.b32.xlu1 %v9921_v58, %s9387_s14 }
 0x173   : > { %2838 = vrot.lane.b32.xlu0 %v9930_v62, %s9387_s14  ;;  %2942 = vrot.lane.b32.xlu1 %v9912_v52, %s9388_s15 }
 0x177   : > { %2944 = vrot.lane.b32.xlu0 %v9921_v58, %s9388_s15  ;;  %2946 = vrot.lane.b32.xlu1 %v9930_v62, %s9388_s15 }
 0x17b   : > { %3050 = vrot.lane.b32.xlu0 %v9912_v52, %s9389_s22  ;;  %3052 = vrot.lane.b32.xlu1 %v9921_v58, %s9389_s22 }
 0x17f   : > { %3054 = vrot.lane.b32.xlu0 %v9930_v62, %s9389_s22  ;;  %3158 = vrot.lane.b32.xlu1 %v9912_v52, %s9390_s17 }
 0x181   : > { %v582_v40 = vpop.permute.xlu0 %581  ;;  %v586_v47 = vpop.permute.xlu1 %585 }
 0x182   : > { %7385 = vmatmul.mubr.msk.f32.vlgmr.msra.gmra.mrb[0].mxu0 %vm587_vm3, %v582_v40  ;;  %v7732_v40 = vpack.c.bf16 %v1205_v37, %v1203_v35  ;;  %v1638_v37 = vld [vmem:[#allocation2 + $0x200] sm:$0xff] }
 0x183   : > { %664 = vmatprep.mubr.f32.mxu0 %v9386_v0  ;;  %7715 = vmatpush1.bf16.msra.mxu0 %v7714_v39  ;;  %v1095_v39 = vld [vmem:[#allocation2 + $0x110] sm:$0xff] }
 0x184   : > { %687 = vmatprep.subr.mxu0 %v570_v41  ;;  %3160 = vrot.lane.b32.xlu0 %v9921_v58, %s9390_s17 }
 0x185   : > { %v584_v46 = vpop.permute.xlu0 %583  ;;  %v774_v4 = vpop.permute.xlu1 %773  ;;  %3162 = vrot.lane.b32.xlu1 %v9930_v62, %s9390_s17 }
 0x186   : > { %7386 = vmatmul.mubr.msk.f32.gmra.mrb[2].mxu0 %vm587_vm3, %v584_v46  ;;  %v1311_v46 = vld [vmem:[#allocation2 + $0x158] sm:$0xff] }
 0x187   : > { %670 = vmatprep.mubr.f32.mxu0 %v9386_v0  ;;  %688 = vmatpush1.msra.mxu0 %v569_v44  ;;  %v7734_v44 = vpack.c.bf16 %v1204_v43, %v1202_v42  ;;  %v1749_v43 = vld [vmem:[#allocation2 + $0x238] sm:$0xff] }
 0x188   : > { %7717 = vmatprep.subr.bf16.mxu0 %v7716_v45  ;;  %v1207_v45 = vld [vmem:[#allocation2 + $0x148] sm:$0xff] }
 0x189   : > { %v776_v8 = vpop.permute.xlu0 %775  ;;  %v778_v10 = vpop.permute.xlu1 %777 }
 0x18a   : > { %7387 = vmatmul.mubr.msk.f32.gmra.mrb[4].mxu0 %vm587_vm3, %v586_v47  ;;  %v1313_v47 = vld [vmem:[#allocation2 + $0x168] sm:$0xff] }
 0x18b   : > { %747 = vmatprep.mubr.f32.mxu0 %v9386_v0  ;;  %v7736_v49 = vpack.c.bf16 %v1313_v47, %v1311_v46  ;;  %v1748_v46 = vld [vmem:[#allocation2 + $0x230] sm:$0xff] }
 0x18d   : > { %v882_v13 = vpop.permute.xlu0 %881  ;;  %v884_v18 = vpop.permute.xlu1 %883 }
 0x18e   : > { %7388 = vmatmul.mubr.msk.f32.vlgmr.msra.gmra.mrb[0].mxu0 %vm587_vm3, %v9758_v1  ;;  %v877_v1 = vld [vmem:[#allocation2 + $0xa0] sm:$0xff] }
 0x18f   : > { %753 = vmatprep.mubr.f32.mxu0 %v9386_v0  ;;  %7719 = vmatpush1.bf16.msra.mxu0 %v7718_v53 }
 0x190   : > { %789 = vmatprep.subr.mxu0 %v772_v55  ;;  %v1419_v55 = vld [vmem:[#allocation2 + $0x188] sm:$0xff] }
 0x191   : > { %v886_v24 = vpop.permute.xlu0 %885  ;;  %v990_v30 = vpop.permute.xlu1 %989 }
 0x192   : > { %7389 = vmatmul.mubr.msk.f32.gmra.mrb[2].mxu0 %vm587_vm3, %v9766_v3  ;;  %v7722_v3 = vpack.c.bf16 %v877_v1, %v875_v63 }
 0x193   : > { %759 = vmatprep.mubr.f32.mxu0 %v9386_v0  ;;  %790 = vmatpush1.msra.mxu0 %v771_v59  ;;  %v7740_v59 = vpack.c.bf16 %v1421_v56, %v1419_v55 }
 0x194   : > { %7721 = vmatprep.subr.bf16.mxu0 %v7720_v60 }
 0x195   : > { %v992_v38 = vpop.permute.xlu0 %991  ;;  %v994_v41 = vpop.permute.xlu1 %993 }
 0x196   : > { %7390 = vmatmul.mubr.msk.f32.gmra.mrb[4].mxu0 %vm587_vm3, %v9761_v2  ;;  %v879_v2 = vld [vmem:[#allocation2 + $0xb0] sm:$0xff] }
 0x197   : > { %849 = vmatprep.mubr.f32.mxu0 %v9386_v0 }
 0x199   : > { %v1209_v53 = vpop.permute.xlu0 %1208  ;;  %v1211_v57 = vpop.permute.xlu1 %1210 }
 0x19a   : > { %7391 = vmatmul.mubr.msk.f32.vlgmr.msra.gmra.mrb[0].mxu0 %vm587_vm3, %v774_v4  ;;  %v1423_v4 = vld [vmem:[#allocation2 + $0x1a8] sm:$0xff] }
 0x19b   : > { %855 = vmatprep.mubr.f32.mxu0 %v9386_v0  ;;  %7723 = vmatpush1.bf16.msra.mxu0 %v7722_v3  ;;  %v1527_v3 = vld [vmem:[#allocation2 + $0x1b8] sm:$0xff] }
 0x19c   : > { %897 = vmatprep.subr.mxu0 %v880_v5  ;;  %v1529_v5 = vld [vmem:[#allocation2 + $0x1c8] sm:$0xff] }
 0x19d   : > { %v1213_v60 = vpop.permute.xlu0 %1212  ;;  %v1317_v63 = vpop.permute.xlu1 %1316 }
 0x19e   : > { %7392 = vmatmul.mubr.msk.f32.gmra.mrb[2].mxu0 %vm587_vm3, %v776_v8  ;;  %v7744_v8 = vpack.c.bf16 %v1529_v5, %v1527_v3  ;;  %v2068_v5 = vld [vmem:[#allocation2 + $0x2a0] sm:$0xff] }
 0x19f   : > { %861 = vmatprep.mubr.f32.mxu0 %v9386_v0  ;;  %898 = vmatpush1.msra.mxu0 %v879_v2 }
 0x1a0   : > { %7725 = vmatprep.subr.bf16.mxu0 %v7724_v9  ;;  %v1526_v9 = vld [vmem:[#allocation2 + $0x1b0] sm:$0xff] }
 0x1a1   : > { %v1319_v6 = vpop.permute.xlu0 %1318  ;;  %v1321_v2 = vpop.permute.xlu1 %1320 }
 0x1a2   : > { %7393 = vmatmul.mubr.msk.f32.gmra.mrb[4].mxu0 %vm587_vm3, %v778_v10  ;;  %v1528_v10 = vld [vmem:[#allocation2 + $0x1c0] sm:$0xff] }
 0x1a3   : > { %957 = vmatprep.mubr.f32.mxu0 %v9386_v0  ;;  %v7746_v12 = vpack.c.bf16 %v1528_v10, %v1526_v9  ;;  %v2177_v9 = vld [vmem:[#allocation2 + $0x2d8] sm:$0xff]  ;;  %v2179_v10 = vld [vmem:[#allocation2 + $0x2e8] sm:$0xff] }
 0x1a5   : > { %v1425_v11 = vpop.permute.xlu0 %1424  ;;  %v1427_v16 = vpop.permute.xlu1 %1426 }
 0x1a6   : > { %7394 = vmatmul.mubr.msk.f32.vlgmr.msra.gmra.mrb[0].mxu0 %vm587_vm3, %v882_v13  ;;  %v1531_v13 = vld [vmem:[#allocation2 + $0x1d8] sm:$0xff] }
 0x1a7   : > { %963 = vmatprep.mubr.f32.mxu0 %v9386_v0  ;;  %7727 = vmatpush1.bf16.msra.mxu0 %v7726_v14  ;;  %v1635_v14 = vld [vmem:[#allocation2 + $0x1e8] sm:$0xff] }
 0x1a8   : > { %1005 = vmatprep.subr.mxu0 %v988_v15  ;;  %v1637_v15 = vld [vmem:[#allocation2 + $0x1f8] sm:$0xff] }
 0x1a9   : > { %v1533_v25 = vpop.permute.xlu1 %1532 }
 0x1aa   : > { %7395 = vmatmul.mubr.msk.f32.gmra.mrb[2].mxu0 %vm587_vm3, %v884_v18  ;;  %v7748_v18 = vpack.c.bf16 %v1637_v15, %v1635_v14  ;;  %v2176_v15 = vld [vmem:[#allocation2 + $0x2d0] sm:$0xff] }
 0x1ab   : > { %969 = vmatprep.mubr.f32.mxu0 %v9386_v0  ;;  %1006 = vmatpush1.msra.mxu0 %v987_v21  ;;  %v1429_v21 = vpop.permute.xlu0 %1428 }
 0x1ac   : > { %7729 = vmatprep.subr.bf16.mxu0 %v7728_v23  ;;  %v1634_v23 = vld [vmem:[#allocation2 + $0x1e0] sm:$0xff] }
 0x1ae   : > { %7396 = vmatmul.mubr.msk.f32.gmra.mrb[4].mxu0 %vm587_vm3, %v886_v24  ;;  %v1636_v24 = vld [vmem:[#allocation2 + $0x1f0] sm:$0xff] }
 0x1af   : > { %1065 = vmatprep.mubr.f32.mxu0 %v9386_v0  ;;  %v7750_v28 = vpack.c.bf16 %v1636_v24, %v1634_v23  ;;  %v1535_v35 = vpop.permute.xlu0 %1534  ;;  %v2287_v23 = vld [vmem:[#allocation2 + $0x308] sm:$0xff]  ;;  %v2289_v24 = vld [vmem:[#allocation2 + $0x318] sm:$0xff] }
 0x1b2   : > { %7397 = vmatmul.mubr.msk.f32.vlgmr.msra.gmra.mrb[0].mxu0 %vm587_vm3, %v990_v30  ;;  %v1639_v30 = vld [vmem:[#allocation2 + $0x208] sm:$0xff] }
 0x1b3   : > { %1071 = vmatprep.mubr.f32.mxu0 %v9386_v0  ;;  %7731 = vmatpush1.bf16.msra.mxu0 %v7730_v31  ;;  %v1745_v31 = vld [vmem:[#allocation2 + $0x218] sm:$0xff] }
 0x1b4   : > { %1116 = vmatprep.subr.mxu0 %v1096_v32  ;;  %v1747_v32 = vld [vmem:[#allocation2 + $0x228] sm:$0xff] }
 0x1b6   : > { %7398 = vmatmul.mubr.msk.f32.gmra.mrb[2].mxu0 %vm587_vm3, %v992_v38  ;;  %v7752_v38 = vpack.c.bf16 %v1747_v32, %v1745_v31  ;;  %v2286_v32 = vld [vmem:[#allocation2 + $0x300] sm:$0xff] }
 0x1b7   : > { %1077 = vmatprep.mubr.f32.mxu0 %v9386_v0  ;;  %1117 = vmatpush1.msra.mxu0 %v1095_v39  ;;  %v1537_v39 = vpop.permute.xlu1 %1536 }
 0x1b8   : > { %7733 = vmatprep.subr.bf16.mxu0 %v7732_v40  ;;  %v1744_v40 = vld [vmem:[#allocation2 + $0x210] sm:$0xff] }
 0x1ba   : > { %7399 = vmatmul.mubr.msk.f32.gmra.mrb[4].mxu0 %vm587_vm3, %v994_v41  ;;  %v1746_v41 = vld [vmem:[#allocation2 + $0x220] sm:$0xff] }
 0x1bb   : > { %1176 = vmatprep.mubr.f32.mxu0 %v9386_v0  ;;  %v7754_v42 = vpack.c.bf16 %v1746_v41, %v1744_v40  ;;  %v2397_v40 = vld [vmem:[#allocation2 + $0x348] sm:$0xff]  ;;  %v2290_v41 = vld [vmem:[#allocation2 + $0x320] sm:$0xff] }
 0x1be   : > { %7400 = vmatmul.mubr.msk.f32.vlgmr.msra.gmra.mrb[0].mxu0 %vm587_vm3, %v9797_v19  ;;  %v7738_v19 = vpack.c.bf16 %v1312_v51, %v1310_v50  ;;  %v1751_v50 = vpop.permute.xlu0 %1750  ;;  %v1857_v51 = vld [vmem:[#allocation2 + $0x268] sm:$0xff] }
 0x1bf   : > { %1182 = vmatprep.mubr.f32.mxu0 %v9386_v0  ;;  %7735 = vmatpush1.bf16.msra.mxu0 %v7734_v44  ;;  %v1853_v44 = vld [vmem:[#allocation2 + $0x248] sm:$0xff] }
 0x1c0   : > { %1224 = vmatprep.subr.mxu0 %v1207_v45  ;;  %v1855_v45 = vld [vmem:[#allocation2 + $0x258] sm:$0xff] }
 0x1c1   : > { %v7756_v47 = vpack.c.bf16 %v1855_v45, %v1853_v44  ;;  %v2396_v44 = vld [vmem:[#allocation2 + $0x340] sm:$0xff] }
 0x1c2   : > { %7401 = vmatmul.mubr.msk.f32.gmra.mrb[2].mxu0 %vm587_vm3, %v9800_v20  ;;  %v1314_v20 = vld [vmem:[#allocation2 + $0x170] sm:$0xff]  ;;  %v1755_v56 = vpop.permute.xlu0 %1754 }
 0x1c3   : > { %1188 = vmatprep.mubr.f32.mxu0 %v9386_v0  ;;  %1225 = vmatpush1.msra.mxu0 %v1206_v48  ;;  %v1852_v48 = vld [vmem:[#allocation2 + $0x240] sm:$0xff] }
 0x1c4   : > { %7737 = vmatprep.subr.bf16.mxu0 %v7736_v49  ;;  %v1854_v49 = vld [vmem:[#allocation2 + $0x250] sm:$0xff] }
 0x1c6   : > { %7402 = vmatmul.mubr.msk.f32.gmra.mrb[4].mxu0 %vm587_vm3, %v9808_v22  ;;  %v1418_v22 = vld [vmem:[#allocation2 + $0x180] sm:$0xff] }
 0x1c7   : > { %1284 = vmatprep.mubr.f32.mxu0 %v9386_v0  ;;  %v7742_v1 = vpack.c.bf16 %v1420_v61, %v1418_v22  ;;  %v2069_v22 = vld [vmem:[#allocation2 + $0x2a8] sm:$0xff]  ;;  %v2071_v61 = vld [vmem:[#allocation2 + $0x2b8] sm:$0xff] }
 0x1ca   : > { %7403 = vmatmul.mubr.msk.f32.vlgmr.msra.gmra.mrb[0].mxu0 %vm587_vm3, %v1209_v53  ;;  %v1961_v53 = vld [vmem:[#allocation2 + $0x278] sm:$0xff] }
 0x1cb   : > { %1290 = vmatprep.mubr.f32.mxu0 %v9386_v0  ;;  %7739 = vmatpush1.bf16.msra.mxu0 %v7738_v19  ;;  %v1963_v19 = vld [vmem:[#allocation2 + $0x288] sm:$0xff] }
 0x1cc   : > { %1332 = vmatprep.subr.mxu0 %v1315_v54  ;;  %v1753_v54 = vpop.permute.xlu1 %1752  ;;  %v7760_v55 = vpack.c.bf16 %v1963_v19, %v1961_v53 }
 0x1ce   : > { %7404 = vmatmul.mubr.msk.f32.gmra.mrb[2].mxu0 %vm587_vm3, %v1211_v57  ;;  %v1962_v57 = vld [vmem:[#allocation2 + $0x280] sm:$0xff] }
 0x1cf   : > { %1296 = vmatprep.mubr.f32.mxu0 %v9386_v0  ;;  %1333 = vmatpush1.msra.mxu0 %v1314_v20 }
 0x1d0   : > { %7741 = vmatprep.subr.bf16.mxu0 %v7740_v59  ;;  %v1859_v20 = vpop.permute.xlu1 %1858 }
 0x1d2   : > { %7405 = vmatmul.mubr.msk.f32.gmra.mrb[4].mxu0 %vm587_vm3, %v1213_v60  ;;  %v1965_v60 = vld [vmem:[#allocation2 + $0x298] sm:$0xff] }
 0x1d3   : > { %1392 = vmatprep.mubr.f32.mxu0 %v9386_v0 }
 0x1d4   : > { %v1863_v3 = vpop.permute.xlu1 %1862 }
 0x1d6   : > { %7406 = vmatmul.mubr.msk.f32.vlgmr.msra.gmra.mrb[0].mxu0 %vm587_vm3, %v1317_v63  ;;  %v1861_v63 = vpop.permute.xlu0 %1860 }
 0x1d7   : > { %1398 = vmatprep.mubr.f32.mxu0 %v9386_v0  ;;  %7743 = vmatpush1.bf16.msra.mxu0 %v7742_v1  ;;  %v1964_v1 = vld [vmem:[#allocation2 + $0x290] sm:$0xff] }
 0x1d8   : > { %1440 = vmatprep.subr.mxu0 %v1423_v4  ;;  %v7764_v4 = vpack.c.bf16 %v2071_v61, %v2069_v22 }
 0x1da   : > { %7407 = vmatmul.mubr.msk.f32.gmra.mrb[2].mxu0 %vm587_vm3, %v1319_v6  ;;  %v2070_v6 = vld [vmem:[#allocation2 + $0x2b0] sm:$0xff] }
 0x1db   : > { %1404 = vmatprep.mubr.f32.mxu0 %v9386_v0  ;;  %1441 = vmatpush1.msra.mxu0 %v1422_v7  ;;  %v1967_v7 = vpop.permute.xlu0 %1966 }
 0x1dc   : > { %7745 = vmatprep.subr.bf16.mxu0 %v7744_v8  ;;  %v7766_v8 = vpack.c.bf16 %v2070_v6, %v2068_v5  ;;  %v2614_v5 = vld [vmem:[#allocation2 + $0x3b0] sm:$0xff] }
 0x1de   : > { %7408 = vmatmul.mubr.msk.f32.gmra.mrb[4].mxu0 %vm587_vm3, %v1321_v2  ;;  %v2073_v2 = vld [vmem:[#allocation2 + $0x2c8] sm:$0xff] }
 0x1df   : > { %1500 = vmatprep.mubr.f32.mxu0 %v9386_v0  ;;  %v1971_v14 = vpop.permute.xlu0 %1970 }
 0x1e2   : > { %7409 = vmatmul.mubr.msk.f32.vlgmr.msra.gmra.mrb[0].mxu0 %vm587_vm3, %v1425_v11  ;;  %v1969_v11 = vpop.permute.xlu1 %1968 }
 0x1e3   : > { %1506 = vmatprep.mubr.f32.mxu0 %v9386_v0  ;;  %7747 = vmatpush1.bf16.msra.mxu0 %v7746_v12  ;;  %v2072_v12 = vld [vmem:[#allocation2 + $0x2c0] sm:$0xff] }
 0x1e4   : > { %1548 = vmatprep.subr.mxu0 %v1531_v13  ;;  %v7768_v13 = vpack.c.bf16 %v2179_v10, %v2177_v9 }
 0x1e6   : > { %7410 = vmatmul.mubr.msk.f32.gmra.mrb[2].mxu0 %vm587_vm3, %v1427_v16  ;;  %v2178_v16 = vld [vmem:[#allocation2 + $0x2e0] sm:$0xff] }
 0x1e7   : > { %1512 = vmatprep.mubr.f32.mxu0 %v9386_v0  ;;  %1549 = vmatpush1.msra.mxu0 %v1530_v17  ;;  %v2075_v17 = vpop.permute.xlu1 %2074 }
 0x1e8   : > { %7749 = vmatprep.subr.bf16.mxu0 %v7748_v18  ;;  %v7770_v18 = vpack.c.bf16 %v2178_v16, %v2176_v15  ;;  %v2722_v15 = vld [vmem:[#allocation2 + $0x3e0] sm:$0xff] }
 0x1ea   : > { %7411 = vmatmul.mubr.msk.f32.gmra.mrb[4].mxu0 %vm587_vm3, %v1429_v21  ;;  %v2181_v21 = vld [vmem:[#allocation2 + $0x2f8] sm:$0xff] }
 0x1eb   : > { %1608 = vmatprep.mubr.f32.mxu0 %v9386_v0  ;;  %v2079_v31 = vpop.permute.xlu1 %2078 }
 0x1ee   : > { %7412 = vmatmul.mubr.msk.f32.vlgmr.msra.gmra.mrb[0].mxu0 %vm587_vm3, %v1533_v25  ;;  %v2077_v25 = vpop.permute.xlu0 %2076 }
 0x1ef   : > { %1614 = vmatprep.mubr.f32.mxu0 %v9386_v0  ;;  %7751 = vmatpush1.bf16.msra.mxu0 %v7750_v28  ;;  %v2180_v28 = vld [vmem:[#allocation2 + $0x2f0] sm:$0xff] }
 0x1f0   : > { %1658 = vmatprep.subr.mxu0 %v1639_v30  ;;  %v7772_v30 = vpack.c.bf16 %v2289_v24, %v2287_v23  ;;  %v2833_v24 = vld [vmem:[#allocation2 + $0x418] sm:$0xff] }
 0x1f2   : > { %7413 = vmatmul.mubr.msk.f32.gmra.mrb[2].mxu0 %vm587_vm3, %v1535_v35  ;;  %v2288_v35 = vld [vmem:[#allocation2 + $0x310] sm:$0xff]  ;;  %v2293_v45 = vpop.permute.xlu0 %2292 }
 0x1f3   : > { %1620 = vmatprep.mubr.f32.mxu0 %v9386_v0  ;;  %1659 = vmatpush1.msra.mxu0 %v1638_v37  ;;  %v7774_v37 = vpack.c.bf16 %v2288_v35, %v2286_v32  ;;  %v2936_v32 = vld [vmem:[#allocation2 + $0x420] sm:$0xff]  ;;  %v2938_v35 = vld [vmem:[#allocation2 + $0x430] sm:$0xff] }
 0x1f4   : > { %7753 = vmatprep.subr.bf16.mxu0 %v7752_v38  ;;  %v2291_v38 = vld [vmem:[#allocation2 + $0x328] sm:$0xff] }
 0x1f6   : > { %7414 = vmatmul.mubr.msk.f32.gmra.mrb[4].mxu0 %vm587_vm3, %v1537_v39  ;;  %v2395_v39 = vld [vmem:[#allocation2 + $0x338] sm:$0xff] }
 0x1f7   : > { %1718 = vmatprep.mubr.f32.mxu0 %v9386_v0 }
 0x1fa   : > { %7415 = vmatmul.mubr.msk.f32.vlgmr.msra.gmra.mrb[0].mxu0 %vm587_vm3, %v9834_v26  ;;  %v7758_v26 = vpack.c.bf16 %v1854_v49, %v1852_v48  ;;  %v2505_v48 = vld [vmem:[#allocation2 + $0x378] sm:$0xff]  ;;  %v2295_v49 = vpop.permute.xlu1 %2294 }
 0x1fb   : > { %1724 = vmatprep.mubr.f32.mxu0 %v9386_v0  ;;  %7755 = vmatpush1.bf16.msra.mxu0 %v7754_v42  ;;  %v7776_v42 = vpack.c.bf16 %v2397_v40, %v2395_v39  ;;  %v3045_v39 = vld [vmem:[#allocation2 + $0x458] sm:$0xff]  ;;  %v3047_v40 = vld [vmem:[#allocation2 + $0x468] sm:$0xff] }
 0x1fc   : > { %1766 = vmatprep.subr.mxu0 %v1749_v43  ;;  %v2394_v43 = vld [vmem:[#allocation2 + $0x330] sm:$0xff] }
 0x1fe   : > { %7416 = vmatmul.mubr.msk.f32.gmra.mrb[2].mxu0 %vm587_vm3, %v9837_v27  ;;  %v1856_v27 = vld [vmem:[#allocation2 + $0x260] sm:$0xff]  ;;  %v2401_v53 = vpop.permute.xlu1 %2400 }
 0x1ff   : > { %1730 = vmatprep.mubr.f32.mxu0 %v9386_v0  ;;  %1767 = vmatpush1.msra.mxu0 %v1748_v46  ;;  %v2399_v46 = vld [vmem:[#allocation2 + $0x358] sm:$0xff] }
 0x200   : > { %7757 = vmatprep.subr.bf16.mxu0 %v7756_v47  ;;  %v2503_v47 = vld [vmem:[#allocation2 + $0x368] sm:$0xff] }
 0x202   : > { %7417 = vmatmul.mubr.msk.f32.gmra.mrb[4].mxu0 %vm587_vm3, %v9845_v29  ;;  %v1960_v29 = vld [vmem:[#allocation2 + $0x270] sm:$0xff] }
 0x203   : > { %1826 = vmatprep.mubr.f32.mxu0 %v9386_v0  ;;  %v7762_v59 = vpack.c.bf16 %v1962_v57, %v1960_v29  ;;  %v2506_v29 = vld [vmem:[#allocation2 + $0x380] sm:$0xff] }
 0x206   : > { %7418 = vmatmul.mubr.msk.f32.vlgmr.msra.gmra.mrb[0].mxu0 %vm587_vm3, %v1751_v50  ;;  %v7780_v50 = vpack.c.bf16 %v2505_v48, %v2503_v47  ;;  %v3153_v47 = vld [vmem:[#allocation2 + $0x488] sm:$0xff]  ;;  %v3155_v48 = vld [vmem:[#allocation2 + $0x498] sm:$0xff] }
 0x207   : > { %1832 = vmatprep.mubr.f32.mxu0 %v9386_v0  ;;  %7759 = vmatpush1.bf16.msra.mxu0 %v7758_v26  ;;  %v2297_v26 = vpop.permute.xlu0 %2296 }
 0x208   : > { %1874 = vmatprep.subr.mxu0 %v1857_v51  ;;  %v2504_v51 = vld [vmem:[#allocation2 + $0x370] sm:$0xff] }
 0x20a   : > { %7419 = vmatmul.mubr.msk.f32.gmra.mrb[2].mxu0 %vm587_vm3, %v1753_v54  ;;  %v2507_v54 = vld [vmem:[#allocation2 + $0x388] sm:$0xff] }
 0x20b   : > { %1838 = vmatprep.mubr.f32.mxu0 %v9386_v0  ;;  %1875 = vmatpush1.msra.mxu0 %v1856_v27  ;;  %v2611_v27 = vld [vmem:[#allocation2 + $0x398] sm:$0xff] }
 0x20c   : > { %7761 = vmatprep.subr.bf16.mxu0 %v7760_v55  ;;  %v2613_v55 = vld [vmem:[#allocation2 + $0x3a8] sm:$0xff] }
 0x20d   : > { %v7784_v57 = vpack.c.bf16 %v2613_v55, %v2611_v27  ;;  %v3156_v55 = vld [vmem:[#allocation2 + $0x4a0] sm:$0xff] }
 0x20e   : > { %7420 = vmatmul.mubr.msk.f32.gmra.mrb[4].mxu0 %vm587_vm3, %v1755_v56  ;;  %v2403_v56 = vpop.permute.xlu0 %2402 }
 0x20f   : > { %1934 = vmatprep.mubr.f32.mxu0 %v9386_v0 }
 0x212   : > { %7421 = vmatmul.mubr.msk.f32.vlgmr.msra.gmra.mrb[0].mxu0 %vm587_vm3, %v1859_v20  ;;  %v2405_v20 = vpop.permute.xlu1 %2404  ;;  %v2509_v22 = vpop.permute.xlu0 %2508 }
 0x213   : > { %1940 = vmatprep.mubr.f32.mxu0 %v9386_v0  ;;  %7763 = vmatpush1.bf16.msra.mxu0 %v7762_v59  ;;  %v2610_v59 = vld [vmem:[#allocation2 + $0x390] sm:$0xff] }
 0x214   : > { %1982 = vmatprep.subr.mxu0 %v1965_v60  ;;  %v2612_v60 = vld [vmem:[#allocation2 + $0x3a0] sm:$0xff] }
 0x215   : > { %v7786_v61 = vpack.c.bf16 %v2612_v60, %v2610_v59  ;;  %v3430_v59 = vld [vmem:[#allocation7] sm:$0xff]  ;;  %v9391_v60 = vmov 0.0|0.0  }
 0x216   : > { %7422 = vmatmul.mubr.msk.f32.gmra.mrb[2].mxu0 %vm587_vm3, %v1861_v63  ;;  %v2615_v63 = vld [vmem:[#allocation2 + $0x3b8] sm:$0xff] }
 0x217   : > { %1946 = vmatprep.mubr.f32.mxu0 %v9386_v0  ;;  %1983 = vmatpush1.msra.mxu0 %v1964_v1  ;;  %v2719_v1 = vld [vmem:[#allocation2 + $0x3c8] sm:$0xff] }
 0x218   : > { %7765 = vmatprep.subr.bf16.mxu0 %v7764_v4  ;;  %v2721_v4 = vld [vmem:[#allocation2 + $0x3d8] sm:$0xff] }
 0x219   : > { %v7788_v6 = vpack.c.bf16 %v2721_v4, %v2719_v1  ;;  %v3433_v1 = vld [vmem:[#allocation7 + $0x18] sm:$0xff] }
 0x21a   : > { %7423 = vmatmul.mubr.msk.f32.gmra.mrb[4].mxu0 %vm587_vm3, %v1863_v3  ;;  %v2511_v3 = vpop.permute.xlu1 %2510 }
 0x21b   : > { %2042 = vmatprep.mubr.f32.mxu0 %v9386_v0 }
 0x21e   : > { %7424 = vmatmul.mubr.msk.f32.vlgmr.msra.gmra.mrb[0].mxu0 %vm587_vm3, %v1967_v7  ;;  %v2513_v7 = vpop.permute.xlu0 %2512  ;;  %v2617_v9 = vpop.permute.xlu1 %2616 }
 0x21f   : > { %2048 = vmatprep.mubr.f32.mxu0 %v9386_v0  ;;  %7767 = vmatpush1.bf16.msra.mxu0 %v7766_v8  ;;  %v2718_v8 = vld [vmem:[#allocation2 + $0x3c0] sm:$0xff] }
 0x220   : > { %2090 = vmatprep.subr.mxu0 %v2073_v2  ;;  %v2720_v2 = vld [vmem:[#allocation2 + $0x3d0] sm:$0xff] }
 0x221   : > { %v7790_v10 = vpack.c.bf16 %v2720_v2, %v2718_v8  ;;  %v3437_v8 = vld [vmem:[#allocation7 + $0x38] sm:$0xff] }
 0x222   : > { %7425 = vmatmul.mubr.msk.f32.gmra.mrb[2].mxu0 %vm587_vm3, %v1969_v11  ;;  %v2723_v11 = vld [vmem:[#allocation2 + $0x3e8] sm:$0xff] }
 0x223   : > { %2054 = vmatprep.mubr.f32.mxu0 %v9386_v0  ;;  %2091 = vmatpush1.msra.mxu0 %v2072_v12  ;;  %v2829_v12 = vld [vmem:[#allocation2 + $0x3f8] sm:$0xff] }
 0x224   : > { %7769 = vmatprep.subr.bf16.mxu0 %v7768_v13  ;;  %v2831_v13 = vld [vmem:[#allocation2 + $0x408] sm:$0xff] }
 0x225   : > { %v7792_v16 = vpack.c.bf16 %v2831_v13, %v2829_v12  ;;  %v3440_v12 = vld [vmem:[#allocation7 + $0x50] sm:$0xff]  ;;  %v3441_v13 = vld [vmem:[#allocation7 + $0x58] sm:$0xff] }
 0x226   : > { %7426 = vmatmul.mubr.msk.f32.gmra.mrb[4].mxu0 %vm587_vm3, %v1971_v14  ;;  %v2619_v14 = vpop.permute.xlu0 %2618 }
 0x227   : > { %2150 = vmatprep.mubr.f32.mxu0 %v9386_v0 }
 0x22a   : > { %7427 = vmatmul.mubr.msk.f32.vlgmr.msra.gmra.mrb[0].mxu0 %vm587_vm3, %v2075_v17  ;;  %v2621_v17 = vpop.permute.xlu1 %2620 }
 0x22b   : > { %2156 = vmatprep.mubr.f32.mxu0 %v9386_v0  ;;  %7771 = vmatpush1.bf16.msra.mxu0 %v7770_v18  ;;  %v2828_v18 = vld [vmem:[#allocation2 + $0x3f0] sm:$0xff] }
 0x22c   : > { %2200 = vmatprep.subr.mxu0 %v2181_v21  ;;  %v2830_v21 = vld [vmem:[#allocation2 + $0x400] sm:$0xff] }
 0x22d   : > { %v7794_v23 = vpack.c.bf16 %v2830_v21, %v2828_v18  ;;  %v3444_v18 = vld [vmem:[#allocation7 + $0x70] sm:$0xff]  ;;  %v3445_v21 = vld [vmem:[#allocation7 + $0x78] sm:$0xff] }
 0x22e   : > { %7428 = vmatmul.mubr.msk.f32.gmra.mrb[2].mxu0 %vm587_vm3, %v2077_v25  ;;  %v2937_v25 = vld [vmem:[#allocation2 + $0x428] sm:$0xff] }
 0x22f   : > { %2162 = vmatprep.mubr.f32.mxu0 %v9386_v0  ;;  %2201 = vmatpush1.msra.mxu0 %v2180_v28  ;;  %v2939_v28 = vld [vmem:[#allocation2 + $0x438] sm:$0xff] }
 0x230   : > { %7773 = vmatprep.subr.bf16.mxu0 %v7772_v30  ;;  %v2832_v30 = vld [vmem:[#allocation2 + $0x410] sm:$0xff] }
 0x232   : > { %7429 = vmatmul.mubr.msk.f32.gmra.mrb[4].mxu0 %vm587_vm3, %v2079_v31  ;;  %v7796_v31 = vpack.c.bf16 %v2939_v28, %v2937_v25  ;;  %v3447_v25 = vld [vmem:[#allocation7 + $0x88] sm:$0xff] }
 0x233   : > { %2260 = vmatprep.mubr.f32.mxu0 %v9386_v0 }
 0x236   : > { %7430 = vmatmul.mubr.msk.f32.vlgmr.msra.gmra.mrb[0].mxu0 %vm587_vm3, %v9871_v33  ;;  %v7778_v33 = vpack.c.bf16 %v2396_v44, %v2394_v43  ;;  %v3046_v44 = vld [vmem:[#allocation2 + $0x460] sm:$0xff] }
 0x237   : > { %2266 = vmatprep.mubr.f32.mxu0 %v9386_v0  ;;  %7775 = vmatpush1.bf16.msra.mxu0 %v7774_v37  ;;  %v2835_v37 = vpop.permute.xlu0 %2834 }
 0x238   : > { %2308 = vmatprep.subr.mxu0 %v2291_v38  ;;  %v2941_v38 = vld [vmem:[#allocation2 + $0x448] sm:$0xff] }
 0x23a   : > { %7431 = vmatmul.mubr.msk.f32.gmra.mrb[2].mxu0 %vm587_vm3, %v9874_v34  ;;  %v2398_v34 = vld [vmem:[#allocation2 + $0x350] sm:$0xff] }
 0x23b   : > { %2272 = vmatprep.mubr.f32.mxu0 %v9386_v0  ;;  %2309 = vmatpush1.msra.mxu0 %v2290_v41  ;;  %v2837_v41 = vpop.permute.xlu1 %2836  ;;  %v2839_v43 = vpop.permute.xlu0 %2838 }
 0x23c   : > { %7777 = vmatprep.subr.bf16.mxu0 %v7776_v42  ;;  %v7800_v42 = vpack.c.bf16 %v3047_v40, %v3045_v39  ;;  %v3453_v39 = vld [vmem:[#allocation7 + $0xb8] sm:$0xff] }
 0x23e   : > { %7432 = vmatmul.mubr.msk.f32.gmra.mrb[4].mxu0 %vm587_vm3, %v9882_v36  ;;  %v2502_v36 = vld [vmem:[#allocation2 + $0x360] sm:$0xff] }
 0x23f   : > { %2368 = vmatprep.mubr.f32.mxu0 %v9386_v0  ;;  %v7782_v19 = vpack.c.bf16 %v2504_v51, %v2502_v36  ;;  %v3152_v36 = vld [vmem:[#allocation2 + $0x480] sm:$0xff]  ;;  %v3154_v51 = vld [vmem:[#allocation2 + $0x490] sm:$0xff] }
 0x242   : > { %7433 = vmatmul.mubr.msk.f32.vlgmr.msra.gmra.mrb[0].mxu0 %vm587_vm3, %v2293_v45  ;;  %v2943_v45 = vpop.permute.xlu1 %2942 }
 0x243   : > { %2374 = vmatprep.mubr.f32.mxu0 %v9386_v0  ;;  %7779 = vmatpush1.bf16.msra.mxu0 %v7778_v33 }
 0x244   : > { %2416 = vmatprep.subr.mxu0 %v2399_v46  ;;  %v3049_v46 = vld [vmem:[#allocation2 + $0x478] sm:$0xff] }
 0x246   : > { %7434 = vmatmul.mubr.msk.f32.gmra.mrb[2].mxu0 %vm587_vm3, %v2295_v49  ;;  %v2945_v49 = vpop.permute.xlu0 %2944 }
 0x247   : > { %2380 = vmatprep.mubr.f32.mxu0 %v9386_v0  ;;  %2417 = vmatpush1.msra.mxu0 %v2398_v34  ;;  %v3048_v34 = vld [vmem:[#allocation2 + $0x470] sm:$0xff] }
 0x248   : > { %7781 = vmatprep.subr.bf16.mxu0 %v7780_v50  ;;  %v7804_v50 = vpack.c.bf16 %v3155_v48, %v3153_v47 }
 0x24a   : > { %7435 = vmatmul.mubr.msk.f32.gmra.mrb[4].mxu0 %vm587_vm3, %v2297_v26  ;;  %v2947_v26 = vpop.permute.xlu1 %2946 }
 0x24b   : > { %2476 = vmatprep.mubr.f32.mxu0 %v9386_v0 }
 0x24e   : > { %7436 = vmatmul.mubr.msk.f32.vlgmr.msra.gmra.mrb[0].mxu0 %vm587_vm3, %v2401_v53  ;;  %v3051_v53 = vpop.permute.xlu0 %3050  ;;  %v3053_v27 = vpop.permute.xlu1 %3052 }
 0x24f   : > { %2482 = vmatprep.mubr.f32.mxu0 %v9386_v0  ;;  %7783 = vmatpush1.bf16.msra.mxu0 %v7782_v19  ;;  %v7806_v19 = vpack.c.bf16 %v3154_v51, %v3152_v36  ;;  %v3260_v36 = vld [vmem:[%s10815_s3 + $0x8] sm:$0xf] }
 0x250   : > { %2524 = vmatprep.subr.mxu0 %v2507_v54  ;;  %v3157_v54 = vld [vmem:[#allocation2 + $0x4a8] sm:$0xff] }
 0x251   : > { %v3543_v51 = vld [vmem:[#allocation7 + $0xf0] sm:$0xff] }
 0x252   : > { %7437 = vmatmul.mubr.msk.f32.gmra.mrb[2].mxu0 %vm587_vm3, %v2403_v56  ;;  %v3055_v56 = vpop.permute.xlu0 %3054 }
 0x253   : > { %2488 = vmatprep.mubr.f32.mxu0 %v9386_v0  ;;  %2525 = vmatpush1.msra.mxu0 %v2506_v29  ;;  %v3159_v29 = vpop.permute.xlu1 %3158 }
 0x254   : > { %7785 = vmatprep.subr.bf16.mxu0 %v7784_v57 }
 0x256   : > { %7438 = vmatmul.mubr.msk.f32.gmra.mrb[4].mxu0 %vm587_vm3, %v2405_v20  ;;  %v3161_v57 = vpop.permute.xlu0 %3160 }
 0x257   : > { %2584 = vmatprep.mubr.f32.mxu0 %v9386_v0  ;;  %v3163_v20 = vpop.permute.xlu1 %3162 }
 0x25a   : > { %7439 = vmatmul.mubr.msk.f32.vlgmr.msra.gmra.mrb[0].mxu0 %vm587_vm3, %v2509_v22  ;;  %v3431_v22 = vld [vmem:[#allocation7 + $0x8] sm:$0xff] }
 0x25b   : > { %2590 = vmatprep.mubr.f32.mxu0 %v9386_v0  ;;  %7787 = vmatpush1.bf16.msra.mxu0 %v7786_v61  ;;  %v10106_v61 = vpack.c.bf16 %v3431_v22, %v3430_v59  ;;  %v3549_v22 = vld [vmem:[#allocation7 + $0x120] sm:$0xff] }
 0x25c   : > { %2632 = vmatprep.subr.mxu0 %v2615_v63  ;;  %v3432_v63 = vld [vmem:[#allocation7 + $0x10] sm:$0xff] }
 0x25d   : > { %v10109_v4 = vpack.c.bf16 %v3433_v1, %v3432_v63  ;;  %v3550_v63 = vld [vmem:[#allocation7 + $0x128] sm:$0xff] }
 0x25e   : > { %7440 = vmatmul.mubr.msk.f32.gmra.mrb[2].mxu0 %vm587_vm3, %v2511_v3  ;;  %v3434_v3 = vld [vmem:[#allocation7 + $0x20] sm:$0xff]  ;;  %v10193_v1 = vpack.c.bf16 %v3550_v63, %v3549_v22  ;;  %v4020_v63 = vld [vmem:[#allocation8 + $0x178] sm:$0xff] }
 0x25f   : > { %2596 = vmatprep.mubr.f32.mxu0 %v9386_v0  ;;  %2633 = vmatpush1.msra.mxu0 %v2614_v5  ;;  %v3435_v5 = vld [vmem:[#allocation7 + $0x28] sm:$0xff] }
 0x260   : > { %7789 = vmatprep.subr.bf16.mxu0 %v7788_v6  ;;  %v10113_v6 = vpack.c.bf16 %v3435_v5, %v3434_v3  ;;  %v3551_v3 = vld [vmem:[#allocation7 + $0x130] sm:$0xff]  ;;  %v3552_v5 = vld [vmem:[#allocation7 + $0x138] sm:$0xff] }
 0x262   : > { %7441 = vmatmul.mubr.msk.f32.gmra.mrb[4].mxu0 %vm587_vm3, %v2513_v7  ;;  %v3436_v7 = vld [vmem:[#allocation7 + $0x30] sm:$0xff] }
 0x263   : > { %2692 = vmatprep.mubr.f32.mxu0 %v9386_v0  ;;  %v10117_v2 = vpack.c.bf16 %v3437_v8, %v3436_v7  ;;  %v10197_v7 = vpack.c.bf16 %v3552_v5, %v3551_v3  ;;  %v3553_v8 = vld [vmem:[#allocation7 + $0x140] sm:$0xff] }
 0x264   : > { %v4017_v5 = vld [vmem:[#allocation8 + $0x160] sm:$0xff] }
 0x266   : > { %7442 = vmatmul.mubr.msk.f32.vlgmr.msra.gmra.mrb[0].mxu0 %vm587_vm3, %v2617_v9  ;;  %v3438_v9 = vld [vmem:[#allocation7 + $0x40] sm:$0xff] }
 0x267   : > { %2698 = vmatprep.mubr.f32.mxu0 %v9386_v0  ;;  %7791 = vmatpush1.bf16.msra.mxu0 %v7790_v10  ;;  %v3439_v10 = vld [vmem:[#allocation7 + $0x48] sm:$0xff] }
 0x268   : > { %2742 = vmatprep.subr.mxu0 %v2723_v11  ;;  %v10121_v11 = vpack.c.bf16 %v3439_v10, %v3438_v9  ;;  %v3554_v9 = vld [vmem:[#allocation7 + $0x148] sm:$0xff] }
 0x269   : > { %v10201_v10 = vpack.c.bf16 %v3554_v9, %v3553_v8  ;;  %v4022_v8 = vld [vmem:[#allocation8 + $0x188] sm:$0xff]  ;;  %v4024_v9 = vld [vmem:[#allocation8 + $0x198] sm:$0xff] }
 0x26a   : > { %7443 = vmatmul.mubr.msk.f32.gmra.mrb[2].mxu0 %vm587_vm3, %v2619_v14  ;;  %v10125_v14 = vpack.c.bf16 %v3441_v13, %v3440_v12  ;;  %v3555_v12 = vld [vmem:[#allocation7 + $0x150] sm:$0xff]  ;;  %v3556_v13 = vld [vmem:[#allocation7 + $0x158] sm:$0xff] }
 0x26b   : > { %2704 = vmatprep.mubr.f32.mxu0 %v9386_v0  ;;  %2743 = vmatpush1.msra.mxu0 %v2722_v15  ;;  %v3442_v15 = vld [vmem:[#allocation7 + $0x60] sm:$0xff] }
 0x26c   : > { %7793 = vmatprep.subr.bf16.mxu0 %v7792_v16  ;;  %v3443_v16 = vld [vmem:[#allocation7 + $0x68] sm:$0xff] }
 0x26e   : > { %7444 = vmatmul.mubr.msk.f32.gmra.mrb[4].mxu0 %vm587_vm3, %v2621_v17  ;;  %v10129_v17 = vpack.c.bf16 %v3443_v16, %v3442_v15  ;;  %v10205_v15 = vpack.c.bf16 %v3556_v13, %v3555_v12  ;;  %v3557_v16 = vld [vmem:[#allocation7 + $0x160] sm:$0xff]  ;;  %v8044_v12 = vpack.c.bf16 %v4024_v9, %v4022_v8  ;;  %v3857_v8 = vld [vmem:[#allocation8 + $0x118] sm:$0xff] }
 0x26f   : > { %2802 = vmatprep.mubr.f32.mxu0 %v9386_v0  ;;  %v4021_v13 = vld [vmem:[#allocation8 + $0x180] sm:$0xff] }
 0x272   : > { %7445 = vmatmul.mubr.msk.f32.vlgmr.msra.gmra.mrb[0].mxu0 %vm587_vm3, %v9912_v52  ;;  %v7798_v52 = vpack.c.bf16 %v2938_v35, %v2936_v32  ;;  %v3450_v35 = vld [vmem:[#allocation7 + $0xa0] sm:$0xff] }
 0x273   : > { %2808 = vmatprep.mubr.f32.mxu0 %v9386_v0  ;;  %7795 = vmatpush1.bf16.msra.mxu0 %v7794_v23  ;;  %v10133_v23 = vpack.c.bf16 %v3445_v21, %v3444_v18  ;;  %v3558_v18 = vld [vmem:[#allocation7 + $0x168] sm:$0xff] }
 0x274   : > { %2850 = vmatprep.subr.mxu0 %v2833_v24  ;;  %v3446_v24 = vld [vmem:[#allocation7 + $0x80] sm:$0xff]  ;;  %v10209_v21 = vpack.c.bf16 %v3558_v18, %v3557_v16  ;;  %v4026_v16 = vld [vmem:[#allocation8 + $0x1a8] sm:$0xff]  ;;  %v4028_v18 = vld [vmem:[#allocation8 + $0x1b8] sm:$0xff] }
 0x275   : > { %v10137_v28 = vpack.c.bf16 %v3447_v25, %v3446_v24  ;;  %v3559_v24 = vld [vmem:[#allocation7 + $0x170] sm:$0xff]  ;;  %v3560_v25 = vld [vmem:[#allocation7 + $0x178] sm:$0xff] }
 0x276   : > { %7446 = vmatmul.mubr.msk.f32.gmra.mrb[2].mxu0 %vm587_vm3, %v9921_v58  ;;  %v2940_v58 = vld [vmem:[#allocation2 + $0x440] sm:$0xff] }
 0x277   : > { %2814 = vmatprep.mubr.f32.mxu0 %v9386_v0  ;;  %2851 = vmatpush1.msra.mxu0 %v2832_v30  ;;  %v3448_v30 = vld [vmem:[#allocation7 + $0x90] sm:$0xff] }
 0x278   : > { %7797 = vmatprep.subr.bf16.mxu0 %v7796_v31  ;;  %v3449_v31 = vld [vmem:[#allocation7 + $0x98] sm:$0xff] }
 0x279   : > { %v10141_v32 = vpack.c.bf16 %v3449_v31, %v3448_v30  ;;  %v10213_v30 = vpack.c.bf16 %v3560_v25, %v3559_v24  ;;  %v3561_v31 = vld [vmem:[#allocation7 + $0x180] sm:$0xff]  ;;  %v8048_v24 = vpack.c.bf16 %v4028_v18, %v4026_v16  ;;  %v3859_v18 = vld [vmem:[#allocation8 + $0x128] sm:$0xff] }
 0x27a   : > { %7447 = vmatmul.mubr.msk.f32.gmra.mrb[4].mxu0 %vm587_vm3, %v9930_v62  ;;  %v3044_v62 = vld [vmem:[#allocation2 + $0x450] sm:$0xff] }
 0x27b   : > { %2910 = vmatprep.mubr.f32.mxu0 %v9386_v0  ;;  %v7802_v33 = vpack.c.bf16 %v3046_v44, %v3044_v62  ;;  %v3457_v62 = vld [vmem:[#allocation7 + $0xd8] sm:$0xff]  ;;  %v4025_v25 = vld [vmem:[#allocation8 + $0x1a0] sm:$0xff] }
 0x27e   : > { %7448 = vmatmul.mubr.msk.f32.vlgmr.msra.gmra.mrb[0].mxu0 %vm587_vm3, %v2835_v37  ;;  %v3451_v37 = vld [vmem:[#allocation7 + $0xa8] sm:$0xff] }
 0x27f   : > { %2916 = vmatprep.mubr.f32.mxu0 %v9386_v0  ;;  %7799 = vmatpush1.bf16.msra.mxu0 %v7798_v52  ;;  %v10145_v52 = vpack.c.bf16 %v3451_v37, %v3450_v35  ;;  %v3562_v35 = vld [vmem:[#allocation7 + $0x188] sm:$0xff] }
 0x280   : > { %2958 = vmatprep.subr.mxu0 %v2941_v38  ;;  %v3452_v38 = vld [vmem:[#allocation7 + $0xb0] sm:$0xff]  ;;  %v10217_v37 = vpack.c.bf16 %v3562_v35, %v3561_v31  ;;  %v4030_v31 = vld [vmem:[#allocation8 + $0x1c8] sm:$0xff]  ;;  %v4032_v35 = vld [vmem:[#allocation8 + $0x1d8] sm:$0xff] }
 0x281   : > { %v10149_v40 = vpack.c.bf16 %v3453_v39, %v3452_v38  ;;  %v3563_v38 = vld [vmem:[#allocation7 + $0x190] sm:$0xff]  ;;  %v3564_v39 = vld [vmem:[#allocation7 + $0x198] sm:$0xff] }
 0x282   : > { %7449 = vmatmul.mubr.msk.f32.gmra.mrb[2].mxu0 %vm587_vm3, %v2837_v41  ;;  %v3454_v41 = vld [vmem:[#allocation7 + $0xc0] sm:$0xff] }
 0x283   : > { %2922 = vmatprep.mubr.f32.mxu0 %v9386_v0  ;;  %2959 = vmatpush1.msra.mxu0 %v2940_v58  ;;  %v3455_v58 = vld [vmem:[#allocation7 + $0xc8] sm:$0xff] }
 0x284   : > { %7801 = vmatprep.subr.bf16.mxu0 %v7800_v42  ;;  %v10153_v42 = vpack.c.bf16 %v3455_v58, %v3454_v41  ;;  %v10221_v41 = vpack.c.bf16 %v3564_v39, %v3563_v38  ;;  %v3565_v58 = vld [vmem:[#allocation7 + $0x1a0] sm:$0xff]  ;;  %v8052_v38 = vpack.c.bf16 %v4032_v35, %v4030_v31 }
 0x285   : > { %v4029_v39 = vld [vmem:[#allocation8 + $0x1c0] sm:$0xff] }
 0x286   : > { %7450 = vmatmul.mubr.msk.f32.gmra.mrb[4].mxu0 %vm587_vm3, %v2839_v43  ;;  %v3456_v43 = vld [vmem:[#allocation7 + $0xd0] sm:$0xff] }
 0x287   : > { %3018 = vmatprep.mubr.f32.mxu0 %v9386_v0  ;;  %v10157_v44 = vpack.c.bf16 %v3457_v62, %v3456_v43  ;;  %v3566_v43 = vld [vmem:[#allocation7 + $0x1a8] sm:$0xff] }
 0x288   : > { %v10225_v62 = vpack.c.bf16 %v3566_v43, %v3565_v58  ;;  %v4112_v58 = vld [vmem:[#allocation8 + $0x1e8] sm:$0xff]  ;;  %v4114_v43 = vld [vmem:[#allocation8 + $0x1f8] sm:$0xff] }
 0x28a   : > { %7451 = vmatmul.mubr.msk.f32.vlgmr.msra.gmra.mrb[0].mxu0 %vm587_vm3, %v2943_v45 }
 0x28b   : > { %3024 = vmatprep.mubr.f32.mxu0 %v9386_v0  ;;  %7803 = vmatpush1.bf16.msra.mxu0 %v7802_v33 }
 0x28c   : > { %3066 = vmatprep.subr.mxu0 %v3049_v46 }
 0x28e   : > { %7452 = vmatmul.mubr.msk.f32.gmra.mrb[2].mxu0 %vm587_vm3, %v2945_v49 }
 0x28f   : > { %3030 = vmatprep.mubr.f32.mxu0 %v9386_v0  ;;  %3067 = vmatpush1.msra.mxu0 %v3048_v34 }
 0x290   : > { %7805 = vmatprep.subr.bf16.mxu0 %v7804_v50 }
 0x292   : > { %7453 = vmatmul.mubr.msk.f32.gmra.mrb[4].mxu0 %vm587_vm3, %v2947_v26  ;;  %v3259_v26 = vld [vmem:[%s10815_s3] sm:$0xff] }
 0x293   : > { %3126 = vmatprep.mubr.f32.mxu0 %v9386_v0 }
 0x296   : > { %7454 = vmatmul.mubr.msk.f32.vlgmr.msra.gmra.mrb[0].mxu0 %vm587_vm3, %v3051_v53  ;;  %v3544_v53 = vld [vmem:[#allocation7 + $0xf8] sm:$0xff] }
 0x297   : > { %3132 = vmatprep.mubr.f32.mxu0 %v9386_v0  ;;  %7807 = vmatpush1.bf16.msra.mxu0 %v7806_v19  ;;  %v7462_v19 = vld [vmem:[%s10815_s3 + $0x10] sm:$0xff] }
 0x298   : > { %3174 = vmatprep.subr.mxu0 %v3157_v54  ;;  %v10175_v54 = vpack.c.bf16 %v3544_v53, %v3543_v51  ;;  %v3459_v51 = vld [vmem:[#allocation7 + $0xe8] sm:$0xff] }
 0x29a   : > { %7455 = vmatmul.mubr.msk.f32.gmra.mrb[2].mxu0 %vm587_vm3, %v3053_v27  ;;  %v3545_v27 = vld [vmem:[#allocation7 + $0x100] sm:$0xff] }
 0x29b   : > { %3138 = vmatprep.mubr.f32.mxu0 %v9386_v0  ;;  %3175 = vmatpush1.msra.mxu0 %v3156_v55  ;;  %v3546_v55 = vld [vmem:[#allocation7 + $0x108] sm:$0xff] }
 0x29c   : > { %7816 = vmatprep.subr.bf16.mxu0 %v9391_v60 }
 0x29e   : > { %7456 = vmatmul.mubr.msk.f32.gmra.mrb[4].mxu0 %vm587_vm3, %v3055_v56  ;;  %v7463_v56 = vld [vmem:[%s10815_s3 + $0x18] sm:$0xf] }
 0x29f   : > { %3234 = vmatprep.mubr.f32.mxu0 %v9386_v0 }
 0x2a2   : > { %7457 = vmatmul.mubr.msk.f32.vlgmr.msra.gmra.mrb[0].mxu0 %vm587_vm3, %v3159_v29  ;;  %v10184_v29 = vpack.c.bf16 %v3546_v55, %v3545_v27 }
 0x2a3   : > { %3240 = vmatprep.mubr.f32.mxu0 %v9386_v0  ;;  %7818 = vmatpush1.bf16.msra.mxu0 %v10106_v61 }
 0x2a4   : > { %7819 = vmatprep.subr.bf16.mxu0 %v9391_v60 }
 0x2a6   : > { %7458 = vmatmul.mubr.msk.f32.gmra.mrb[2].mxu0 %vm587_vm3, %v3161_v57  ;;  %v3547_v57 = vld [vmem:[#allocation7 + $0x110] sm:$0xff] }
 0x2a7   : > { %3246 = vmatprep.mubr.f32.mxu0 %v9386_v0  ;;  %7821 = vmatpush1.bf16.msra.mxu0 %v10109_v4 }
 0x2a8   : > { %7822 = vmatprep.subr.bf16.mxu0 %v9391_v60 }
 0x2aa   : > { %7459 = vmatmul.mubr.msk.f32.gmra.mrb[4].mxu0 %vm587_vm3, %v3163_v20  ;;  %v3548_v20 = vld [vmem:[#allocation7 + $0x118] sm:$0xff] }
 0x2ab   : > { %7824 = vmatpush1.bf16.msra.mxu0 %v10113_v6  ;;  %v10189_v59 = vpack.c.bf16 %v3548_v20, %v3547_v57 }
 0x2ac   : > { %7825 = vmatprep.subr.bf16.mxu0 %v9391_v60 }
 0x2af   : > { %7827 = vmatpush1.bf16.msra.mxu0 %v10117_v2 }
 0x2b0   : > { %7828 = vmatprep.subr.bf16.mxu0 %v9391_v60 }
 0x2b3   : > { %7830 = vmatpush1.bf16.msra.mxu0 %v10121_v11 }
 0x2b4   : > { %7831 = vmatprep.subr.bf16.mxu0 %v9391_v60 }
 0x2b7   : > { %7833 = vmatpush1.bf16.msra.mxu0 %v10125_v14 }
 0x2b8   : > { %7834 = vmatprep.subr.bf16.mxu0 %v9391_v60 }
 0x2bb   : > { %7836 = vmatpush1.bf16.msra.mxu0 %v10129_v17 }
 0x2bc   : > { %7837 = vmatprep.subr.bf16.mxu0 %v9391_v60 }
 0x2bf   : > { %7839 = vmatpush1.bf16.msra.mxu0 %v10133_v23 }
 0x2c0   : > { %7840 = vmatprep.subr.bf16.mxu0 %v9391_v60 }
 0x2c3   : > { %7842 = vmatpush1.bf16.msra.mxu0 %v10137_v28 }
 0x2c4   : > { %7843 = vmatprep.subr.bf16.mxu0 %v9391_v60 }
 0x2c7   : > { %7845 = vmatpush1.bf16.msra.mxu0 %v10141_v32 }
 0x2c8   : > { %7846 = vmatprep.subr.bf16.mxu0 %v9391_v60 }
 0x2cb   : > { %7848 = vmatpush1.bf16.msra.mxu0 %v10145_v52 }
 0x2cc   : > { %7849 = vmatprep.subr.bf16.mxu0 %v9391_v60 }
 0x2cf   : > { %7851 = vmatpush1.bf16.msra.mxu0 %v10149_v40 }
 0x2d0   : > { %7852 = vmatprep.subr.bf16.mxu0 %v9391_v60 }
 0x2d3   : > { %7854 = vmatpush1.bf16.msra.mxu0 %v10153_v42 }
 0x2d4   : > { %7855 = vmatprep.subr.bf16.mxu0 %v9391_v60 }
 0x2d7   : > { %7857 = vmatpush1.bf16.msra.mxu0 %v10157_v44 }
 0x2d8   : > { %7858 = vmatprep.subr.bf16.mxu0 %v9391_v60 }
 0x375   : > { %v3236_v45 = vpop.f32.mrb[0].mxu0 }
 0x376   : > { %v3238_v33 = vpop.f32.mrb[1].mxu0 }
 0x379   : > { %v3242_v46 = vpop.f32.mrb[2].mxu0 }
 0x37a   : > { %v7810_v47 = vpack.c.bf16 %v3242_v46, %v3236_v45  ;;  %v3244_v48 = vpop.f32.mrb[3].mxu0  ;;  %v3567_v45 = vld [vmem:[#allocation7 + $0x1b0] sm:$0xff] }
 0x37b   : > { %v7808_v49 = vpack.c.bf16 %v3244_v48, %v3238_v33  ;;  %v3568_v33 = vld [vmem:[#allocation7 + $0x1b8] sm:$0xff]  ;;  %v3570_v48 = vld [vmem:[#allocation7 + $0x1c8] sm:$0xff] }
 0x37c   : > { %v10229_v46 = vpack.c.bf16 %v3568_v33, %v3567_v45  ;;  %v8056_v45 = vpack.c.bf16 %v4114_v43, %v4112_v58 }
 0x37d   : > { %v3248_v34 = vpop.f32.mrb[4].mxu0  ;;  %7809 = vmatprep.subr.bf16.mxu1 %v7808_v49 }
 0x37e   : > { %v3250_v50 = vpop.f32.mrb[5].mxu0  ;;  %7811 = vmatpush1.bf16.msra.mxu1 %v7810_v47 }
 0x37f   : > { %3271 = vmatprep.subr.mxu1 %v3250_v50 }
 0x382   : > { %3272 = vmatpush1.msra.mxu1 %v3248_v34 }
 0x383   : > { %7460 = vmatmul.mubr.msk.f32.vlgmr.msra.gmra.mrb[0].mxu1 %vm587_vm3, %v3259_v26  ;;  %7813 = vmatprep.subr.bf16.mxu1 %v7808_v49 }
 0x384   : > { %7815 = vmatpush1.bf16.msra.mxu1 %v7810_v47  ;;  %3337 = vmatprep.mubr.f32.mxu1 %v9386_v0  ;;  %v3569_v47 = vld [vmem:[#allocation7 + $0x1c0] sm:$0xff] }
 0x385   : > { %3357 = vmatprep.subr.mxu1 %v3250_v50  ;;  %v10233_v49 = vpack.c.bf16 %v3570_v48, %v3569_v47  ;;  %v3572_v50 = vld [vmem:[#allocation7 + $0x1d8] sm:$0xff] }
 0x387   : > { %7461 = vmatmul.mubr.msk.f32.gmra.mrb[2].mxu1 %vm587_vm3, %v3260_v36  ;;  %v3458_v36 = vld [vmem:[#allocation7 + $0xe0] sm:$0xff] }
 0x388   : > { %3358 = vmatpush1.msra.mxu1 %v3248_v34  ;;  %3417 = vmatprep.mubr.f32.mxu1 %v9386_v0  ;;  %v3571_v34 = vld [vmem:[#allocation7 + $0x1d0] sm:$0xff]  ;;  %v7859_v53 = vpack.c.bf16 %v3459_v51, %v3458_v36 }
 0x389   : > { %7861 = vmatprep.subr.bf16.mxu1 %v9391_v60  ;;  %v10237_v26 = vpack.c.bf16 %v3572_v50, %v3571_v34 }
 0x38a   : > { %7860 = vmatpush1.bf16.msra.mxu0 %v7859_v53 }
 0x38b   : > { %7464 = vmatmul.mubr.msk.f32.vlgmr.msra.gmra.mrb[4].mxu1 %vm587_vm3, %v7462_v19 }
 0x38c   : > { %3423 = vmatprep.mubr.f32.mxu1 %v9386_v0  ;;  %7863 = vmatpush1.bf16.msra.mxu1 %v10175_v54 }
 0x38d   : > { %7864 = vmatprep.subr.bf16.mxu1 %v9391_v60 }
 0x38f   : > { %7465 = vmatmul.mubr.msk.f32.gmra.mrb[6].mxu1 %vm587_vm3, %v7463_v56 }
 0x390   : > { %7866 = vmatpush1.bf16.msra.mxu1 %v10184_v29 }
 0x391   : > { %7867 = vmatprep.subr.bf16.mxu1 %v9391_v60 }
 0x394   : > { %7869 = vmatpush1.bf16.msra.mxu1 %v10189_v59 }
 0x395   : > { %7870 = vmatprep.subr.bf16.mxu1 %v9391_v60 }
 0x398   : > { %7872 = vmatpush1.bf16.msra.mxu1 %v10193_v1 }
 0x399   : > { %7873 = vmatprep.subr.bf16.mxu1 %v9391_v60 }
 0x39c   : > { %7875 = vmatpush1.bf16.msra.mxu1 %v10197_v7 }
 0x39d   : > { %7876 = vmatprep.subr.bf16.mxu1 %v9391_v60 }
 0x3a0   : > { %7878 = vmatpush1.bf16.msra.mxu1 %v10201_v10 }
 0x3a1   : > { %7879 = vmatprep.subr.bf16.mxu1 %v9391_v60 }
 0x3a4   : > { %7881 = vmatpush1.bf16.msra.mxu1 %v10205_v15 }
 0x3a5   : > { %7882 = vmatprep.subr.bf16.mxu1 %v9391_v60 }
 0x3a8   : > { %7884 = vmatpush1.bf16.msra.mxu1 %v10209_v21 }
 0x3a9   : > { %7885 = vmatprep.subr.bf16.mxu1 %v9391_v60 }
 0x3ac   : > { %7887 = vmatpush1.bf16.msra.mxu1 %v10213_v30 }
 0x3ad   : > { %7888 = vmatprep.subr.bf16.mxu1 %v9391_v60 }
 0x3b0   : > { %7890 = vmatpush1.bf16.msra.mxu1 %v10217_v37 }
 0x3b1   : > { %7891 = vmatprep.subr.bf16.mxu1 %v9391_v60 }
 0x3b4   : > { %7893 = vmatpush1.bf16.msra.mxu1 %v10221_v41 }
 0x3b5   : > { %7894 = vmatprep.subr.bf16.mxu1 %v9391_v60 }
 0x3b8   : > { %7896 = vmatpush1.bf16.msra.mxu1 %v10225_v62 }
 0x3b9   : > { %7897 = vmatprep.subr.bf16.mxu1 %v9391_v60 }
 0x3bc   : > { %7899 = vmatpush1.bf16.msra.mxu1 %v10229_v46 }
 0x3bd   : > { %7900 = vmatprep.subr.bf16.mxu1 %v9391_v60 }
 0x3c0   : > { %7902 = vmatpush1.bf16.msra.mxu1 %v10233_v49 }
 0x3c1   : > { %7903 = vmatprep.subr.bf16.mxu1 %v9391_v60 }
 0x3c4   : > { %7905 = vmatpush1.bf16.msra.mxu1 %v10237_v26 }
 0x3c5   : > { %7906 = vmatprep.subr.bf16.mxu1 %v9391_v60 }
 0x456   : > { %v3333_v19 = vpop.f32.mrb[0].mxu1 }
 0x457   : > { %v3335_v27 = vpop.f32.mrb[1].mxu1 }
 0x458   : > { %7466 = vmatprep.mubr.msk.f32.mxu0 %vm3460_vm5, %v3335_v27  ;;  %7468 = vmatprep.mubr.msk.f32.mxu1 %vm3460_vm5, %v3335_v27 }
 0x459   : > { %3532 = vmatmul.mubr.f32.vlgmr.msra.gmra.mrb[6].mxu0 %v3333_v19  ;;  %3638 = vmatmul.mubr.f32.vlgmr.msra.gmra.mrb[8].mxu1 %v3333_v19 }
 0x45a   : > { %7908 = vmatpush1.bf16.msra.mxu1 %v10106_v61  ;;  %v3339_v55 = vpop.f32.mrb[2].mxu1 }
 0x45b   : > { %7909 = vmatprep.subr.bf16.mxu1 %v9391_v60  ;;  %v3341_v56 = vpop.f32.mrb[3].mxu1 }
 0x45c   : > { %7467 = vmatprep.mubr.msk.f32.mxu0 %vm3460_vm5, %v3341_v56  ;;  %7469 = vmatprep.mubr.msk.f32.mxu1 %vm3460_vm5, %v3341_v56 }
 0x45d   : > { %3537 = vmatmul.mubr.f32.gmra.mrb[8].mxu0 %v3339_v55  ;;  %3643 = vmatmul.mubr.f32.gmra.mrb[10].mxu1 %v3339_v55 }
 0x45e   : > { %7911 = vmatpush1.bf16.msra.mxu1 %v10109_v4  ;;  %v10249_v57 = vpop.f32.mrb[4].mxu1  ;;  %3932 = vmatprep.mubr.f32.mxu0 %v9386_v0 }
 0x45f   : > { %7912 = vmatprep.subr.bf16.mxu1 %v9391_v60  ;;  %v3421_v20 = vpop.f32.mrb[5].mxu1 }
 0x460   : > { %7470 = vmatprep.mubr.msk.f32.mxu1 %vm3460_vm5, %v3421_v20 }
 0x462   : > { %7914 = vmatpush1.bf16.msra.mxu1 %v10113_v6  ;;  %v3425_v61 = vpop.f32.mrb[6].mxu1 }
 0x463   : > { %7915 = vmatprep.subr.bf16.mxu1 %v9391_v60  ;;  %v3427_v22 = vpop.f32.mrb[7].mxu1 }
 0x466   : > { %7917 = vmatpush1.bf16.msra.mxu1 %v10117_v2 }
 0x467   : > { %7918 = vmatprep.subr.bf16.mxu1 %v9391_v60 }
 0x46a   : > { %7920 = vmatpush1.bf16.msra.mxu1 %v10121_v11 }
 0x46b   : > { %7921 = vmatprep.subr.bf16.mxu1 %v9391_v60 }
 0x46e   : > { %7923 = vmatpush1.bf16.msra.mxu1 %v10125_v14 }
 0x46f   : > { %7924 = vmatprep.subr.bf16.mxu1 %v9391_v60 }
 0x472   : > { %7926 = vmatpush1.bf16.msra.mxu1 %v10129_v17 }
 0x473   : > { %7927 = vmatprep.subr.bf16.mxu1 %v9391_v60 }
 0x476   : > { %7929 = vmatpush1.bf16.msra.mxu1 %v10133_v23 }
 0x477   : > { %7930 = vmatprep.subr.bf16.mxu1 %v9391_v60 }
 0x47a   : > { %7932 = vmatpush1.bf16.msra.mxu1 %v10137_v28 }
 0x47b   : > { %7933 = vmatprep.subr.bf16.mxu1 %v9391_v60 }
 0x47e   : > { %7935 = vmatpush1.bf16.msra.mxu1 %v10141_v32 }
 0x47f   : > { %7936 = vmatprep.subr.bf16.mxu1 %v9391_v60 }
 0x482   : > { %7938 = vmatpush1.bf16.msra.mxu1 %v10145_v52 }
 0x483   : > { %7939 = vmatprep.subr.bf16.mxu1 %v9391_v60 }
 0x486   : > { %7941 = vmatpush1.bf16.msra.mxu1 %v10149_v40  ;;  %v4014_v40 = vld [vmem:[#allocation8 + $0x148] sm:$0xff] }
 0x487   : > { %7942 = vmatprep.subr.bf16.mxu1 %v9391_v60 }
 0x48a   : > { %7944 = vmatpush1.bf16.msra.mxu1 %v10153_v42  ;;  %v4016_v42 = vld [vmem:[#allocation8 + $0x158] sm:$0xff] }
 0x48b   : > { %7945 = vmatprep.subr.bf16.mxu1 %v9391_v60 }
 0x48e   : > { %7947 = vmatpush1.bf16.msra.mxu1 %v10157_v44  ;;  %v4013_v44 = vld [vmem:[#allocation8 + $0x140] sm:$0xff] }
 0x48f   : > { %7948 = vmatprep.subr.bf16.mxu1 %v9391_v60 }
 0x492   : > { %7950 = vmatpush1.bf16.msra.mxu1 %v7859_v53 }
 0x493   : > { %7951 = vmatprep.subr.bf16.mxu1 %v9391_v60 }
 0x495   : > { %3721 = vmatmul.mubr.f32.vlgmr.msra.gmra.mrb[12].mxu1 %v10249_v57 }
 0x496   : > { %7953 = vmatpush1.bf16.msra.mxu1 %v10175_v54  ;;  %7471 = vmatprep.mubr.msk.f32.mxu1 %vm3460_vm5, %v3427_v22  ;;  %v8036_v54 = vpack.c.bf16 %v4016_v42, %v4014_v40 }
 0x497   : > { %7954 = vmatprep.subr.bf16.mxu1 %v9391_v60 }
 0x499   : > { %3726 = vmatmul.mubr.f32.gmra.mrb[14].mxu1 %v3425_v61 }
 0x49a   : > { %7956 = vmatpush1.bf16.msra.mxu1 %v10184_v29  ;;  %7472 = vmatprep.mubr.msk.f32.mxu1 %vm3460_vm5, %v3421_v20  ;;  %v4015_v29 = vld [vmem:[#allocation8 + $0x150] sm:$0xff]  ;;  %v3845_v20 = vld [vmem:[#allocation8 + $0xb8] sm:$0xff] }
 0x49b   : > { %7957 = vmatprep.subr.bf16.mxu1 %v9391_v60 }
 0x49e   : > { %7959 = vmatpush1.bf16.msra.mxu1 %v10189_v59  ;;  %v4018_v59 = vld [vmem:[#allocation8 + $0x168] sm:$0xff] }
 0x49f   : > { %7960 = vmatprep.subr.bf16.mxu1 %v9391_v60  ;;  %v8040_v3 = vpack.c.bf16 %v4020_v63, %v4018_v59  ;;  %v3850_v63 = vld [vmem:[#allocation8 + $0xe0] sm:$0xff] }
 0x4a2   : > { %7962 = vmatpush1.bf16.msra.mxu1 %v10193_v1  ;;  %v8038_v1 = vpack.c.bf16 %v4015_v29, %v4013_v44  ;;  %v3853_v29 = vld [vmem:[#allocation8 + $0xf8] sm:$0xff] }
 0x4a3   : > { %7963 = vmatprep.subr.bf16.mxu1 %v9391_v60 }
 0x4a6   : > { %7965 = vmatpush1.bf16.msra.mxu1 %v10197_v7  ;;  %v4019_v7 = vld [vmem:[#allocation8 + $0x170] sm:$0xff] }
 0x4a7   : > { %7966 = vmatprep.subr.bf16.mxu1 %v9391_v60 }
 0x4aa   : > { %7968 = vmatpush1.bf16.msra.mxu1 %v10201_v10  ;;  %v8042_v10 = vpack.c.bf16 %v4019_v7, %v4017_v5  ;;  %v3855_v7 = vld [vmem:[#allocation8 + $0x108] sm:$0xff] }
 0x4ab   : > { %7969 = vmatprep.subr.bf16.mxu1 %v9391_v60 }
 0x4ae   : > { %7971 = vmatpush1.bf16.msra.mxu1 %v10205_v15  ;;  %v4023_v15 = vld [vmem:[#allocation8 + $0x190] sm:$0xff] }
 0x4af   : > { %7972 = vmatprep.subr.bf16.mxu1 %v9391_v60 }
 0x4b2   : > { %7974 = vmatpush1.bf16.msra.mxu1 %v10209_v21  ;;  %v8046_v21 = vpack.c.bf16 %v4023_v15, %v4021_v13  ;;  %v3856_v13 = vld [vmem:[#allocation8 + $0x110] sm:$0xff] }
 0x4b3   : > { %7975 = vmatprep.subr.bf16.mxu1 %v9391_v60 }
 0x4b6   : > { %7977 = vmatpush1.bf16.msra.mxu1 %v10213_v30  ;;  %v4027_v30 = vld [vmem:[#allocation8 + $0x1b0] sm:$0xff] }
 0x4b7   : > { %7978 = vmatprep.subr.bf16.mxu1 %v9391_v60 }
 0x4ba   : > { %7980 = vmatpush1.bf16.msra.mxu1 %v10217_v37  ;;  %v8050_v37 = vpack.c.bf16 %v4027_v30, %v4025_v25  ;;  %v3858_v25 = vld [vmem:[#allocation8 + $0x120] sm:$0xff]  ;;  %v3860_v30 = vld [vmem:[#allocation8 + $0x130] sm:$0xff] }
 0x4bb   : > { %7981 = vmatprep.subr.bf16.mxu1 %v9391_v60  ;;  %v8014_v31 = vpack.c.bf16 %v3860_v30, %v3858_v25 }
 0x4be   : > { %7983 = vmatpush1.bf16.msra.mxu1 %v10221_v41  ;;  %v4031_v41 = vld [vmem:[#allocation8 + $0x1d0] sm:$0xff] }
 0x4bf   : > { %7984 = vmatprep.subr.bf16.mxu1 %v9391_v60 }
 0x4c2   : > { %7986 = vmatpush1.bf16.msra.mxu1 %v10225_v62  ;;  %v8054_v62 = vpack.c.bf16 %v4031_v41, %v4029_v39 }
 0x4c3   : > { %7987 = vmatprep.subr.bf16.mxu1 %v9391_v60 }
 0x4c6   : > { %7989 = vmatpush1.bf16.msra.mxu1 %v10229_v46 }
 0x4c7   : > { %7990 = vmatprep.subr.bf16.mxu1 %v9391_v60 }
 0x4ca   : > { %7992 = vmatpush1.bf16.msra.mxu1 %v10233_v49 }
 0x4cb   : > { %7993 = vmatprep.subr.bf16.mxu1 %v9391_v60 }
 0x4ce   : > { %7995 = vmatpush1.bf16.msra.mxu1 %v10237_v26  ;;  %v7474_v26 = vld [vmem:[#allocation5] ss:$0 sm:$0xff] }
 0x4cf   : > { %8037 = vmatprep.subr.bf16.mxu1 %v8036_v54  ;;  %v3851_v54 = vld [vmem:[#allocation8 + $0xe8] sm:$0xff] }
 0x4d0   : > { %v8004_v59 = vpack.c.bf16 %v3853_v29, %v3851_v54  ;;  %v4210_v54 = vld [vmem:[#allocation8 + $0x288] sm:$0xff]  ;;  %v4212_v29 = vld [vmem:[#allocation8 + $0x298] sm:$0xff] }
 0x4d1   : > { %3796 = vmatmul.mubr.f32.vlgmr.msra.gmra.mrb[16].mxu1 %v10249_v57  ;;  %v3843_v57 = vld [vmem:[#allocation8 + $0xa8] sm:$0xff] }
 0x4d2   : > { %7473 = vmatprep.mubr.msk.f32.mxu1 %vm3460_vm5, %v3427_v22  ;;  %8039 = vmatpush1.bf16.msra.mxu1 %v8038_v1  ;;  %v3842_v22 = vld [vmem:[#allocation8 + $0xa0] sm:$0xff]  ;;  %v3852_v1 = vld [vmem:[#allocation8 + $0xf0] sm:$0xff] }
 0x4d3   : > { %8041 = vmatprep.subr.bf16.mxu1 %v8040_v3  ;;  %v8006_v3 = vpack.c.bf16 %v3852_v1, %v3850_v63  ;;  %v8076_v1 = vpack.c.bf16 %v4212_v29, %v4210_v54 }
 0x4d5   : > { %3801 = vmatmul.mubr.f32.gmra.mrb[18].mxu1 %v3425_v61 }
 0x4d6   : > { %4101 = vmatprep.mubr.f32.mxu1 %v9386_v0  ;;  %8043 = vmatpush1.bf16.msra.mxu1 %v8042_v10  ;;  %v8008_v10 = vpack.c.bf16 %v3857_v8, %v3855_v7  ;;  %v4214_v7 = vld [vmem:[#allocation8 + $0x2a8] sm:$0xff]  ;;  %v4216_v8 = vld [vmem:[#allocation8 + $0x2b8] sm:$0xff] }
 0x4d7   : > { %8045 = vmatprep.subr.bf16.mxu1 %v8044_v12  ;;  %v3854_v12 = vld [vmem:[#allocation8 + $0x100] sm:$0xff] }
 0x4d8   : > { %v8010_v15 = vpack.c.bf16 %v3856_v13, %v3854_v12  ;;  %v8080_v12 = vpack.c.bf16 %v4216_v8, %v4214_v7  ;;  %v4213_v13 = vld [vmem:[#allocation8 + $0x2a0] sm:$0xff]  ;;  %v4313_v7 = vld [vmem:[#allocation8 + $0x350] sm:$0xff]  ;;  %v3834_v8 = vld [vmem:[#allocation8 + $0x68] sm:$0xff] }
 0x4da   : > { %8047 = vmatpush1.bf16.msra.mxu1 %v8046_v21  ;;  %v3861_v21 = vld [vmem:[#allocation8 + $0x138] sm:$0xff] }
 0x4db   : > { %8049 = vmatprep.subr.bf16.mxu1 %v8048_v24  ;;  %v8012_v24 = vpack.c.bf16 %v3861_v21, %v3859_v18  ;;  %v4218_v18 = vld [vmem:[#allocation8 + $0x2c8] sm:$0xff]  ;;  %v4220_v21 = vld [vmem:[#allocation8 + $0x2d8] sm:$0xff] }
 0x4dc   : > { %v8084_v30 = vpack.c.bf16 %v4220_v21, %v4218_v18 }
 0x4de   : > { %8051 = vmatpush1.bf16.msra.mxu1 %v8050_v37  ;;  %v3822_v37 = vld [vmem:[#allocation8 + $0x8] sm:$0xff] }
 0x4df   : > { %8053 = vmatprep.subr.bf16.mxu1 %v8052_v38  ;;  %v3824_v38 = vld [vmem:[#allocation8 + $0x18] sm:$0xff] }
 0x4e0   : > { %v8016_v41 = vpack.c.bf16 %v3824_v38, %v3822_v37  ;;  %v4222_v37 = vld [vmem:[#allocation8 + $0x2e8] sm:$0xff]  ;;  %v4224_v38 = vld [vmem:[#allocation8 + $0x2f8] sm:$0xff] }
 0x4e2   : > { %8055 = vmatpush1.bf16.msra.mxu1 %v8054_v62 }
 0x4e3   : > { %8057 = vmatprep.subr.bf16.mxu1 %v8056_v45 }
 0x52c   : > { %v10314_v4 = vpop.f32.mrb[6].mxu0  ;;  %v3639_v6 = vpop.f32.mrb[8].mxu1 }
 0x52d   : > { %v3648_v2 = vmax.f32 %v10314_v4, %v3639_v6  ;;  %v3535_v11 = vpop.f32.mrb[7].mxu0  ;;  %v3641_v14 = vpop.f32.mrb[9].mxu1  ;;  %v3844_v4 = vld [vmem:[#allocation8 + $0xb0] sm:$0xff]  ;;  %v7996_v6 = vpack.c.bf16 %v3845_v20, %v3843_v57  ;;  %v4119_v57 = vld [vmem:[#allocation8 + $0x220] sm:$0xff] }
 0x52e   : > { %v3847_v14 = vld [vmem:[#allocation8 + $0xc8] sm:$0xff]  ;;  %v4121_v20 = vld [vmem:[#allocation8 + $0x230] sm:$0xff] }
 0x52f   : > { %7997 = vmatprep.subr.bf16.mxu0 %v7996_v6 }
 0x530   : > { %v10317_v17 = vpop.f32.mrb[8].mxu0  ;;  %v10319_v23 = vpop.f32.mrb[10].mxu1 }
 0x531   : > { %v3649_v28 = vmax.f32 %v10317_v17, %v10319_v23  ;;  %v3540_v32 = vpop.f32.mrb[9].mxu0  ;;  %v3646_v52 = vpop.f32.mrb[11].mxu1  ;;  %v3849_v17 = vld [vmem:[#allocation8 + $0xd8] sm:$0xff] }
 0x532   : > { %v3846_v32 = vld [vmem:[#allocation8 + $0xc0] sm:$0xff]  ;;  %v3848_v52 = vld [vmem:[#allocation8 + $0xd0] sm:$0xff]  ;;  %v8000_v40 = vpack.c.bf16 %v3849_v17, %v3847_v14  ;;  %v4128_v17 = vld [vmem:[#allocation8 + $0x268] sm:$0xff] }
 0x533   : > { %v8002_v42 = vpack.c.bf16 %v3848_v52, %v3846_v32  ;;  %v4125_v14 = vld [vmem:[#allocation8 + $0x250] sm:$0xff] }
 0x568   : > { %v3722_v33 = vpop.f32.mrb[12].mxu1 }
 0x569   : > { %v3724_v46 = vpop.f32.mrb[13].mxu1 }
 0x56a   : > { %v4113_v46 = vld [vmem:[#allocation8 + $0x1f0] sm:$0xff] }
 0x56c   : > { %v3727_v47 = vpop.f32.mrb[14].mxu1 }
 0x56d   : > { %v3729_v48 = vpop.f32.mrb[15].mxu1 }
 0x56e   : > { %v4118_v48 = vld [vmem:[#allocation8 + $0x218] sm:$0xff] }
 0x5a4   : > { %v3797_v49 = vpop.f32.mrb[16].mxu1 }
 0x5a5   : > { %v3806_v34 = vmax.f32 %v3722_v33, %v3797_v49  ;;  %v3799_v50 = vpop.f32.mrb[17].mxu1  ;;  %v4111_v33 = vld [vmem:[#allocation8 + $0x1e0] sm:$0xff] }
 0x5a6   : > { %v8058_v49 = vpack.c.bf16 %v4113_v46, %v4111_v33  ;;  %v4115_v50 = vld [vmem:[#allocation8 + $0x200] sm:$0xff]  ;;  %v4223_v33 = vld [vmem:[#allocation8 + $0x2f0] sm:$0xff]  ;;  %v4226_v46 = vld [vmem:[#allocation8 + $0x308] sm:$0xff] }
 0x5a7   : > { %v3808_v36 = vmax.f32 %v3648_v2, %v3806_v34  ;;  %v7998_v2 = vpack.c.bf16 %v3844_v4, %v3842_v22  ;;  %v4126_v22 = vld [vmem:[#allocation8 + $0x258] sm:$0xff]  ;;  %v8066_v4 = vpack.c.bf16 %v4121_v20, %v4119_v57 }
 0x5a8   : > { %v3802_v51 = vpop.f32.mrb[18].mxu1 }
 0x5a9   : > { %v3817_v53 = vadd.f32 %v7474_v26, %v3808_v36  ;;  %v3807_v19 = vmax.f32 %v3727_v47, %v3802_v51  ;;  %v3804_v27 = vpop.f32.mrb[19].mxu1  ;;  %7999 = vmatpush1.bf16.msra.mxu0 %v7998_v2  ;;  %v4116_v47 = vld [vmem:[#allocation8 + $0x208] sm:$0xff] }
 0x5aa   : > { %8001 = vmatprep.subr.bf16.mxu0 %v8000_v40  ;;  %v8060_v34 = vpack.c.bf16 %v4118_v48, %v4116_v47  ;;  %v4120_v51 = vld [vmem:[#allocation8 + $0x228] sm:$0xff]  ;;  %v4127_v40 = vld [vmem:[#allocation8 + $0x260] sm:$0xff]  ;;  %v4228_v47 = vld [vmem:[#allocation8 + $0x318] sm:$0xff] }
 0x5ab   : > { %v10323_v55 = vmax.f32 %v3817_v53, 0.0  ;;  %v3809_v56 = vmax.f32 %v3649_v28, %v3807_v19  ;;  %v4122_v53 = vld [vmem:[#allocation8 + $0x238] sm:$0xff] }
 0x5ad   : > { %v3818_v61 = vadd.f32 %v7474_v26, %v3809_v56  ;;  %4131 = vrot.lane.b32.xlu1 %v10323_v55, %s9392_s28  ;;  %4033 = vrot.lane.b32.xlu0 %v10323_v55, %s9393_s21  ;;  %v4328_v23 = vrot.slane %v10323_v55, 1  ;;  %v4819_v9 = vrot.slane %v10323_v55, 2  ;;  %v5310_v39 = vrot.slane %v10323_v55, 3  ;;  %v4117_v26 = vld [vmem:[#allocation8 + $0x210] sm:$0xff] }
 0x5ae   : > { %8003 = vmatpush1.bf16.msra.mxu0 %v8002_v42  ;;  %v5801_v62 = vrot.slane %v10323_v55, 4  ;;  %v8062_v19 = vpack.c.bf16 %v4117_v26, %v4115_v50  ;;  %v8064_v56 = vpack.c.bf16 %v4122_v53, %v4120_v51  ;;  %v4129_v42 = vld [vmem:[#allocation8 + $0x270] sm:$0xff]  ;;  %v4225_v50 = vld [vmem:[#allocation8 + $0x300] sm:$0xff]  ;;  %v3826_v53 = vld [vmem:[#allocation8 + $0x28] sm:$0xff] }
 0x5af   : > { %v10329_v11 = vmax.f32 %v3818_v61, 0.0  ;;  %8005 = vmatprep.subr.bf16.mxu0 %v8004_v59  ;;  %v4124_v61 = vld [vmem:[#allocation8 + $0x248] sm:$0xff]  ;;  %v8074_v59 = vpack.c.bf16 %v4129_v42, %v4127_v40  ;;  %v4227_v51 = vld [vmem:[#allocation8 + $0x310] sm:$0xff]  ;;  %v4314_v40 = vld [vmem:[#allocation8 + $0x358] sm:$0xff] }
 0x5b0   : > { %v8068_v2 = vpack.c.bf16 %v4126_v22, %v4124_v61  ;;  %v8094_v20 = vpack.c.bf16 %v4227_v51, %v4225_v50  ;;  %v3825_v22 = vld [vmem:[#allocation8 + $0x20] sm:$0xff]  ;;  %v4321_v51 = vld [vmem:[#allocation8 + $0x390] sm:$0xff] }
 0x5b1   : > { %4229 = vrot.lane.b32.xlu0 %v10323_v55, %s9394_s25  ;;  %v4329_v28 = vrot.slane %v10329_v11, 1  ;;  %v4820_v5 = vrot.slane %v10329_v11, 2  ;;  %v5311_v35 = vrot.slane %v10329_v11, 3  ;;  %v5802_v43 = vrot.slane %v10329_v11, 4  ;;  %v4123_v11 = vld [vmem:[#allocation8 + $0x240] sm:$0xff] }
 0x5b2   : > { %8007 = vmatpush1.bf16.msra.mxu0 %v8006_v3  ;;  %v4209_v3 = vld [vmem:[#allocation8 + $0x280] sm:$0xff] }
 0x5b3   : > { %v10336_v44 = vsel %vm1098_vm0, %v4328_v23, %v4329_v28  ;;  %v10349_v16 = vsel %vm1640_vm1, %v4819_v9, %v4820_v5  ;;  %8009 = vmatprep.subr.bf16.mxu0 %v8008_v10  ;;  %v10362_v58 = vsel %vm2182_vm2, %v5310_v39, %v5311_v35  ;;  %v10375_v45 = vsel %vm2724_vm4, %v5801_v62, %v5802_v43  ;;  %v4130_v23 = vld [vmem:[#allocation8 + $0x278] sm:$0xff]  ;;  %v4211_v5 = vld [vmem:[#allocation8 + $0x290] sm:$0xff]  ;;  %v4221_v62 = vld [vmem:[#allocation8 + $0x2e0] sm:$0xff] }
 0x5b4   : > { %4427 = vrot.lane.b32.xlu1 %v10336_v44, %s9395_s20  ;;  %v8070_v28 = vpack.c.bf16 %v4125_v14, %v4123_v11  ;;  %v8072_v52 = vpack.c.bf16 %v4130_v23, %v4128_v17  ;;  %v8078_v9 = vpack.c.bf16 %v4211_v5, %v4209_v3  ;;  %v4219_v35 = vld [vmem:[#allocation8 + $0x2d0] sm:$0xff]  ;;  %v8088_v43 = vpack.c.bf16 %v4224_v38, %v4222_v37  ;;  %v3830_v23 = vld [vmem:[#allocation8 + $0x48] sm:$0xff]  ;;  %v4311_v3 = vld [vmem:[#allocation8 + $0x340] sm:$0xff] }
 0x5b5   : > { %4525 = vrot.lane.b32.xlu0 %v10336_v44, %s9393_s21  ;;  %v8090_v48 = vpack.c.bf16 %v4223_v33, %v4221_v62  ;;  %v4309_v17 = vld [vmem:[#allocation8 + $0x330] sm:$0xff]  ;;  %v8102_v21 = vpack.c.bf16 %v4313_v7, %v4311_v3  ;;  %v4320_v62 = vld [vmem:[#allocation8 + $0x388] sm:$0xff]  ;;  %v4322_v33 = vld [vmem:[#allocation8 + $0x398] sm:$0xff] }
 0x5b6   : > { %8011 = vmatpush1.bf16.msra.mxu0 %v8010_v15  ;;  %v4215_v15 = vld [vmem:[#allocation8 + $0x2b0] sm:$0xff]  ;;  %v8108_v50 = vpack.c.bf16 %v4322_v33, %v4320_v62  ;;  %v4415_v3 = vld [vmem:[#allocation8 + $0x400] sm:$0xff]  ;;  %v4420_v7 = vld [vmem:[#allocation8 + $0x428] sm:$0xff] }
 0x5b7   : > { %8013 = vmatprep.subr.bf16.mxu0 %v8012_v24  ;;  %v8082_v24 = vpack.c.bf16 %v4215_v15, %v4213_v13  ;;  %v4316_v13 = vld [vmem:[#allocation8 + $0x368] sm:$0xff]  ;;  %v4318_v15 = vld [vmem:[#allocation8 + $0x378] sm:$0xff]  ;;  %v4317_v38 = vld [vmem:[#allocation8 + $0x370] sm:$0xff] }
 0x5b8   : > { %4623 = vrot.lane.b32.xlu1 %v10336_v44, %s9392_s28  ;;  %v8104_v37 = vpack.c.bf16 %v4318_v15, %v4316_v13  ;;  %v4419_v13 = vld [vmem:[#allocation8 + $0x420] sm:$0xff]  ;;  %v4421_v15 = vld [vmem:[#allocation8 + $0x430] sm:$0xff]  ;;  %v4510_v33 = vld [vmem:[#allocation8 + $0x488] sm:$0xff] }
 0x5b9   : > { %4721 = vrot.lane.b32.xlu0 %v10336_v44, %s9394_s25  ;;  %v4507_v62 = vld [vmem:[#allocation8 + $0x470] sm:$0xff] }
 0x5ba   : > { %8015 = vmatpush1.bf16.msra.mxu0 %v8014_v31  ;;  %v4217_v31 = vld [vmem:[#allocation8 + $0x2c0] sm:$0xff] }
 0x5bb   : > { %8017 = vmatprep.subr.bf16.mxu0 %v8016_v41  ;;  %v8086_v39 = vpack.c.bf16 %v4219_v35, %v4217_v31  ;;  %v3835_v31 = vld [vmem:[#allocation8 + $0x70] sm:$0xff]  ;;  %v4315_v35 = vld [vmem:[#allocation8 + $0x360] sm:$0xff] }
 0x5bc   : > { %4918 = vrot.lane.b32.xlu1 %v10349_v16, %s9395_s20 }
 0x5bd   : > { %5016 = vrot.lane.b32.xlu0 %v10349_v16, %s9393_s21 }
 0x5c0   : > { %5114 = vrot.lane.b32.xlu1 %v10349_v16, %s9392_s28 }
 0x5c1   : > { %5212 = vrot.lane.b32.xlu0 %v10349_v16, %s9394_s25 }
 0x5c4   : > { %5409 = vrot.lane.b32.xlu1 %v10362_v58, %s9395_s20 }
 0x5c5   : > { %5507 = vrot.lane.b32.xlu0 %v10362_v58, %s9393_s21 }
 0x5c8   : > { %5605 = vrot.lane.b32.xlu1 %v10362_v58, %s9392_s28 }
 0x5c9   : > { %5703 = vrot.lane.b32.xlu0 %v10362_v58, %s9394_s25 }
 0x5cc   : > { %5900 = vrot.lane.b32.xlu1 %v10375_v45, %s9395_s20 }
 0x5cd   : > { %5998 = vrot.lane.b32.xlu0 %v10375_v45, %s9393_s21 }
 0x5d0   : > { %3863 = vrot.lane.b32.xlu1 %v10323_v55, %s9395_s20  ;;  %s10872_s20 = sld [smem:[#allocation25_spill]] }
 0x5d1   : > { %6096 = vrot.lane.b32.xlu0 %v10375_v45, %s9392_s28 }
 0x5d4   : > { %6194 = vrot.lane.b32.xlu1 %v10375_v45, %s9394_s25 }
 0x5d6   : > { %s554_s16 = sand.u32 1, %s10872_s20  }
 0x5d7   : > { %s555_s14 = scalar_lea.vmem [#allocation17], %s554_s16  ;;  %s7206_s18 = scalar_lea.sflag [#allocation4], %s554_s16 }
 0x5d8   : > { %s7218_s15 = sshll.u32 %s555_s14, 4  ;;  %s10771_s15 = int_to_ptr.vmem [resolvable:$true] %s7218_s15 }
 0x5d9   : > { %s9287_s30 = scalar_lea.vmem %s10771_s15, 16  ;;  %p9294_p0 = scmp.lt.s32.totalorder %s10771_s15, %s9292_s19 }
 0x5da   : > { %p9288_p8 = scmp.ne.s32.totalorder %s10771_s15, %s9287_s30  ;;  %p9295_p6 = scmp.lt.s32.totalorder %s9293_s2, %s9287_s30 }
 0x5dc   : > { %p9289_p13 = pnand %p9288_p8, %p10875_p11  ;;  %p9296_p5 = por %p9295_p6, %p9294_p0 }
 0x5de   : > { %p9290_p1 = pneg %p9289_p13 }
 0x5e0   : > { %p9297_p9 = pnand %p9296_p5, %p9290_p1 }
 0x61f   : > { %v4034_v36 = vpop.permute.xlu0 %4033  ;;  %v4132_v27 = vpop.permute.xlu1 %4131 }
 0x620   : > { %7477 = vmatmul.mubr.msk.f32.vlgmr.msra.gmra.mrb[20].mxu1 %vm3865_vm6, %v4034_v36  ;;  %v8092_v36 = vpack.c.bf16 %v4228_v47, %v4226_v46  ;;  %v8106_v47 = vpack.c.bf16 %v4317_v38, %v4315_v35  ;;  %v4506_v35 = vld [vmem:[#allocation8 + $0x468] sm:$0xff] }
 0x621   : > { %8059 = vmatpush1.bf16.msra.mxu1 %v8058_v49  ;;  %4199 = vmatprep.mubr.f32.mxu1 %v9386_v0  ;;  %v3821_v49 = vld [vmem:[#allocation8] sm:$0xff] }
 0x622   : > { %8061 = vmatprep.subr.bf16.mxu1 %v8060_v34  ;;  %v3823_v34 = vld [vmem:[#allocation8 + $0x10] sm:$0xff] }
 0x623   : > { %v8018_v57 = vpack.c.bf16 %v3823_v34, %v3821_v49  ;;  %v3837_v49 = vld [vmem:[#allocation8 + $0x80] sm:$0xff]  ;;  %v3839_v34 = vld [vmem:[#allocation8 + $0x90] sm:$0xff] }
 0x625   : > { %8063 = vmatpush1.bf16.msra.mxu1 %v8062_v19  ;;  %v3828_v19 = vld [vmem:[#allocation8 + $0x38] sm:$0xff] }
 0x626   : > { %v10389_v6 = vpop.permute.xlu1 %4427  ;;  %8065 = vmatprep.subr.bf16.mxu1 %v8064_v56  ;;  %v4310_v56 = vld [vmem:[#allocation8 + $0x338] sm:$0xff]  ;;  %v8020_v61 = vpack.c.bf16 %v3828_v19, %v3826_v53  ;;  %v4324_v53 = vld [vmem:[#allocation8 + $0x3a8] sm:$0xff] }
 0x627   : > { %v4326_v19 = vld [vmem:[#allocation8 + $0x3b8] sm:$0xff] }
 0x629   : > { %8067 = vmatpush1.bf16.msra.mxu1 %v8066_v4  ;;  %v3827_v4 = vld [vmem:[#allocation8 + $0x30] sm:$0xff] }
 0x62a   : > { %v10391_v32 = vpop.permute.xlu1 %4623  ;;  %8069 = vmatprep.subr.bf16.mxu1 %v8068_v2  ;;  %v4307_v2 = vld [vmem:[#allocation8 + $0x320] sm:$0xff]  ;;  %v8022_v42 = vpack.c.bf16 %v3827_v4, %v3825_v22  ;;  %v4408_v22 = vld [vmem:[#allocation8 + $0x3c8] sm:$0xff]  ;;  %v4410_v4 = vld [vmem:[#allocation8 + $0x3d8] sm:$0xff] }
 0x62b   : > { %v8098_v54 = vpack.c.bf16 %v4309_v17, %v4307_v2  ;;  %v4409_v17 = vld [vmem:[#allocation8 + $0x3d0] sm:$0xff] }
 0x62d   : > { %8071 = vmatpush1.bf16.msra.mxu1 %v8070_v28  ;;  %v3832_v28 = vld [vmem:[#allocation8 + $0x58] sm:$0xff] }
 0x62e   : > { %v10393_v63 = vpop.permute.xlu1 %4918  ;;  %8073 = vmatprep.subr.bf16.mxu1 %v8072_v52  ;;  %v4312_v52 = vld [vmem:[#allocation8 + $0x348] sm:$0xff]  ;;  %v8024_v29 = vpack.c.bf16 %v3832_v28, %v3830_v23  ;;  %v4414_v28 = vld [vmem:[#allocation8 + $0x3f8] sm:$0xff] }
 0x62f   : > { %v8100_v5 = vpack.c.bf16 %v4314_v40, %v4312_v52  ;;  %v4412_v23 = vld [vmem:[#allocation8 + $0x3e8] sm:$0xff] }
 0x630   : > { %v8120_v40 = vpack.c.bf16 %v4414_v28, %v4412_v23  ;;  %v4523_v23 = vld [vmem:[#allocation8 + $0x4f0] sm:$0xff]  ;;  %v4604_v28 = vld [vmem:[#allocation8 + $0x508] sm:$0xff] }
 0x631   : > { %8075 = vmatpush1.bf16.msra.mxu1 %v8074_v59  ;;  %v3829_v59 = vld [vmem:[#allocation8 + $0x40] sm:$0xff] }
 0x632   : > { %v10395_v10 = vpop.permute.xlu1 %5114  ;;  %8077 = vmatprep.subr.bf16.mxu1 %v8076_v1  ;;  %v3831_v1 = vld [vmem:[#allocation8 + $0x50] sm:$0xff] }
 0x633   : > { %v8026_v18 = vpack.c.bf16 %v3831_v1, %v3829_v59  ;;  %v4418_v59 = vld [vmem:[#allocation8 + $0x418] sm:$0xff] }
 0x634   : > { %7478 = vmatmul.mubr.msk.f32.vlgmr.msra.gmra.mrb[20].mxu1 %vm3865_vm6, %v4132_v27  ;;  %v4308_v27 = vld [vmem:[#allocation8 + $0x328] sm:$0xff] }
 0x635   : > { %8079 = vmatpush1.bf16.msra.mxu1 %v8078_v9  ;;  %4297 = vmatprep.mubr.f32.mxu1 %v9386_v0  ;;  %v8096_v14 = vpack.c.bf16 %v4310_v56, %v4308_v27  ;;  %v3836_v9 = vld [vmem:[#allocation8 + $0x78] sm:$0xff]  ;;  %v8034_v27 = vpack.c.bf16 %v3839_v34, %v3837_v49  ;;  %v4509_v49 = vld [vmem:[#allocation8 + $0x480] sm:$0xff]  ;;  %v4511_v34 = vld [vmem:[#allocation8 + $0x490] sm:$0xff] }
 0x636   : > { %v10399_v25 = vpop.permute.xlu1 %5409  ;;  %8081 = vmatprep.subr.bf16.mxu1 %v8080_v12  ;;  %v4230_v12 = vpop.permute.xlu0 %4229 }
 0x639   : > { %8083 = vmatpush1.bf16.msra.mxu1 %v8082_v24  ;;  %v8028_v24 = vpack.c.bf16 %v3836_v9, %v3834_v8  ;;  %v4422_v8 = vld [vmem:[#allocation8 + $0x438] sm:$0xff] }
 0x63a   : > { %v10401_v41 = vpop.permute.xlu1 %5605  ;;  %8085 = vmatprep.subr.bf16.mxu1 %v8084_v30  ;;  %v3833_v30 = vld [vmem:[#allocation8 + $0x60] sm:$0xff] }
 0x63b   : > { %v8030_v46 = vpack.c.bf16 %v3835_v31, %v3833_v30  ;;  %v4423_v30 = vld [vmem:[#allocation8 + $0x440] sm:$0xff]  ;;  %v4425_v31 = vld [vmem:[#allocation8 + $0x450] sm:$0xff] }
 0x63c   : > { %v8134_v38 = vpack.c.bf16 %v4425_v31, %v4423_v30 }
 0x63d   : > { %8087 = vmatpush1.bf16.msra.mxu1 %v8086_v39  ;;  %v3838_v39 = vld [vmem:[#allocation8 + $0x88] sm:$0xff] }
 0x63e   : > { %v10403_v26 = vpop.permute.xlu1 %5900  ;;  %8089 = vmatprep.subr.bf16.mxu1 %v8088_v43  ;;  %v3840_v43 = vld [vmem:[#allocation8 + $0x98] sm:$0xff] }
 0x641   : > { %8091 = vmatpush1.bf16.msra.mxu1 %v8090_v48  ;;  %v8032_v48 = vpack.c.bf16 %v3840_v43, %v3838_v39  ;;  %v4505_v43 = vld [vmem:[#allocation8 + $0x460] sm:$0xff] }
 0x642   : > { %v3864_v11 = vpop.permute.xlu1 %3863  ;;  %8093 = vmatprep.subr.bf16.mxu1 %v8092_v36  ;;  %v4319_v36 = vld [vmem:[#allocation8 + $0x380] sm:$0xff] }
 0x643   : > { %7475 = vmatmul.mubr.msk.f32.vlgmr.msra.gmra.mrb[10].mxu0 %vm3865_vm6, %v3864_v11  ;;  %v8110_v56 = vpack.c.bf16 %v4321_v51, %v4319_v36  ;;  %v8116_v11 = vpack.c.bf16 %v4410_v4, %v4408_v22  ;;  %v4516_v36 = vld [vmem:[#allocation8 + $0x4b8] sm:$0xff]  ;;  %v8142_v51 = vpack.c.bf16 %v4511_v34, %v4509_v49  ;;  %v4517_v22 = vld [vmem:[#allocation8 + $0x4c0] sm:$0xff]  ;;  %v4519_v4 = vld [vmem:[#allocation8 + $0x4d0] sm:$0xff] }
 0x644   : > { %8019 = vmatpush1.bf16.msra.mxu0 %v8018_v57  ;;  %4005 = vmatprep.mubr.f32.mxu0 %v9386_v0  ;;  %v8112_v57 = vpack.c.bf16 %v4326_v19, %v4324_v53  ;;  %v4513_v19 = vld [vmem:[#allocation8 + $0x4a0] sm:$0xff] }
 0x645   : > { %8095 = vmatpush1.bf16.msra.mxu1 %v8094_v20  ;;  %8021 = vmatprep.subr.bf16.mxu0 %v8020_v61  ;;  %v4323_v20 = vld [vmem:[#allocation8 + $0x3a0] sm:$0xff]  ;;  %v4325_v61 = vld [vmem:[#allocation8 + $0x3b0] sm:$0xff] }
 0x646   : > { %8097 = vmatprep.subr.bf16.mxu1 %v8096_v14  ;;  %v8114_v2 = vpack.c.bf16 %v4325_v61, %v4323_v20  ;;  %v4407_v14 = vld [vmem:[#allocation8 + $0x3c0] sm:$0xff] }
 0x647   : > { %v8118_v52 = vpack.c.bf16 %v4409_v17, %v4407_v14  ;;  %v4521_v17 = vld [vmem:[#allocation8 + $0x4e0] sm:$0xff] }
 0x648   : > { %8023 = vmatpush1.bf16.msra.mxu0 %v8022_v42  ;;  %7479 = vmatmul.mubr.msk.f32.vlgmr.msra.gmra.mrb[20].mxu1 %vm3865_vm6, %v4230_v12  ;;  %v4411_v42 = vld [vmem:[#allocation8 + $0x3e0] sm:$0xff]  ;;  %v8128_v12 = vpack.c.bf16 %v4422_v8, %v4420_v7  ;;  %v4609_v7 = vld [vmem:[#allocation8 + $0x530] sm:$0xff]  ;;  %v4526_v8 = vpop.permute.xlu0 %4525 }
 0x649   : > { %8099 = vmatpush1.bf16.msra.mxu1 %v8098_v54  ;;  %8025 = vmatprep.subr.bf16.mxu0 %v8024_v29  ;;  %v4413_v54 = vld [vmem:[#allocation8 + $0x3f0] sm:$0xff]  ;;  %v4416_v29 = vld [vmem:[#allocation8 + $0x408] sm:$0xff] }
 0x64a   : > { %8101 = vmatprep.subr.bf16.mxu1 %v8100_v5  ;;  %4397 = vmatprep.mubr.f32.mxu1 %v9386_v0  ;;  %v8122_v1 = vpack.c.bf16 %v4413_v54, %v4411_v42  ;;  %v4417_v5 = vld [vmem:[#allocation8 + $0x410] sm:$0xff]  ;;  %v4603_v54 = vld [vmem:[#allocation8 + $0x500] sm:$0xff] }
 0x64b   : > { %v8126_v9 = vpack.c.bf16 %v4417_v5, %v4415_v3  ;;  %v4607_v5 = vld [vmem:[#allocation8 + $0x520] sm:$0xff] }
 0x64c   : > { %8027 = vmatpush1.bf16.msra.mxu0 %v8026_v18  ;;  %v4424_v18 = vld [vmem:[#allocation8 + $0x448] sm:$0xff] }
 0x64d   : > { %8103 = vmatpush1.bf16.msra.mxu1 %v8102_v21  ;;  %8029 = vmatprep.subr.bf16.mxu0 %v8028_v24  ;;  %v4426_v21 = vld [vmem:[#allocation8 + $0x458] sm:$0xff] }
 0x64e   : > { %8105 = vmatprep.subr.bf16.mxu1 %v8104_v37  ;;  %v8132_v24 = vpack.c.bf16 %v4426_v21, %v4424_v18  ;;  %v4508_v37 = vld [vmem:[#allocation8 + $0x478] sm:$0xff]  ;;  %v4611_v18 = vld [vmem:[#allocation8 + $0x540] sm:$0xff]  ;;  %v4613_v21 = vld [vmem:[#allocation8 + $0x550] sm:$0xff] }
 0x64f   : > { %v8136_v39 = vpack.c.bf16 %v4508_v37, %v4506_v35  ;;  %v8166_v30 = vpack.c.bf16 %v4613_v21, %v4611_v18  ;;  %v4615_v35 = vld [vmem:[#allocation8 + $0x560] sm:$0xff]  ;;  %v4617_v37 = vld [vmem:[#allocation8 + $0x570] sm:$0xff] }
 0x650   : > { %8031 = vmatpush1.bf16.msra.mxu0 %v8030_v46  ;;  %v4512_v46 = vld [vmem:[#allocation8 + $0x498] sm:$0xff]  ;;  %v4803_v18 = vld [vmem:[#allocation8 + $0x660] sm:$0xff]  ;;  %v4805_v21 = vld [vmem:[#allocation8 + $0x670] sm:$0xff] }
 0x651   : > { %8107 = vmatpush1.bf16.msra.mxu1 %v8106_v47  ;;  %8033 = vmatprep.subr.bf16.mxu0 %v8032_v48  ;;  %v8138_v47 = vpack.c.bf16 %v4507_v62, %v4505_v43  ;;  %v8140_v48 = vpack.c.bf16 %v4512_v46, %v4510_v33  ;;  %v8170_v43 = vpack.c.bf16 %v4617_v37, %v4615_v35  ;;  %v4619_v33 = vld [vmem:[#allocation8 + $0x580] sm:$0xff]  ;;  %v4621_v46 = vld [vmem:[#allocation8 + $0x590] sm:$0xff] }
 0x652   : > { %8109 = vmatprep.subr.bf16.mxu1 %v8108_v50  ;;  %v4514_v50 = vld [vmem:[#allocation8 + $0x4a8] sm:$0xff]  ;;  %v8174_v49 = vpack.c.bf16 %v4621_v46, %v4619_v33  ;;  %v4807_v37 = vld [vmem:[#allocation8 + $0x680] sm:$0xff] }
 0x653   : > { %v8144_v53 = vpack.c.bf16 %v4516_v36, %v4514_v50  ;;  %v4701_v50 = vld [vmem:[#allocation8 + $0x5a0] sm:$0xff]  ;;  %v4703_v36 = vld [vmem:[#allocation8 + $0x5b0] sm:$0xff] }
 0x654   : > { %8035 = vmatpush1.bf16.msra.mxu0 %v8034_v27  ;;  %v4515_v27 = vld [vmem:[#allocation8 + $0x4b0] sm:$0xff]  ;;  %v4811_v46 = vld [vmem:[#allocation8 + $0x6a0] sm:$0xff] }
 0x655   : > { %8111 = vmatpush1.bf16.msra.mxu1 %v8110_v56  ;;  %v4518_v56 = vld [vmem:[#allocation8 + $0x4c8] sm:$0xff]  ;;  %v8146_v20 = vpack.c.bf16 %v4515_v27, %v4513_v19  ;;  %v8178_v19 = vpack.c.bf16 %v4703_v36, %v4701_v50  ;;  %v4815_v36 = vld [vmem:[#allocation8 + $0x6c0] sm:$0xff] }
 0x656   : > { %8113 = vmatprep.subr.bf16.mxu1 %v8112_v57  ;;  %v4520_v57 = vld [vmem:[#allocation8 + $0x4d8] sm:$0xff] }
 0x657   : > { %7476 = vmatmul.mubr.msk.f32.vlgmr.msra.gmra.mrb[10].mxu0 %vm3865_vm6, %v10323_v55  ;;  %v8124_v55 = vpack.c.bf16 %v4418_v59, %v4416_v29  ;;  %v8148_v61 = vpack.c.bf16 %v4520_v57, %v4518_v56  ;;  %v4605_v29 = vld [vmem:[#allocation8 + $0x510] sm:$0xff]  ;;  %v4608_v59 = vld [vmem:[#allocation8 + $0x528] sm:$0xff]  ;;  %v4705_v56 = vld [vmem:[#allocation8 + $0x5c0] sm:$0xff] }
 0x658   : > { %6340 = vmatprep.mubr.f32.mxu0 %v9386_v0  ;;  %v4707_v57 = vld [vmem:[#allocation8 + $0x5d0] sm:$0xff] }
 0x659   : > { %8115 = vmatpush1.bf16.msra.mxu1 %v8114_v2  ;;  %v4522_v2 = vld [vmem:[#allocation8 + $0x4e8] sm:$0xff] }
 0x65a   : > { %8117 = vmatprep.subr.bf16.mxu1 %v8116_v11  ;;  %v4524_v11 = vld [vmem:[#allocation8 + $0x4f8] sm:$0xff] }
 0x65b   : > { %v8152_v14 = vpack.c.bf16 %v4524_v11, %v4522_v2  ;;  %v4709_v2 = vld [vmem:[#allocation8 + $0x5e0] sm:$0xff]  ;;  %v4711_v11 = vld [vmem:[#allocation8 + $0x5f0] sm:$0xff] }
 0x65c   : > { %7480 = vmatmul.mubr.msk.f32.vlgmr.msra.gmra.mrb[20].mxu1 %vm3865_vm6, %v10336_v44  ;;  %v8130_v44 = vpack.c.bf16 %v4421_v15, %v4419_v13  ;;  %v8162_v13 = vpack.c.bf16 %v4609_v7, %v4607_v5  ;;  %v4799_v7 = vld [vmem:[#allocation8 + $0x640] sm:$0xff] }
 0x65d   : > { %8119 = vmatpush1.bf16.msra.mxu1 %v8118_v52  ;;  %4495 = vmatprep.mubr.f32.mxu1 %v9386_v0  ;;  %v4606_v52 = vld [vmem:[#allocation8 + $0x518] sm:$0xff] }
 0x65e   : > { %8121 = vmatprep.subr.bf16.mxu1 %v8120_v40  ;;  %v8154_v40 = vpack.c.bf16 %v4523_v23, %v4521_v17  ;;  %v8156_v42 = vpack.c.bf16 %v4606_v52, %v4604_v28  ;;  %v8186_v17 = vpack.c.bf16 %v4711_v11, %v4709_v2  ;;  %v4713_v28 = vld [vmem:[#allocation8 + $0x600] sm:$0xff]  ;;  %v4715_v52 = vld [vmem:[#allocation8 + $0x610] sm:$0xff] }
 0x65f   : > { %v4902_v11 = vld [vmem:[#allocation8 + $0x700] sm:$0xff] }
 0x661   : > { %8123 = vmatpush1.bf16.msra.mxu1 %v8122_v1  ;;  %v4610_v1 = vld [vmem:[#allocation8 + $0x538] sm:$0xff] }
 0x662   : > { %8125 = vmatprep.subr.bf16.mxu1 %v8124_v55  ;;  %v8158_v55 = vpack.c.bf16 %v4605_v29, %v4603_v54  ;;  %v8160_v3 = vpack.c.bf16 %v4610_v1, %v4608_v59  ;;  %v4717_v29 = vld [vmem:[#allocation8 + $0x620] sm:$0xff]  ;;  %v4719_v59 = vld [vmem:[#allocation8 + $0x630] sm:$0xff]  ;;  %v4800_v1 = vld [vmem:[#allocation8 + $0x648] sm:$0xff] }
 0x665   : > { %8127 = vmatpush1.bf16.msra.mxu1 %v8126_v9  ;;  %v4612_v9 = vld [vmem:[#allocation8 + $0x548] sm:$0xff] }
 0x666   : > { %8129 = vmatprep.subr.bf16.mxu1 %v8128_v12  ;;  %v4614_v12 = vld [vmem:[#allocation8 + $0x558] sm:$0xff] }
 0x667   : > { %v8164_v15 = vpack.c.bf16 %v4614_v12, %v4612_v9  ;;  %v4804_v9 = vld [vmem:[#allocation8 + $0x668] sm:$0xff]  ;;  %v4806_v12 = vld [vmem:[#allocation8 + $0x678] sm:$0xff] }
 0x669   : > { %8131 = vmatpush1.bf16.msra.mxu1 %v8130_v44  ;;  %v4616_v44 = vld [vmem:[#allocation8 + $0x568] sm:$0xff] }
 0x66a   : > { %8133 = vmatprep.subr.bf16.mxu1 %v8132_v24  ;;  %v4618_v24 = vld [vmem:[#allocation8 + $0x578] sm:$0xff] }
 0x66b   : > { %v8168_v31 = vpack.c.bf16 %v4618_v24, %v4616_v44  ;;  %v4722_v44 = vpop.permute.xlu0 %4721  ;;  %v4808_v24 = vld [vmem:[#allocation8 + $0x688] sm:$0xff] }
 0x66d   : > { %8135 = vmatpush1.bf16.msra.mxu1 %v8134_v38  ;;  %v4620_v38 = vld [vmem:[#allocation8 + $0x588] sm:$0xff] }
 0x66e   : > { %8137 = vmatprep.subr.bf16.mxu1 %v8136_v39  ;;  %v4622_v39 = vld [vmem:[#allocation8 + $0x598] sm:$0xff] }
 0x66f   : > { %v8172_v62 = vpack.c.bf16 %v4622_v39, %v4620_v38  ;;  %v4809_v38 = vld [vmem:[#allocation8 + $0x690] sm:$0xff]  ;;  %v4812_v39 = vld [vmem:[#allocation8 + $0x6a8] sm:$0xff] }
 0x670   : > { %7481 = vmatmul.mubr.msk.f32.vlgmr.msra.gmra.mrb[20].mxu1 %vm3865_vm6, %v10389_v6  ;;  %v8150_v6 = vpack.c.bf16 %v4519_v4, %v4517_v22  ;;  %v8182_v22 = vpack.c.bf16 %v4707_v57, %v4705_v56  ;;  %v4898_v57 = vld [vmem:[#allocation8 + $0x6e0] sm:$0xff] }
 0x671   : > { %8139 = vmatpush1.bf16.msra.mxu1 %v8138_v47  ;;  %4593 = vmatprep.mubr.f32.mxu1 %v9386_v0  ;;  %v4702_v47 = vld [vmem:[#allocation8 + $0x5a8] sm:$0xff] }
 0x672   : > { %8141 = vmatprep.subr.bf16.mxu1 %v8140_v48  ;;  %v4704_v48 = vld [vmem:[#allocation8 + $0x5b8] sm:$0xff] }
 0x673   : > { %v8176_v34 = vpack.c.bf16 %v4704_v48, %v4702_v47  ;;  %v4813_v47 = vld [vmem:[#allocation8 + $0x6b0] sm:$0xff]  ;;  %v4816_v48 = vld [vmem:[#allocation8 + $0x6c8] sm:$0xff] }
 0x675   : > { %8143 = vmatpush1.bf16.msra.mxu1 %v8142_v51  ;;  %v4706_v51 = vld [vmem:[#allocation8 + $0x5c8] sm:$0xff] }
 0x676   : > { %8145 = vmatprep.subr.bf16.mxu1 %v8144_v53  ;;  %v4708_v53 = vld [vmem:[#allocation8 + $0x5d8] sm:$0xff] }
 0x677   : > { %v8180_v27 = vpack.c.bf16 %v4708_v53, %v4706_v51  ;;  %v4817_v51 = vld [vmem:[#allocation8 + $0x6d0] sm:$0xff]  ;;  %v4899_v53 = vld [vmem:[#allocation8 + $0x6e8] sm:$0xff] }
 0x679   : > { %8147 = vmatpush1.bf16.msra.mxu1 %v8146_v20  ;;  %v4710_v20 = vld [vmem:[#allocation8 + $0x5e8] sm:$0xff] }
 0x67a   : > { %8149 = vmatprep.subr.bf16.mxu1 %v8148_v61  ;;  %v4712_v61 = vld [vmem:[#allocation8 + $0x5f8] sm:$0xff] }
 0x67b   : > { %v8184_v4 = vpack.c.bf16 %v4712_v61, %v4710_v20  ;;  %v4900_v20 = vld [vmem:[#allocation8 + $0x6f0] sm:$0xff]  ;;  %v4903_v61 = vld [vmem:[#allocation8 + $0x708] sm:$0xff] }
 0x67d   : > { %8151 = vmatpush1.bf16.msra.mxu1 %v8150_v6  ;;  %v4714_v6 = vld [vmem:[#allocation8 + $0x608] sm:$0xff] }
 0x67e   : > { %8153 = vmatprep.subr.bf16.mxu1 %v8152_v14  ;;  %v4716_v14 = vld [vmem:[#allocation8 + $0x618] sm:$0xff] }
 0x67f   : > { %v8188_v23 = vpack.c.bf16 %v4716_v14, %v4714_v6  ;;  %v4904_v6 = vld [vmem:[#allocation8 + $0x710] sm:$0xff]  ;;  %v4907_v14 = vld [vmem:[#allocation8 + $0x728] sm:$0xff] }
 0x681   : > { %8155 = vmatpush1.bf16.msra.mxu1 %v8154_v40  ;;  %v4718_v40 = vld [vmem:[#allocation8 + $0x628] sm:$0xff] }
 0x682   : > { %8157 = vmatprep.subr.bf16.mxu1 %v8156_v42  ;;  %v4720_v42 = vld [vmem:[#allocation8 + $0x638] sm:$0xff] }
 0x683   : > { %v8192_v54 = vpack.c.bf16 %v4720_v42, %v4718_v40  ;;  %v4908_v40 = vld [vmem:[#allocation8 + $0x730] sm:$0xff]  ;;  %v4911_v42 = vld [vmem:[#allocation8 + $0x748] sm:$0xff] }
 0x684   : > { %7482 = vmatmul.mubr.msk.f32.vlgmr.msra.gmra.mrb[20].mxu1 %vm3865_vm6, %v4526_v8  ;;  %v4801_v8 = vld [vmem:[#allocation8 + $0x650] sm:$0xff] }
 0x685   : > { %8159 = vmatpush1.bf16.msra.mxu1 %v8158_v55  ;;  %4691 = vmatprep.mubr.f32.mxu1 %v9386_v0  ;;  %v4802_v55 = vld [vmem:[#allocation8 + $0x658] sm:$0xff] }
 0x686   : > { %8161 = vmatprep.subr.bf16.mxu1 %v8160_v3  ;;  %v8194_v3 = vpack.c.bf16 %v4719_v59, %v4717_v29  ;;  %v8196_v5 = vpack.c.bf16 %v4802_v55, %v4800_v1  ;;  %v4910_v59 = vld [vmem:[#allocation8 + $0x740] sm:$0xff]  ;;  %v4912_v1 = vld [vmem:[#allocation8 + $0x750] sm:$0xff]  ;;  %v4915_v55 = vld [vmem:[#allocation8 + $0x768] sm:$0xff] }
 0x689   : > { %8163 = vmatpush1.bf16.msra.mxu1 %v8162_v13  ;;  %v8198_v13 = vpack.c.bf16 %v4801_v8, %v4799_v7  ;;  %v4914_v7 = vld [vmem:[#allocation8 + $0x760] sm:$0xff]  ;;  %v4916_v8 = vld [vmem:[#allocation8 + $0x770] sm:$0xff] }
 0x68a   : > { %8165 = vmatprep.subr.bf16.mxu1 %v8164_v15  ;;  %v8200_v15 = vpack.c.bf16 %v4806_v12, %v4804_v9  ;;  %v4997_v9 = vld [vmem:[#allocation8 + $0x788] sm:$0xff]  ;;  %v4999_v12 = vld [vmem:[#allocation8 + $0x798] sm:$0xff] }
 0x68d   : > { %8167 = vmatpush1.bf16.msra.mxu1 %v8166_v30  ;;  %v4810_v30 = vld [vmem:[#allocation8 + $0x698] sm:$0xff] }
 0x68e   : > { %8169 = vmatprep.subr.bf16.mxu1 %v8168_v31  ;;  %v8202_v31 = vpack.c.bf16 %v4805_v21, %v4803_v18  ;;  %v8204_v35 = vpack.c.bf16 %v4810_v30, %v4808_v24  ;;  %v4996_v18 = vld [vmem:[#allocation8 + $0x780] sm:$0xff]  ;;  %v4998_v21 = vld [vmem:[#allocation8 + $0x790] sm:$0xff]  ;;  %v5003_v24 = vld [vmem:[#allocation8 + $0x7b8] sm:$0xff] }
 0x68f   : > { %v8238_v30 = vpack.c.bf16 %v4998_v21, %v4996_v18  ;;  %v5112_v18 = vld [vmem:[#allocation8 + $0x8b0] sm:$0xff]  ;;  %v5193_v21 = vld [vmem:[#allocation8 + $0x8c8] sm:$0xff] }
 0x691   : > { %8171 = vmatpush1.bf16.msra.mxu1 %v8170_v43  ;;  %v4814_v43 = vld [vmem:[#allocation8 + $0x6b8] sm:$0xff] }
 0x692   : > { %8173 = vmatprep.subr.bf16.mxu1 %v8172_v62  ;;  %v8206_v62 = vpack.c.bf16 %v4809_v38, %v4807_v37  ;;  %v8208_v33 = vpack.c.bf16 %v4814_v43, %v4812_v39  ;;  %v5002_v37 = vld [vmem:[#allocation8 + $0x7b0] sm:$0xff]  ;;  %v5005_v38 = vld [vmem:[#allocation8 + $0x7c8] sm:$0xff]  ;;  %v5007_v39 = vld [vmem:[#allocation8 + $0x7d8] sm:$0xff] }
 0x695   : > { %8175 = vmatpush1.bf16.msra.mxu1 %v8174_v49  ;;  %v4818_v49 = vld [vmem:[#allocation8 + $0x6d8] sm:$0xff] }
 0x696   : > { %8177 = vmatprep.subr.bf16.mxu1 %v8176_v34  ;;  %v8210_v34 = vpack.c.bf16 %v4813_v47, %v4811_v46  ;;  %v8212_v50 = vpack.c.bf16 %v4818_v49, %v4816_v48  ;;  %v5006_v46 = vld [vmem:[#allocation8 + $0x7d0] sm:$0xff]  ;;  %v5009_v47 = vld [vmem:[#allocation8 + $0x7e8] sm:$0xff]  ;;  %v5011_v48 = vld [vmem:[#allocation8 + $0x7f8] sm:$0xff] }
 0x698   : > { %7483 = vmatmul.mubr.msk.f32.vlgmr.msra.gmra.mrb[20].mxu1 %vm3865_vm6, %v10391_v32  ;;  %v8190_v32 = vpack.c.bf16 %v4715_v52, %v4713_v28  ;;  %v4906_v52 = vld [vmem:[#allocation8 + $0x720] sm:$0xff] }
 0x699   : > { %8179 = vmatpush1.bf16.msra.mxu1 %v8178_v19  ;;  %4789 = vmatprep.mubr.f32.mxu1 %v9386_v0  ;;  %v4901_v19 = vld [vmem:[#allocation8 + $0x6f8] sm:$0xff] }
 0x69a   : > { %8181 = vmatprep.subr.bf16.mxu1 %v8180_v27  ;;  %v8214_v27 = vpack.c.bf16 %v4817_v51, %v4815_v36  ;;  %v8216_v56 = vpack.c.bf16 %v4901_v19, %v4899_v53  ;;  %v5010_v36 = vld [vmem:[#allocation8 + $0x7f0] sm:$0xff]  ;;  %v5013_v51 = vld [vmem:[#allocation8 + $0x808] sm:$0xff]  ;;  %v5015_v53 = vld [vmem:[#allocation8 + $0x818] sm:$0xff] }
 0x69b   : > { %v8252_v19 = vpack.c.bf16 %v5015_v53, %v5013_v51  ;;  %v5207_v51 = vld [vmem:[#allocation8 + $0x938] sm:$0xff] }
 0x69d   : > { %8183 = vmatpush1.bf16.msra.mxu1 %v8182_v22  ;;  %v4905_v22 = vld [vmem:[#allocation8 + $0x718] sm:$0xff] }
 0x69e   : > { %8185 = vmatprep.subr.bf16.mxu1 %v8184_v4  ;;  %v8218_v4 = vpack.c.bf16 %v4900_v20, %v4898_v57  ;;  %v8220_v2 = vpack.c.bf16 %v4905_v22, %v4903_v61  ;;  %v5095_v57 = vld [vmem:[#allocation8 + $0x828] sm:$0xff]  ;;  %v5097_v20 = vld [vmem:[#allocation8 + $0x838] sm:$0xff] }
 0x69f   : > { %v8256_v22 = vpack.c.bf16 %v5097_v20, %v5095_v57  ;;  %v5211_v57 = vld [vmem:[#allocation8 + $0x958] sm:$0xff] }
 0x6a1   : > { %8187 = vmatpush1.bf16.msra.mxu1 %v8186_v17  ;;  %v4909_v17 = vld [vmem:[#allocation8 + $0x738] sm:$0xff] }
 0x6a2   : > { %8189 = vmatprep.subr.bf16.mxu1 %v8188_v23  ;;  %v8222_v23 = vpack.c.bf16 %v4904_v6, %v4902_v11  ;;  %v8224_v28 = vpack.c.bf16 %v4909_v17, %v4907_v14  ;;  %v5099_v11 = vld [vmem:[#allocation8 + $0x848] sm:$0xff]  ;;  %v5101_v6 = vld [vmem:[#allocation8 + $0x858] sm:$0xff] }
 0x6a3   : > { %v8260_v17 = vpack.c.bf16 %v5101_v6, %v5099_v11 }
 0x6a5   : > { %8191 = vmatpush1.bf16.msra.mxu1 %v8190_v32  ;;  %v4913_v32 = vld [vmem:[#allocation8 + $0x758] sm:$0xff] }
 0x6a6   : > { %8193 = vmatprep.subr.bf16.mxu1 %v8192_v54  ;;  %v8226_v54 = vpack.c.bf16 %v4908_v40, %v4906_v52  ;;  %v8228_v29 = vpack.c.bf16 %v4913_v32, %v4911_v42  ;;  %v5017_v52 = vpop.permute.xlu0 %5016  ;;  %v5103_v40 = vld [vmem:[#allocation8 + $0x868] sm:$0xff]  ;;  %v5105_v42 = vld [vmem:[#allocation8 + $0x878] sm:$0xff] }
 0x6a9   : > { %8195 = vmatpush1.bf16.msra.mxu1 %v8194_v3  ;;  %v4917_v3 = vld [vmem:[#allocation8 + $0x778] sm:$0xff] }
 0x6aa   : > { %8197 = vmatprep.subr.bf16.mxu1 %v8196_v5  ;;  %v8232_v5 = vpack.c.bf16 %v4917_v3, %v4915_v55  ;;  %v5109_v55 = vld [vmem:[#allocation8 + $0x898] sm:$0xff] }
 0x6ac   : > { %7484 = vmatmul.mubr.msk.f32.vlgmr.msra.gmra.mrb[20].mxu1 %vm3865_vm6, %v4722_v44  ;;  %v5001_v44 = vld [vmem:[#allocation8 + $0x7a8] sm:$0xff] }
 0x6ad   : > { %8199 = vmatpush1.bf16.msra.mxu1 %v8198_v13  ;;  %4888 = vmatprep.mubr.f32.mxu1 %v9386_v0  ;;  %v8234_v13 = vpack.c.bf16 %v4916_v8, %v4914_v7  ;;  %v5108_v7 = vld [vmem:[#allocation8 + $0x890] sm:$0xff]  ;;  %v5111_v8 = vld [vmem:[#allocation8 + $0x8a8] sm:$0xff] }
 0x6ae   : > { %8201 = vmatprep.subr.bf16.mxu1 %v8200_v15  ;;  %v8236_v15 = vpack.c.bf16 %v4999_v12, %v4997_v9  ;;  %v5113_v9 = vld [vmem:[#allocation8 + $0x8b8] sm:$0xff] }
 0x6b1   : > { %8203 = vmatpush1.bf16.msra.mxu1 %v8202_v31  ;;  %v8240_v31 = vpack.c.bf16 %v5003_v24, %v5001_v44  ;;  %v5195_v44 = vld [vmem:[#allocation8 + $0x8d8] sm:$0xff] }
 0x6b2   : > { %8205 = vmatprep.subr.bf16.mxu1 %v8204_v35  ;;  %v5000_v35 = vld [vmem:[#allocation8 + $0x7a0] sm:$0xff] }
 0x6b3   : > { %v8242_v43 = vpack.c.bf16 %v5002_v37, %v5000_v35  ;;  %v5194_v35 = vld [vmem:[#allocation8 + $0x8d0] sm:$0xff]  ;;  %v5197_v37 = vld [vmem:[#allocation8 + $0x8e8] sm:$0xff] }
 0x6b5   : > { %8207 = vmatpush1.bf16.msra.mxu1 %v8206_v62  ;;  %v8244_v62 = vpack.c.bf16 %v5007_v39, %v5005_v38  ;;  %v5199_v38 = vld [vmem:[#allocation8 + $0x8f8] sm:$0xff] }
 0x6b6   : > { %8209 = vmatprep.subr.bf16.mxu1 %v8208_v33  ;;  %v5004_v33 = vld [vmem:[#allocation8 + $0x7c0] sm:$0xff] }
 0x6b7   : > { %v8246_v49 = vpack.c.bf16 %v5006_v46, %v5004_v33  ;;  %v5198_v33 = vld [vmem:[#allocation8 + $0x8f0] sm:$0xff]  ;;  %v5201_v46 = vld [vmem:[#allocation8 + $0x908] sm:$0xff] }
 0x6b9   : > { %8211 = vmatpush1.bf16.msra.mxu1 %v8210_v34  ;;  %v8248_v34 = vpack.c.bf16 %v5011_v48, %v5009_v47  ;;  %v5203_v47 = vld [vmem:[#allocation8 + $0x918] sm:$0xff] }
 0x6ba   : > { %8213 = vmatprep.subr.bf16.mxu1 %v8212_v50  ;;  %v5008_v50 = vld [vmem:[#allocation8 + $0x7e0] sm:$0xff] }
 0x6bd   : > { %8215 = vmatpush1.bf16.msra.mxu1 %v8214_v27  ;;  %v5012_v27 = vld [vmem:[#allocation8 + $0x800] sm:$0xff] }
 0x6be   : > { %8217 = vmatprep.subr.bf16.mxu1 %v8216_v56  ;;  %v5014_v56 = vld [vmem:[#allocation8 + $0x810] sm:$0xff] }
 0x6bf   : > { %v8254_v61 = vpack.c.bf16 %v5014_v56, %v5012_v27  ;;  %v5206_v27 = vld [vmem:[#allocation8 + $0x930] sm:$0xff]  ;;  %v5209_v56 = vld [vmem:[#allocation8 + $0x948] sm:$0xff] }
 0x6c0   : > { %7485 = vmatmul.mubr.msk.f32.vlgmr.msra.gmra.mrb[20].mxu1 %vm3865_vm6, %v10349_v16  ;;  %v8230_v16 = vpack.c.bf16 %v4912_v1, %v4910_v59  ;;  %v5104_v59 = vld [vmem:[#allocation8 + $0x870] sm:$0xff]  ;;  %v5107_v1 = vld [vmem:[#allocation8 + $0x888] sm:$0xff]  ;;  %v8292_v20 = vpack.c.bf16 %v5211_v57, %v5209_v56 }
 0x6c1   : > { %8219 = vmatpush1.bf16.msra.mxu1 %v8218_v4  ;;  %4986 = vmatprep.mubr.f32.mxu1 %v9386_v0  ;;  %v5094_v4 = vld [vmem:[#allocation8 + $0x820] sm:$0xff] }
 0x6c2   : > { %8221 = vmatprep.subr.bf16.mxu1 %v8220_v2  ;;  %v5096_v2 = vld [vmem:[#allocation8 + $0x830] sm:$0xff] }
 0x6c3   : > { %v8258_v14 = vpack.c.bf16 %v5096_v2, %v5094_v4  ;;  %v5291_v4 = vld [vmem:[#allocation8 + $0x968] sm:$0xff]  ;;  %v5293_v2 = vld [vmem:[#allocation8 + $0x978] sm:$0xff] }
 0x6c4   : > { %v8296_v6 = vpack.c.bf16 %v5293_v2, %v5291_v4  ;;  %v5408_v4 = vld [vmem:[#allocation8 + $0xa98] sm:$0xff] }
 0x6c5   : > { %8223 = vmatpush1.bf16.msra.mxu1 %v8222_v23  ;;  %v5098_v23 = vld [vmem:[#allocation8 + $0x840] sm:$0xff] }
 0x6c6   : > { %8225 = vmatprep.subr.bf16.mxu1 %v8224_v28  ;;  %v5100_v28 = vld [vmem:[#allocation8 + $0x850] sm:$0xff] }
 0x6c7   : > { %v8262_v32 = vpack.c.bf16 %v5100_v28, %v5098_v23  ;;  %v5295_v23 = vld [vmem:[#allocation8 + $0x988] sm:$0xff]  ;;  %v5297_v28 = vld [vmem:[#allocation8 + $0x998] sm:$0xff] }
 0x6c9   : > { %8227 = vmatpush1.bf16.msra.mxu1 %v8226_v54  ;;  %v8264_v54 = vpack.c.bf16 %v5105_v42, %v5103_v40  ;;  %v8300_v40 = vpack.c.bf16 %v5297_v28, %v5295_v23  ;;  %v5294_v42 = vld [vmem:[#allocation8 + $0x980] sm:$0xff]  ;;  %v5490_v23 = vld [vmem:[#allocation8 + $0xab8] sm:$0xff] }
 0x6ca   : > { %8229 = vmatprep.subr.bf16.mxu1 %v8228_v29  ;;  %v5102_v29 = vld [vmem:[#allocation8 + $0x860] sm:$0xff] }
 0x6cb   : > { %v8266_v3 = vpack.c.bf16 %v5104_v59, %v5102_v29  ;;  %v5299_v29 = vld [vmem:[#allocation8 + $0x9a8] sm:$0xff]  ;;  %v5301_v59 = vld [vmem:[#allocation8 + $0x9b8] sm:$0xff] }
 0x6cd   : > { %8231 = vmatpush1.bf16.msra.mxu1 %v8230_v16  ;;  %v8268_v16 = vpack.c.bf16 %v5109_v55, %v5107_v1  ;;  %v8304_v55 = vpack.c.bf16 %v5301_v59, %v5299_v29 }
 0x6ce   : > { %8233 = vmatprep.subr.bf16.mxu1 %v8232_v5  ;;  %v5106_v5 = vld [vmem:[#allocation8 + $0x880] sm:$0xff] }
 0x6cf   : > { %v8270_v12 = vpack.c.bf16 %v5108_v7, %v5106_v5  ;;  %v5303_v5 = vld [vmem:[#allocation8 + $0x9c8] sm:$0xff]  ;;  %v5305_v7 = vld [vmem:[#allocation8 + $0x9d8] sm:$0xff] }
 0x6d1   : > { %8235 = vmatpush1.bf16.msra.mxu1 %v8234_v13  ;;  %v8272_v13 = vpack.c.bf16 %v5113_v9, %v5111_v8  ;;  %v8308_v9 = vpack.c.bf16 %v5305_v7, %v5303_v5 }
 0x6d2   : > { %8237 = vmatprep.subr.bf16.mxu1 %v8236_v15  ;;  %v5110_v15 = vld [vmem:[#allocation8 + $0x8a0] sm:$0xff] }
 0x6d3   : > { %v8274_v24 = vpack.c.bf16 %v5112_v18, %v5110_v15  ;;  %v5307_v15 = vld [vmem:[#allocation8 + $0x9e8] sm:$0xff]  ;;  %v5309_v18 = vld [vmem:[#allocation8 + $0x9f8] sm:$0xff] }
 0x6d4   : > { %7486 = vmatmul.mubr.msk.f32.vlgmr.msra.gmra.mrb[20].mxu1 %vm3865_vm6, %v10393_v63  ;;  %v8250_v63 = vpack.c.bf16 %v5010_v36, %v5008_v50  ;;  %v5202_v50 = vld [vmem:[#allocation8 + $0x910] sm:$0xff]  ;;  %v5205_v36 = vld [vmem:[#allocation8 + $0x928] sm:$0xff] }
 0x6d5   : > { %8239 = vmatpush1.bf16.msra.mxu1 %v8238_v30  ;;  %5084 = vmatprep.mubr.f32.mxu1 %v9386_v0  ;;  %v8276_v30 = vpack.c.bf16 %v5195_v44, %v5193_v21  ;;  %v8312_v44 = vpack.c.bf16 %v5309_v18, %v5307_v15 }
 0x6d6   : > { %8241 = vmatprep.subr.bf16.mxu1 %v8240_v31  ;;  %v5192_v31 = vld [vmem:[#allocation8 + $0x8c0] sm:$0xff] }
 0x6d7   : > { %v8278_v39 = vpack.c.bf16 %v5194_v35, %v5192_v31  ;;  %v5390_v31 = vld [vmem:[#allocation8 + $0xa08] sm:$0xff]  ;;  %v5392_v35 = vld [vmem:[#allocation8 + $0xa18] sm:$0xff] }
 0x6d9   : > { %8243 = vmatpush1.bf16.msra.mxu1 %v8242_v43  ;;  %v8280_v43 = vpack.c.bf16 %v5199_v38, %v5197_v37  ;;  %v8316_v38 = vpack.c.bf16 %v5392_v35, %v5390_v31  ;;  %v5503_v35 = vld [vmem:[#allocation8 + $0xb20] sm:$0xff] }
 0x6da   : > { %8245 = vmatprep.subr.bf16.mxu1 %v8244_v62  ;;  %v5196_v62 = vld [vmem:[#allocation8 + $0x8e0] sm:$0xff] }
 0x6db   : > { %v8282_v48 = vpack.c.bf16 %v5198_v33, %v5196_v62  ;;  %v5394_v62 = vld [vmem:[#allocation8 + $0xa28] sm:$0xff]  ;;  %v5396_v33 = vld [vmem:[#allocation8 + $0xa38] sm:$0xff] }
 0x6dd   : > { %8247 = vmatpush1.bf16.msra.mxu1 %v8246_v49  ;;  %v8284_v49 = vpack.c.bf16 %v5203_v47, %v5201_v46  ;;  %v8320_v47 = vpack.c.bf16 %v5396_v33, %v5394_v62  ;;  %v5585_v33 = vld [vmem:[#allocation8 + $0xb40] sm:$0xff] }
 0x6de   : > { %8249 = vmatprep.subr.bf16.mxu1 %v8248_v34  ;;  %v5200_v34 = vld [vmem:[#allocation8 + $0x900] sm:$0xff] }
 0x6df   : > { %v8286_v53 = vpack.c.bf16 %v5202_v50, %v5200_v34  ;;  %v5398_v34 = vld [vmem:[#allocation8 + $0xa48] sm:$0xff]  ;;  %v5400_v50 = vld [vmem:[#allocation8 + $0xa58] sm:$0xff] }
 0x6e1   : > { %8251 = vmatpush1.bf16.msra.mxu1 %v8250_v63  ;;  %v8288_v63 = vpack.c.bf16 %v5207_v51, %v5205_v36  ;;  %v8324_v51 = vpack.c.bf16 %v5400_v50, %v5398_v34  ;;  %v5589_v50 = vld [vmem:[#allocation8 + $0xb60] sm:$0xff] }
 0x6e2   : > { %8253 = vmatprep.subr.bf16.mxu1 %v8252_v19  ;;  %v5204_v19 = vld [vmem:[#allocation8 + $0x920] sm:$0xff] }
 0x6e5   : > { %8255 = vmatpush1.bf16.msra.mxu1 %v8254_v61  ;;  %v5208_v61 = vld [vmem:[#allocation8 + $0x940] sm:$0xff] }
 0x6e6   : > { %8257 = vmatprep.subr.bf16.mxu1 %v8256_v22  ;;  %v5210_v22 = vld [vmem:[#allocation8 + $0x950] sm:$0xff] }
 0x6e7   : > { %v8294_v11 = vpack.c.bf16 %v5210_v22, %v5208_v61  ;;  %v5403_v61 = vld [vmem:[#allocation8 + $0xa70] sm:$0xff] }
 0x6e8   : > { %7487 = vmatmul.mubr.msk.f32.vlgmr.msra.gmra.mrb[20].mxu1 %vm3865_vm6, %v5017_v52 }
 0x6e9   : > { %8259 = vmatpush1.bf16.msra.mxu1 %v8258_v14  ;;  %5182 = vmatprep.mubr.f32.mxu1 %v9386_v0  ;;  %v5290_v14 = vld [vmem:[#allocation8 + $0x960] sm:$0xff] }
 0x6ea   : > { %8261 = vmatprep.subr.bf16.mxu1 %v8260_v17  ;;  %v5292_v17 = vld [vmem:[#allocation8 + $0x970] sm:$0xff] }
 0x6eb   : > { %v8298_v52 = vpack.c.bf16 %v5292_v17, %v5290_v14  ;;  %v5407_v14 = vld [vmem:[#allocation8 + $0xa90] sm:$0xff]  ;;  %v5488_v17 = vld [vmem:[#allocation8 + $0xaa8] sm:$0xff] }
 0x6ed   : > { %8263 = vmatpush1.bf16.msra.mxu1 %v8262_v32  ;;  %v5296_v32 = vld [vmem:[#allocation8 + $0x990] sm:$0xff] }
 0x6ee   : > { %8265 = vmatprep.subr.bf16.mxu1 %v8264_v54  ;;  %v5213_v54 = vpop.permute.xlu0 %5212  ;;  %v8302_v1 = vpack.c.bf16 %v5296_v32, %v5294_v42  ;;  %v5489_v42 = vld [vmem:[#allocation8 + $0xab0] sm:$0xff]  ;;  %v5492_v32 = vld [vmem:[#allocation8 + $0xac8] sm:$0xff] }
 0x6f1   : > { %8267 = vmatpush1.bf16.msra.mxu1 %v8266_v3  ;;  %v5298_v3 = vld [vmem:[#allocation8 + $0x9a0] sm:$0xff] }
 0x6f2   : > { %8269 = vmatprep.subr.bf16.mxu1 %v8268_v16  ;;  %v5300_v16 = vld [vmem:[#allocation8 + $0x9b0] sm:$0xff] }
 0x6f3   : > { %v8306_v8 = vpack.c.bf16 %v5300_v16, %v5298_v3  ;;  %v5496_v3 = vld [vmem:[#allocation8 + $0xae8] sm:$0xff]  ;;  %v5498_v16 = vld [vmem:[#allocation8 + $0xaf8] sm:$0xff] }
 0x6f4   : > { %v8344_v7 = vpack.c.bf16 %v5498_v16, %v5496_v3 }
 0x6f5   : > { %8271 = vmatpush1.bf16.msra.mxu1 %v8270_v12  ;;  %v5302_v12 = vld [vmem:[#allocation8 + $0x9c0] sm:$0xff] }
 0x6f6   : > { %8273 = vmatprep.subr.bf16.mxu1 %v8272_v13  ;;  %v5304_v13 = vld [vmem:[#allocation8 + $0x9d0] sm:$0xff] }
 0x6f7   : > { %v8310_v21 = vpack.c.bf16 %v5304_v13, %v5302_v12  ;;  %v5500_v12 = vld [vmem:[#allocation8 + $0xb08] sm:$0xff]  ;;  %v5502_v13 = vld [vmem:[#allocation8 + $0xb18] sm:$0xff] }
 0x6f8   : > { %v8348_v18 = vpack.c.bf16 %v5502_v13, %v5500_v12 }
 0x6f9   : > { %8275 = vmatpush1.bf16.msra.mxu1 %v8274_v24  ;;  %v5306_v24 = vld [vmem:[#allocation8 + $0x9e0] sm:$0xff] }
 0x6fa   : > { %8277 = vmatprep.subr.bf16.mxu1 %v8276_v30  ;;  %v5308_v30 = vld [vmem:[#allocation8 + $0x9f0] sm:$0xff] }
 0x6fb   : > { %v8314_v37 = vpack.c.bf16 %v5308_v30, %v5306_v24  ;;  %v5504_v24 = vld [vmem:[#allocation8 + $0xb28] sm:$0xff]  ;;  %v5506_v30 = vld [vmem:[#allocation8 + $0xb38] sm:$0xff] }
 0x6fc   : > { %7488 = vmatmul.mubr.msk.f32.vlgmr.msra.gmra.mrb[20].mxu1 %vm3865_vm6, %v10395_v10  ;;  %v8290_v10 = vpack.c.bf16 %v5206_v27, %v5204_v19  ;;  %v5402_v19 = vld [vmem:[#allocation8 + $0xa68] sm:$0xff]  ;;  %v5404_v27 = vld [vmem:[#allocation8 + $0xa78] sm:$0xff]  ;;  %v8352_v31 = vpack.c.bf16 %v5506_v30, %v5504_v24 }
 0x6fd   : > { %8279 = vmatpush1.bf16.msra.mxu1 %v8278_v39  ;;  %5280 = vmatprep.mubr.f32.mxu1 %v9386_v0  ;;  %v5389_v39 = vld [vmem:[#allocation8 + $0xa00] sm:$0xff] }
 0x6fe   : > { %8281 = vmatprep.subr.bf16.mxu1 %v8280_v43  ;;  %v5391_v43 = vld [vmem:[#allocation8 + $0xa10] sm:$0xff] }
 0x6ff   : > { %v8318_v46 = vpack.c.bf16 %v5391_v43, %v5389_v39  ;;  %v5588_v39 = vld [vmem:[#allocation8 + $0xb58] sm:$0xff] }
 0x701   : > { %8283 = vmatpush1.bf16.msra.mxu1 %v8282_v48  ;;  %v5393_v48 = vld [vmem:[#allocation8 + $0xa20] sm:$0xff] }
 0x702   : > { %8285 = vmatprep.subr.bf16.mxu1 %v8284_v49  ;;  %v5395_v49 = vld [vmem:[#allocation8 + $0xa30] sm:$0xff] }
 0x703   : > { %v8322_v36 = vpack.c.bf16 %v5395_v49, %v5393_v48  ;;  %v5592_v48 = vld [vmem:[#allocation8 + $0xb78] sm:$0xff] }
 0x705   : > { %8287 = vmatpush1.bf16.msra.mxu1 %v8286_v53  ;;  %v5397_v53 = vld [vmem:[#allocation8 + $0xa40] sm:$0xff] }
 0x706   : > { %8289 = vmatprep.subr.bf16.mxu1 %v8288_v63  ;;  %v5399_v63 = vld [vmem:[#allocation8 + $0xa50] sm:$0xff] }
 0x707   : > { %v8326_v56 = vpack.c.bf16 %v5399_v63, %v5397_v53  ;;  %v5594_v53 = vld [vmem:[#allocation8 + $0xb88] sm:$0xff]  ;;  %v5596_v63 = vld [vmem:[#allocation8 + $0xb98] sm:$0xff] }
 0x709   : > { %8291 = vmatpush1.bf16.msra.mxu1 %v8290_v10  ;;  %v8328_v10 = vpack.c.bf16 %v5404_v27, %v5402_v19  ;;  %v8364_v27 = vpack.c.bf16 %v5596_v63, %v5594_v53  ;;  %v5785_v53 = vld [vmem:[#allocation8 + $0xca0] sm:$0xff]  ;;  %v5787_v63 = vld [vmem:[#allocation8 + $0xcb0] sm:$0xff] }
 0x70a   : > { %8293 = vmatprep.subr.bf16.mxu1 %v8292_v20  ;;  %v5401_v20 = vld [vmem:[#allocation8 + $0xa60] sm:$0xff] }
 0x70b   : > { %v8330_v2 = vpack.c.bf16 %v5403_v61, %v5401_v20  ;;  %v5598_v20 = vld [vmem:[#allocation8 + $0xba8] sm:$0xff]  ;;  %v5600_v61 = vld [vmem:[#allocation8 + $0xbb8] sm:$0xff] }
 0x70d   : > { %8295 = vmatpush1.bf16.msra.mxu1 %v8294_v11 }
 0x70e   : > { %8297 = vmatprep.subr.bf16.mxu1 %v8296_v6  ;;  %v5405_v6 = vld [vmem:[#allocation8 + $0xa80] sm:$0xff] }
 0x70f   : > { %v8334_v28 = vpack.c.bf16 %v5407_v14, %v5405_v6  ;;  %v5602_v6 = vld [vmem:[#allocation8 + $0xbc8] sm:$0xff]  ;;  %v5604_v14 = vld [vmem:[#allocation8 + $0xbd8] sm:$0xff] }
 0x710   : > { %7489 = vmatmul.mubr.msk.f32.vlgmr.msra.gmra.mrb[20].mxu1 %vm3865_vm6, %v5213_v54  ;;  %v5494_v54 = vld [vmem:[#allocation8 + $0xad8] sm:$0xff] }
 0x711   : > { %8299 = vmatpush1.bf16.msra.mxu1 %v8298_v52  ;;  %5379 = vmatprep.mubr.f32.mxu1 %v9386_v0  ;;  %v8336_v52 = vpack.c.bf16 %v5490_v23, %v5488_v17  ;;  %v8340_v59 = vpack.c.bf16 %v5494_v54, %v5492_v32  ;;  %v8372_v23 = vpack.c.bf16 %v5604_v14, %v5602_v6  ;;  %v5793_v14 = vld [vmem:[#allocation8 + $0xce0] sm:$0xff] }
 0x712   : > { %8301 = vmatprep.subr.bf16.mxu1 %v8300_v40  ;;  %v5487_v40 = vld [vmem:[#allocation8 + $0xaa0] sm:$0xff] }
 0x713   : > { %v8338_v29 = vpack.c.bf16 %v5489_v42, %v5487_v40  ;;  %v5684_v40 = vld [vmem:[#allocation8 + $0xbe8] sm:$0xff]  ;;  %v5686_v42 = vld [vmem:[#allocation8 + $0xbf8] sm:$0xff] }
 0x714   : > { %v8376_v54 = vpack.c.bf16 %v5686_v42, %v5684_v40  ;;  %v5797_v42 = vld [vmem:[#allocation8 + $0xd00] sm:$0xff] }
 0x715   : > { %8303 = vmatpush1.bf16.msra.mxu1 %v8302_v1  ;;  %v5491_v1 = vld [vmem:[#allocation8 + $0xac0] sm:$0xff] }
 0x716   : > { %8305 = vmatprep.subr.bf16.mxu1 %v8304_v55  ;;  %v5493_v55 = vld [vmem:[#allocation8 + $0xad0] sm:$0xff] }
 0x717   : > { %v8342_v5 = vpack.c.bf16 %v5493_v55, %v5491_v1  ;;  %v5688_v1 = vld [vmem:[#allocation8 + $0xc08] sm:$0xff]  ;;  %v5690_v55 = vld [vmem:[#allocation8 + $0xc18] sm:$0xff] }
 0x718   : > { %v8380_v16 = vpack.c.bf16 %v5690_v55, %v5688_v1  ;;  %v5880_v55 = vld [vmem:[#allocation8 + $0xd20] sm:$0xff] }
 0x719   : > { %8307 = vmatpush1.bf16.msra.mxu1 %v8306_v8  ;;  %v5495_v8 = vld [vmem:[#allocation8 + $0xae0] sm:$0xff] }
 0x71a   : > { %8309 = vmatprep.subr.bf16.mxu1 %v8308_v9  ;;  %v5497_v9 = vld [vmem:[#allocation8 + $0xaf0] sm:$0xff] }
 0x71b   : > { %v8346_v15 = vpack.c.bf16 %v5497_v9, %v5495_v8  ;;  %v5692_v8 = vld [vmem:[#allocation8 + $0xc28] sm:$0xff]  ;;  %v5694_v9 = vld [vmem:[#allocation8 + $0xc38] sm:$0xff] }
 0x71c   : > { %v8384_v13 = vpack.c.bf16 %v5694_v9, %v5692_v8  ;;  %v5884_v9 = vld [vmem:[#allocation8 + $0xd40] sm:$0xff] }
 0x71d   : > { %8311 = vmatpush1.bf16.msra.mxu1 %v8310_v21  ;;  %v5499_v21 = vld [vmem:[#allocation8 + $0xb00] sm:$0xff] }
 0x71e   : > { %8313 = vmatprep.subr.bf16.mxu1 %v8312_v44  ;;  %v5501_v44 = vld [vmem:[#allocation8 + $0xb10] sm:$0xff] }
 0x721   : > { %8315 = vmatpush1.bf16.msra.mxu1 %v8314_v37  ;;  %v5505_v37 = vld [vmem:[#allocation8 + $0xb30] sm:$0xff] }
 0x722   : > { %8317 = vmatprep.subr.bf16.mxu1 %v8316_v38  ;;  %v5586_v38 = vld [vmem:[#allocation8 + $0xb48] sm:$0xff]  ;;  %v8354_v43 = vpack.c.bf16 %v5505_v37, %v5503_v35  ;;  %v5702_v37 = vld [vmem:[#allocation8 + $0xc78] sm:$0xff] }
 0x723   : > { %v8356_v62 = vpack.c.bf16 %v5588_v39, %v5586_v38  ;;  %v5700_v35 = vld [vmem:[#allocation8 + $0xc68] sm:$0xff]  ;;  %v5699_v39 = vld [vmem:[#allocation8 + $0xc60] sm:$0xff] }
 0x724   : > { %7490 = vmatmul.mubr.msk.f32.vlgmr.msra.gmra.mrb[20].mxu1 %vm3865_vm6, %v10362_v58  ;;  %v5406_v58 = vld [vmem:[#allocation8 + $0xa88] sm:$0xff]  ;;  %v8392_v38 = vpack.c.bf16 %v5702_v37, %v5700_v35  ;;  %v5892_v37 = vld [vmem:[#allocation8 + $0xd80] sm:$0xff] }
 0x725   : > { %8319 = vmatpush1.bf16.msra.mxu1 %v8318_v46  ;;  %5477 = vmatprep.mubr.f32.mxu1 %v9386_v0  ;;  %v8332_v11 = vpack.c.bf16 %v5408_v4, %v5406_v58  ;;  %v5587_v46 = vld [vmem:[#allocation8 + $0xb50] sm:$0xff]  ;;  %v8368_v4 = vpack.c.bf16 %v5600_v61, %v5598_v20  ;;  %v5789_v61 = vld [vmem:[#allocation8 + $0xcc0] sm:$0xff] }
 0x726   : > { %8321 = vmatprep.subr.bf16.mxu1 %v8320_v47  ;;  %v5590_v47 = vld [vmem:[#allocation8 + $0xb68] sm:$0xff]  ;;  %v8358_v49 = vpack.c.bf16 %v5587_v46, %v5585_v33  ;;  %v5784_v33 = vld [vmem:[#allocation8 + $0xc98] sm:$0xff] }
 0x727   : > { %v8360_v34 = vpack.c.bf16 %v5592_v48, %v5590_v47  ;;  %v5781_v48 = vld [vmem:[#allocation8 + $0xc80] sm:$0xff] }
 0x729   : > { %8323 = vmatpush1.bf16.msra.mxu1 %v8322_v36  ;;  %v5591_v36 = vld [vmem:[#allocation8 + $0xb70] sm:$0xff] }
 0x72a   : > { %v10441_v57 = vpop.f32.mrb[10].mxu0  ;;  %8325 = vmatprep.subr.bf16.mxu1 %v8324_v51  ;;  %v5508_v51 = vpop.permute.xlu0 %5507  ;;  %v8362_v19 = vpack.c.bf16 %v5591_v36, %v5589_v50  ;;  %v5788_v50 = vld [vmem:[#allocation8 + $0xcb8] sm:$0xff] }
 0x72b   : > { %v10443_v22 = vpop.f32.mrb[11].mxu0 }
 0x72d   : > { %8327 = vmatpush1.bf16.msra.mxu1 %v8326_v56  ;;  %v5593_v56 = vld [vmem:[#allocation8 + $0xb80] sm:$0xff] }
 0x72e   : > { %8329 = vmatprep.subr.bf16.mxu1 %v8328_v10  ;;  %v5595_v10 = vld [vmem:[#allocation8 + $0xb90] sm:$0xff] }
 0x72f   : > { %v8366_v58 = vpack.c.bf16 %v5595_v10, %v5593_v56  ;;  %v5792_v56 = vld [vmem:[#allocation8 + $0xcd8] sm:$0xff]  ;;  %v8402_v10 = vpack.c.bf16 %v5787_v63, %v5785_v53 }
 0x731   : > { %8331 = vmatpush1.bf16.msra.mxu1 %v8330_v2  ;;  %v5597_v2 = vld [vmem:[#allocation8 + $0xba0] sm:$0xff] }
 0x732   : > { %8333 = vmatprep.subr.bf16.mxu1 %v8332_v11  ;;  %v5599_v11 = vld [vmem:[#allocation8 + $0xbb0] sm:$0xff] }
 0x733   : > { %v8370_v17 = vpack.c.bf16 %v5599_v11, %v5597_v2  ;;  %v5796_v2 = vld [vmem:[#allocation8 + $0xcf8] sm:$0xff] }
 0x735   : > { %8335 = vmatpush1.bf16.msra.mxu1 %v8334_v28  ;;  %v5601_v28 = vld [vmem:[#allocation8 + $0xbc0] sm:$0xff] }
 0x736   : > { %8337 = vmatprep.subr.bf16.mxu1 %v8336_v52  ;;  %v5603_v52 = vld [vmem:[#allocation8 + $0xbd0] sm:$0xff] }
 0x737   : > { %v8374_v32 = vpack.c.bf16 %v5603_v52, %v5601_v28  ;;  %v5800_v28 = vld [vmem:[#allocation8 + $0xd18] sm:$0xff] }
 0x738   : > { %7491 = vmatmul.mubr.msk.f32.vlgmr.msra.gmra.mrb[20].mxu1 %vm3865_vm6, %v10399_v25  ;;  %v8350_v25 = vpack.c.bf16 %v5501_v44, %v5499_v21  ;;  %v5696_v21 = vld [vmem:[#allocation8 + $0xc48] sm:$0xff]  ;;  %v5698_v44 = vld [vmem:[#allocation8 + $0xc58] sm:$0xff] }
 0x739   : > { %8339 = vmatpush1.bf16.msra.mxu1 %v8338_v29  ;;  %5575 = vmatprep.mubr.f32.mxu1 %v9386_v0  ;;  %v5683_v29 = vld [vmem:[#allocation8 + $0xbe0] sm:$0xff]  ;;  %v8388_v30 = vpack.c.bf16 %v5698_v44, %v5696_v21 }
 0x73a   : > { %8341 = vmatprep.subr.bf16.mxu1 %v8340_v59  ;;  %v5685_v59 = vld [vmem:[#allocation8 + $0xbf0] sm:$0xff]  ;;  %v5888_v44 = vld [vmem:[#allocation8 + $0xd60] sm:$0xff] }
 0x73b   : > { %v8378_v3 = vpack.c.bf16 %v5685_v59, %v5683_v29  ;;  %v5883_v29 = vld [vmem:[#allocation8 + $0xd38] sm:$0xff] }
 0x73d   : > { %8343 = vmatpush1.bf16.msra.mxu1 %v8342_v5  ;;  %v5687_v5 = vld [vmem:[#allocation8 + $0xc00] sm:$0xff] }
 0x73e   : > { %8345 = vmatprep.subr.bf16.mxu1 %v8344_v7  ;;  %v5689_v7 = vld [vmem:[#allocation8 + $0xc10] sm:$0xff] }
 0x73f   : > { %v8382_v12 = vpack.c.bf16 %v5689_v7, %v5687_v5  ;;  %v5887_v5 = vld [vmem:[#allocation8 + $0xd58] sm:$0xff] }
 0x741   : > { %8347 = vmatpush1.bf16.msra.mxu1 %v8346_v15  ;;  %v5691_v15 = vld [vmem:[#allocation8 + $0xc20] sm:$0xff] }
 0x742   : > { %8349 = vmatprep.subr.bf16.mxu1 %v8348_v18  ;;  %v5693_v18 = vld [vmem:[#allocation8 + $0xc30] sm:$0xff] }
 0x743   : > { %v8386_v24 = vpack.c.bf16 %v5693_v18, %v5691_v15  ;;  %v5891_v15 = vld [vmem:[#allocation8 + $0xd78] sm:$0xff] }
 0x745   : > { %8351 = vmatpush1.bf16.msra.mxu1 %v8350_v25  ;;  %v5695_v25 = vld [vmem:[#allocation8 + $0xc40] sm:$0xff] }
 0x746   : > { %8353 = vmatprep.subr.bf16.mxu1 %v8352_v31  ;;  %v5697_v31 = vld [vmem:[#allocation8 + $0xc50] sm:$0xff] }
 0x749   : > { %8355 = vmatpush1.bf16.msra.mxu1 %v8354_v43  ;;  %v5701_v43 = vld [vmem:[#allocation8 + $0xc70] sm:$0xff] }
 0x74a   : > { %8357 = vmatprep.subr.bf16.mxu1 %v8356_v62  ;;  %v5782_v62 = vld [vmem:[#allocation8 + $0xc88] sm:$0xff]  ;;  %v8394_v46 = vpack.c.bf16 %v5701_v43, %v5699_v39  ;;  %v5899_v39 = vld [vmem:[#allocation8 + $0xdb8] sm:$0xff] }
 0x74b   : > { %v8396_v47 = vpack.c.bf16 %v5784_v33, %v5782_v62  ;;  %v5896_v62 = vld [vmem:[#allocation8 + $0xda0] sm:$0xff]  ;;  %v5898_v33 = vld [vmem:[#allocation8 + $0xdb0] sm:$0xff] }
 0x74c   : > { %7492 = vmatmul.mubr.msk.f32.vlgmr.msra.gmra.mrb[20].mxu1 %vm3865_vm6, %v5508_v51 }
 0x74d   : > { %8359 = vmatpush1.bf16.msra.mxu1 %v8358_v49  ;;  %5673 = vmatprep.mubr.f32.mxu1 %v9386_v0  ;;  %v5783_v49 = vld [vmem:[#allocation8 + $0xc90] sm:$0xff] }
 0x74e   : > { %8361 = vmatprep.subr.bf16.mxu1 %v8360_v34  ;;  %v5786_v34 = vld [vmem:[#allocation8 + $0xca8] sm:$0xff]  ;;  %v8398_v36 = vpack.c.bf16 %v5783_v49, %v5781_v48  ;;  %v8434_v48 = vpack.c.bf16 %v5898_v33, %v5896_v62  ;;  %v6092_v33 = vld [vmem:[#allocation8 + $0xee0] sm:$0xff] }
 0x74f   : > { %v8400_v51 = vpack.c.bf16 %v5788_v50, %v5786_v34  ;;  %v5978_v34 = vld [vmem:[#allocation8 + $0xdc0] sm:$0xff]  ;;  %v5980_v50 = vld [vmem:[#allocation8 + $0xdd0] sm:$0xff] }
 0x750   : > { %v8438_v53 = vpack.c.bf16 %v5980_v50, %v5978_v34  ;;  %v6174_v50 = vld [vmem:[#allocation8 + $0xf00] sm:$0xff] }
 0x751   : > { %8363 = vmatpush1.bf16.msra.mxu1 %v8362_v19  ;;  %v5704_v19 = vpop.permute.xlu0 %5703 }
 0x752   : > { %8365 = vmatprep.subr.bf16.mxu1 %v8364_v27  ;;  %v5790_v27 = vld [vmem:[#allocation8 + $0xcc8] sm:$0xff] }
 0x753   : > { %v8404_v20 = vpack.c.bf16 %v5792_v56, %v5790_v27  ;;  %v5984_v27 = vld [vmem:[#allocation8 + $0xdf0] sm:$0xff]  ;;  %v5987_v56 = vld [vmem:[#allocation8 + $0xe08] sm:$0xff] }
 0x755   : > { %8367 = vmatpush1.bf16.msra.mxu1 %v8366_v58  ;;  %v5791_v58 = vld [vmem:[#allocation8 + $0xcd0] sm:$0xff] }
 0x756   : > { %8369 = vmatprep.subr.bf16.mxu1 %v8368_v4  ;;  %v5794_v4 = vld [vmem:[#allocation8 + $0xce8] sm:$0xff]  ;;  %v8406_v11 = vpack.c.bf16 %v5791_v58, %v5789_v61  ;;  %v5986_v58 = vld [vmem:[#allocation8 + $0xe00] sm:$0xff] }
 0x757   : > { %v8408_v6 = vpack.c.bf16 %v5796_v2, %v5794_v4  ;;  %v5988_v4 = vld [vmem:[#allocation8 + $0xe10] sm:$0xff]  ;;  %v5991_v2 = vld [vmem:[#allocation8 + $0xe28] sm:$0xff] }
 0x759   : > { %8371 = vmatpush1.bf16.msra.mxu1 %v8370_v17  ;;  %v5795_v17 = vld [vmem:[#allocation8 + $0xcf0] sm:$0xff] }
 0x75a   : > { %8373 = vmatprep.subr.bf16.mxu1 %v8372_v23  ;;  %v5798_v23 = vld [vmem:[#allocation8 + $0xd08] sm:$0xff]  ;;  %v8410_v52 = vpack.c.bf16 %v5795_v17, %v5793_v14  ;;  %v5990_v17 = vld [vmem:[#allocation8 + $0xe20] sm:$0xff] }
 0x75b   : > { %v8412_v40 = vpack.c.bf16 %v5800_v28, %v5798_v23  ;;  %v5992_v23 = vld [vmem:[#allocation8 + $0xe30] sm:$0xff]  ;;  %v5995_v28 = vld [vmem:[#allocation8 + $0xe48] sm:$0xff] }
 0x75d   : > { %8375 = vmatpush1.bf16.msra.mxu1 %v8374_v32  ;;  %v5799_v32 = vld [vmem:[#allocation8 + $0xd10] sm:$0xff] }
 0x75e   : > { %8377 = vmatprep.subr.bf16.mxu1 %v8376_v54  ;;  %v5881_v54 = vld [vmem:[#allocation8 + $0xd28] sm:$0xff]  ;;  %v8414_v59 = vpack.c.bf16 %v5799_v32, %v5797_v42  ;;  %v5994_v42 = vld [vmem:[#allocation8 + $0xe40] sm:$0xff]  ;;  %v5996_v32 = vld [vmem:[#allocation8 + $0xe50] sm:$0xff] }
 0x75f   : > { %v8416_v1 = vpack.c.bf16 %v5883_v29, %v5881_v54  ;;  %v6077_v54 = vld [vmem:[#allocation8 + $0xe68] sm:$0xff]  ;;  %v6079_v29 = vld [vmem:[#allocation8 + $0xe78] sm:$0xff] }
 0x760   : > { %7493 = vmatmul.mubr.msk.f32.vlgmr.msra.gmra.mrb[20].mxu1 %vm3865_vm6, %v10401_v41  ;;  %v8390_v41 = vpack.c.bf16 %v5697_v31, %v5695_v25  ;;  %v5895_v25 = vld [vmem:[#allocation8 + $0xd98] sm:$0xff] }
 0x761   : > { %8379 = vmatpush1.bf16.msra.mxu1 %v8378_v3  ;;  %5771 = vmatprep.mubr.f32.mxu1 %v9386_v0  ;;  %v5882_v3 = vld [vmem:[#allocation8 + $0xd30] sm:$0xff] }
 0x762   : > { %8381 = vmatprep.subr.bf16.mxu1 %v8380_v16  ;;  %v5885_v16 = vld [vmem:[#allocation8 + $0xd48] sm:$0xff]  ;;  %v8418_v7 = vpack.c.bf16 %v5882_v3, %v5880_v55  ;;  %v6076_v55 = vld [vmem:[#allocation8 + $0xe60] sm:$0xff]  ;;  %v6078_v3 = vld [vmem:[#allocation8 + $0xe70] sm:$0xff] }
 0x763   : > { %v8420_v8 = vpack.c.bf16 %v5887_v5, %v5885_v16  ;;  %v6081_v16 = vld [vmem:[#allocation8 + $0xe88] sm:$0xff]  ;;  %v6083_v5 = vld [vmem:[#allocation8 + $0xe98] sm:$0xff] }
 0x765   : > { %8383 = vmatpush1.bf16.msra.mxu1 %v8382_v12  ;;  %v5886_v12 = vld [vmem:[#allocation8 + $0xd50] sm:$0xff] }
 0x766   : > { %8385 = vmatprep.subr.bf16.mxu1 %v8384_v13  ;;  %v5889_v13 = vld [vmem:[#allocation8 + $0xd68] sm:$0xff]  ;;  %v8422_v18 = vpack.c.bf16 %v5886_v12, %v5884_v9  ;;  %v6080_v9 = vld [vmem:[#allocation8 + $0xe80] sm:$0xff]  ;;  %v6082_v12 = vld [vmem:[#allocation8 + $0xe90] sm:$0xff] }
 0x767   : > { %v8424_v21 = vpack.c.bf16 %v5891_v15, %v5889_v13  ;;  %v5999_v13 = vpop.permute.xlu0 %5998  ;;  %v6085_v15 = vld [vmem:[#allocation8 + $0xea8] sm:$0xff] }
 0x769   : > { %8387 = vmatpush1.bf16.msra.mxu1 %v8386_v24  ;;  %v5890_v24 = vld [vmem:[#allocation8 + $0xd70] sm:$0xff] }
 0x76a   : > { %8389 = vmatprep.subr.bf16.mxu1 %v8388_v30  ;;  %v5893_v30 = vld [vmem:[#allocation8 + $0xd88] sm:$0xff]  ;;  %v8426_v31 = vpack.c.bf16 %v5890_v24, %v5888_v44  ;;  %v6084_v24 = vld [vmem:[#allocation8 + $0xea0] sm:$0xff] }
 0x76b   : > { %v8428_v35 = vpack.c.bf16 %v5895_v25, %v5893_v30  ;;  %v6086_v30 = vld [vmem:[#allocation8 + $0xeb0] sm:$0xff]  ;;  %v6089_v25 = vld [vmem:[#allocation8 + $0xec8] sm:$0xff] }
 0x76d   : > { %8391 = vmatpush1.bf16.msra.mxu1 %v8390_v41  ;;  %v5894_v41 = vld [vmem:[#allocation8 + $0xd90] sm:$0xff] }
 0x76e   : > { %8393 = vmatprep.subr.bf16.mxu1 %v8392_v38  ;;  %v5897_v38 = vld [vmem:[#allocation8 + $0xda8] sm:$0xff] }
 0x76f   : > { %v8432_v43 = vpack.c.bf16 %v5899_v39, %v5897_v38  ;;  %v6090_v38 = vld [vmem:[#allocation8 + $0xed0] sm:$0xff]  ;;  %v6093_v39 = vld [vmem:[#allocation8 + $0xee8] sm:$0xff] }
 0x771   : > { %8395 = vmatpush1.bf16.msra.mxu1 %v8394_v46  ;;  %v5979_v46 = vld [vmem:[#allocation8 + $0xdc8] sm:$0xff] }
 0x772   : > { %8397 = vmatprep.subr.bf16.mxu1 %v8396_v47  ;;  %v5981_v47 = vld [vmem:[#allocation8 + $0xdd8] sm:$0xff] }
 0x773   : > { %v8436_v49 = vpack.c.bf16 %v5981_v47, %v5979_v46  ;;  %v6094_v46 = vld [vmem:[#allocation8 + $0xef0] sm:$0xff]  ;;  %v6175_v47 = vld [vmem:[#allocation8 + $0xf08] sm:$0xff] }
 0x774   : > { %7494 = vmatmul.mubr.msk.f32.vlgmr.msra.gmra.mrb[20].mxu1 %vm3865_vm6, %v5704_v19  ;;  %v5982_v19 = vld [vmem:[#allocation8 + $0xde0] sm:$0xff] }
 0x775   : > { %8399 = vmatpush1.bf16.msra.mxu1 %v8398_v36  ;;  %5870 = vmatprep.mubr.f32.mxu1 %v9386_v0  ;;  %v5983_v36 = vld [vmem:[#allocation8 + $0xde8] sm:$0xff] }
 0x776   : > { %8401 = vmatprep.subr.bf16.mxu1 %v8400_v51  ;;  %v5985_v51 = vld [vmem:[#allocation8 + $0xdf8] sm:$0xff] }
 0x777   : > { %v8440_v63 = vpack.c.bf16 %v5985_v51, %v5983_v36  ;;  %v6176_v36 = vld [vmem:[#allocation8 + $0xf10] sm:$0xff]  ;;  %v6179_v51 = vld [vmem:[#allocation8 + $0xf28] sm:$0xff] }
 0x779   : > { %8403 = vmatpush1.bf16.msra.mxu1 %v8402_v10  ;;  %v5989_v10 = vld [vmem:[#allocation8 + $0xe18] sm:$0xff] }
 0x77a   : > { %8405 = vmatprep.subr.bf16.mxu1 %v8404_v20  ;;  %v8442_v20 = vpack.c.bf16 %v5984_v27, %v5982_v19  ;;  %v8444_v61 = vpack.c.bf16 %v5989_v10, %v5987_v56  ;;  %v6178_v27 = vld [vmem:[#allocation8 + $0xf20] sm:$0xff]  ;;  %v6180_v56 = vld [vmem:[#allocation8 + $0xf30] sm:$0xff]  ;;  %v6097_v10 = vpop.permute.xlu0 %6096 }
 0x77d   : > { %8407 = vmatpush1.bf16.msra.mxu1 %v8406_v11  ;;  %v5993_v11 = vld [vmem:[#allocation8 + $0xe38] sm:$0xff] }
 0x77e   : > { %8409 = vmatprep.subr.bf16.mxu1 %v8408_v6  ;;  %v8446_v6 = vpack.c.bf16 %v5988_v4, %v5986_v58  ;;  %v8448_v14 = vpack.c.bf16 %v5993_v11, %v5991_v2  ;;  %v8482_v58 = vpack.c.bf16 %v6180_v56, %v6178_v27  ;;  %v6182_v2 = vld [vmem:[#allocation8 + $0xf40] sm:$0xff]  ;;  %v6184_v11 = vld [vmem:[#allocation8 + $0xf50] sm:$0xff] }
 0x781   : > { %8411 = vmatpush1.bf16.msra.mxu1 %v8410_v52  ;;  %v5997_v52 = vld [vmem:[#allocation8 + $0xe58] sm:$0xff] }
 0x782   : > { %8413 = vmatprep.subr.bf16.mxu1 %v8412_v40  ;;  %v8452_v40 = vpack.c.bf16 %v5997_v52, %v5995_v28  ;;  %v6186_v28 = vld [vmem:[#allocation8 + $0xf60] sm:$0xff]  ;;  %v6188_v52 = vld [vmem:[#allocation8 + $0xf70] sm:$0xff] }
 0x785   : > { %8415 = vmatpush1.bf16.msra.mxu1 %v8414_v59  ;;  %v8454_v59 = vpack.c.bf16 %v5996_v32, %v5994_v42  ;;  %v8490_v42 = vpack.c.bf16 %v6188_v52, %v6186_v28  ;;  %v6526_v28 = vld [vmem:[#allocation13 + $0xe0] sm:$0xff]  ;;  %v6527_v52 = vld [vmem:[#allocation13 + $0xe8] sm:$0xff] }
 0x786   : > { %8417 = vmatprep.subr.bf16.mxu1 %v8416_v1  ;;  %v8456_v1 = vpack.c.bf16 %v6079_v29, %v6077_v54  ;;  %v6190_v54 = vld [vmem:[#allocation8 + $0xf80] sm:$0xff]  ;;  %v6192_v29 = vld [vmem:[#allocation8 + $0xf90] sm:$0xff] }
 0x788   : > { %7495 = vmatmul.mubr.msk.f32.vlgmr.msra.gmra.mrb[20].mxu1 %vm3865_vm6, %v10375_v45  ;;  %v8430_v45 = vpack.c.bf16 %v5894_v41, %v5892_v37  ;;  %v6088_v41 = vld [vmem:[#allocation8 + $0xec0] sm:$0xff] }
 0x789   : > { %8419 = vmatpush1.bf16.msra.mxu1 %v8418_v7  ;;  %5968 = vmatprep.mubr.f32.mxu1 %v9386_v0  ;;  %v8458_v7 = vpack.c.bf16 %v6078_v3, %v6076_v55 }
 0x78a   : > { %8421 = vmatprep.subr.bf16.mxu1 %v8420_v8  ;;  %v8460_v8 = vpack.c.bf16 %v6083_v5, %v6081_v16 }
 0x78d   : > { %8423 = vmatpush1.bf16.msra.mxu1 %v8422_v18  ;;  %v6087_v18 = vld [vmem:[#allocation8 + $0xeb8] sm:$0xff] }
 0x78e   : > { %8425 = vmatprep.subr.bf16.mxu1 %v8424_v21  ;;  %v8462_v21 = vpack.c.bf16 %v6082_v12, %v6080_v9  ;;  %v8464_v44 = vpack.c.bf16 %v6087_v18, %v6085_v15  ;;  %v6424_v9 = vld [vmem:[#allocation13 + $0x8] sm:$0xff]  ;;  %v6348_v12 = vld [vmem:[#allocation11 + $0x4] sm:$0xf]  ;;  %v6427_v18 = vld [vmem:[#allocation13 + $0x20] sm:$0xff] }
 0x78f   : > { %v6426_v15 = vld [vmem:[#allocation13 + $0x18] sm:$0xff] }
 0x791   : > { %8427 = vmatpush1.bf16.msra.mxu1 %v8426_v31  ;;  %v6091_v31 = vld [vmem:[#allocation8 + $0xed8] sm:$0xff] }
 0x792   : > { %8429 = vmatprep.subr.bf16.mxu1 %v8428_v35  ;;  %v8466_v35 = vpack.c.bf16 %v6086_v30, %v6084_v24  ;;  %v8468_v37 = vpack.c.bf16 %v6091_v31, %v6089_v25  ;;  %v6429_v24 = vld [vmem:[#allocation13 + $0x30] sm:$0xff]  ;;  %v6430_v30 = vld [vmem:[#allocation13 + $0x38] sm:$0xff]  ;;  %v6431_v31 = vld [vmem:[#allocation13 + $0x40] sm:$0xff] }
 0x793   : > { %v10481_v25 = vpack.c.bf16 %v6430_v30, %v6429_v24  ;;  %v6769_v24 = vld [vmem:[%s10821_s9 + $0x28] sm:$0xff] }
 0x795   : > { %8431 = vmatpush1.bf16.msra.mxu1 %v8430_v45  ;;  %v6095_v45 = vld [vmem:[#allocation8 + $0xef8] sm:$0xff] }
 0x796   : > { %8433 = vmatprep.subr.bf16.mxu1 %v8432_v43  ;;  %v8470_v43 = vpack.c.bf16 %v6090_v38, %v6088_v41  ;;  %v8472_v62 = vpack.c.bf16 %v6095_v45, %v6093_v39  ;;  %v6433_v41 = vld [vmem:[#allocation13 + $0x50] sm:$0xff]  ;;  %v6434_v38 = vld [vmem:[#allocation13 + $0x58] sm:$0xff]  ;;  %v6435_v45 = vld [vmem:[#allocation13 + $0x60] sm:$0xff] }
 0x797   : > { %v10489_v39 = vpack.c.bf16 %v6434_v38, %v6433_v41  ;;  %v6773_v41 = vld [vmem:[%s10821_s9 + $0x48] sm:$0xff] }
 0x799   : > { %8435 = vmatpush1.bf16.msra.mxu1 %v8434_v48  ;;  %v6177_v48 = vld [vmem:[#allocation8 + $0xf18] sm:$0xff] }
 0x79a   : > { %8437 = vmatprep.subr.bf16.mxu1 %v8436_v49  ;;  %v8474_v49 = vpack.c.bf16 %v6094_v46, %v6092_v33  ;;  %v8476_v34 = vpack.c.bf16 %v6177_v48, %v6175_v47  ;;  %v6437_v33 = vld [vmem:[#allocation13 + $0x70] sm:$0xff]  ;;  %v6438_v46 = vld [vmem:[#allocation13 + $0x78] sm:$0xff]  ;;  %v6439_v48 = vld [vmem:[#allocation13 + $0x80] sm:$0xff] }
 0x79b   : > { %v10497_v47 = vpack.c.bf16 %v6438_v46, %v6437_v33 }
 0x79c   : > { %7496 = vmatmul.mubr.msk.f32.vlgmr.msra.gmra.mrb[20].mxu1 %vm3865_vm6, %v10403_v26  ;;  %v8450_v26 = vpack.c.bf16 %v5992_v23, %v5990_v17  ;;  %v8486_v17 = vpack.c.bf16 %v6184_v11, %v6182_v2  ;;  %v6523_v2 = vld [vmem:[#allocation13 + $0xc8] sm:$0xff] }
 0x79d   : > { %8439 = vmatpush1.bf16.msra.mxu1 %v8438_v53  ;;  %6066 = vmatprep.mubr.f32.mxu1 %v9386_v0  ;;  %v6181_v53 = vld [vmem:[#allocation8 + $0xf38] sm:$0xff] }
 0x79e   : > { %8441 = vmatprep.subr.bf16.mxu1 %v8440_v63  ;;  %v8478_v63 = vpack.c.bf16 %v6176_v36, %v6174_v50  ;;  %v8480_v19 = vpack.c.bf16 %v6181_v53, %v6179_v51  ;;  %v6441_v50 = vld [vmem:[#allocation13 + $0x90] sm:$0xff]  ;;  %v6442_v36 = vld [vmem:[#allocation13 + $0x98] sm:$0xff]  ;;  %v6518_v53 = vld [vmem:[#allocation13 + $0xa0] sm:$0xff] }
 0x79f   : > { %v10505_v51 = vpack.c.bf16 %v6442_v36, %v6441_v50  ;;  %v7506_v50 = vld [vmem:[#allocation10] ss:$0 sm:$0xff] }
 0x7a1   : > { %8443 = vmatpush1.bf16.msra.mxu1 %v8442_v20  ;;  %v6183_v20 = vld [vmem:[#allocation8 + $0xf48] sm:$0xff] }
 0x7a2   : > { %8445 = vmatprep.subr.bf16.mxu1 %v8444_v61  ;;  %v6185_v61 = vld [vmem:[#allocation8 + $0xf58] sm:$0xff] }
 0x7a3   : > { %v8484_v4 = vpack.c.bf16 %v6185_v61, %v6183_v20  ;;  %v6521_v20 = vld [vmem:[#allocation13 + $0xb8] sm:$0xff] }
 0x7a5   : > { %8447 = vmatpush1.bf16.msra.mxu1 %v8446_v6  ;;  %v6187_v6 = vld [vmem:[#allocation8 + $0xf68] sm:$0xff] }
 0x7a6   : > { %8449 = vmatprep.subr.bf16.mxu1 %v8448_v14  ;;  %v6189_v14 = vld [vmem:[#allocation8 + $0xf78] sm:$0xff] }
 0x7a7   : > { %v8488_v23 = vpack.c.bf16 %v6189_v14, %v6187_v6  ;;  %v6524_v14 = vld [vmem:[#allocation13 + $0xd0] sm:$0xff] }
 0x7a9   : > { %8451 = vmatpush1.bf16.msra.mxu1 %v8450_v26  ;;  %v6191_v26 = vld [vmem:[#allocation8 + $0xf88] sm:$0xff] }
 0x7aa   : > { %8453 = vmatprep.subr.bf16.mxu1 %v8452_v40  ;;  %v6193_v40 = vld [vmem:[#allocation8 + $0xf98] sm:$0xff] }
 0x7ab   : > { %v8492_v32 = vpack.c.bf16 %v6193_v40, %v6191_v26  ;;  %v8539_v26 = vpack.c.bf16 %v6527_v52, %v6526_v28  ;;  %v6528_v40 = vld [vmem:[#allocation13 + $0xf0] sm:$0xff]  ;;  %v7519_v28 = vld [vmem:[%s10821_s9 + $0xa0] sm:$0xff] }
 0x7ac   : > { %v7520_v52 = vld [vmem:[%s10821_s9 + $0xa8] sm:$0xff] }
 0x7ad   : > { %8455 = vmatpush1.bf16.msra.mxu1 %v8454_v59  ;;  %v8494_v59 = vpack.c.bf16 %v6192_v29, %v6190_v54  ;;  %v6530_v54 = vld [vmem:[#allocation13 + $0x100] sm:$0xff]  ;;  %v6531_v29 = vld [vmem:[#allocation13 + $0x108] sm:$0xff] }
 0x7ae   : > { %8457 = vmatprep.subr.bf16.mxu1 %v8456_v1  ;;  %v6195_v1 = vpop.permute.xlu1 %6194 }
 0x7b0   : > { %7497 = vmatmul.mubr.msk.f32.vlgmr.msra.gmra.mrb[20].mxu1 %vm3865_vm6, %v5999_v13 }
 0x7b1   : > { %8459 = vmatpush1.bf16.msra.mxu1 %v8458_v7  ;;  %6164 = vmatprep.mubr.f32.mxu1 %v9386_v0  ;;  %v6271_v7 = vld [vmem:[#allocation11] sm:$0xf] }
 0x7b2   : > { %8461 = vmatprep.subr.bf16.mxu1 %v8460_v8  ;;  %v6423_v8 = vld [vmem:[#allocation13] sm:$0xff] }
 0x7b3   : > { %v10469_v13 = vpack.c.bf16 %v6424_v9, %v6423_v8  ;;  %v6536_v8 = vld [vmem:[#allocation13 + $0x130] sm:$0xff]  ;;  %v6537_v9 = vld [vmem:[#allocation13 + $0x138] sm:$0xff] }
 0x7b5   : > { %8463 = vmatpush1.bf16.msra.mxu1 %v8462_v21  ;;  %v6428_v21 = vld [vmem:[#allocation13 + $0x28] sm:$0xff] }
 0x7b6   : > { %8465 = vmatprep.subr.bf16.mxu1 %v8464_v44  ;;  %v10477_v44 = vpack.c.bf16 %v6428_v21, %v6427_v18  ;;  %v6767_v18 = vld [vmem:[%s10821_s9 + $0x18] sm:$0xff] }
 0x7b9   : > { %8467 = vmatpush1.bf16.msra.mxu1 %v8466_v35  ;;  %v6432_v35 = vld [vmem:[#allocation13 + $0x48] sm:$0xff] }
 0x7ba   : > { %8469 = vmatprep.subr.bf16.mxu1 %v8468_v37  ;;  %v10485_v37 = vpack.c.bf16 %v6432_v35, %v6431_v31  ;;  %v6771_v31 = vld [vmem:[%s10821_s9 + $0x38] sm:$0xff] }
 0x7bd   : > { %8471 = vmatpush1.bf16.msra.mxu1 %v8470_v43  ;;  %v6436_v43 = vld [vmem:[#allocation13 + $0x68] sm:$0xff] }
 0x7be   : > { %8473 = vmatprep.subr.bf16.mxu1 %v8472_v62  ;;  %v10493_v62 = vpack.c.bf16 %v6436_v43, %v6435_v45 }
 0x7c1   : > { %8475 = vmatpush1.bf16.msra.mxu1 %v8474_v49  ;;  %v6440_v49 = vld [vmem:[#allocation13 + $0x88] sm:$0xff] }
 0x7c2   : > { %8477 = vmatprep.subr.bf16.mxu1 %v8476_v34  ;;  %v10501_v34 = vpack.c.bf16 %v6440_v49, %v6439_v48 }
 0x7c4   : > { %7498 = vmatmul.mubr.msk.f32.vlgmr.msra.gmra.mrb[20].mxu1 %vm3865_vm6, %v6097_v10  ;;  %v6520_v10 = vld [vmem:[#allocation13 + $0xb0] sm:$0xff] }
 0x7c5   : > { %8479 = vmatpush1.bf16.msra.mxu1 %v8478_v63  ;;  %6262 = vmatprep.mubr.f32.mxu1 %v9386_v0  ;;  %v6519_v63 = vld [vmem:[#allocation13 + $0xa8] sm:$0xff]  ;;  %v10515_v61 = vpack.c.bf16 %v6521_v20, %v6520_v10 }
 0x7c6   : > { %8481 = vmatprep.subr.bf16.mxu1 %v8480_v19  ;;  %v10510_v27 = vpack.c.bf16 %v6519_v63, %v6518_v53  ;;  %v7509_v53 = vld [vmem:[%s10821_s9 + $0x58] sm:$0xff]  ;;  %v7511_v10 = vld [vmem:[%s10821_s9 + $0x68] sm:$0xff] }
 0x7c9   : > { %8483 = vmatpush1.bf16.msra.mxu1 %v8482_v58 }
 0x7ca   : > { %8485 = vmatprep.subr.bf16.mxu1 %v8484_v4  ;;  %v6522_v4 = vld [vmem:[#allocation13 + $0xc0] sm:$0xff] }
 0x7cb   : > { %v10523_v6 = vpack.c.bf16 %v6523_v2, %v6522_v4  ;;  %v7514_v2 = vld [vmem:[%s10821_s9 + $0x80] sm:$0xff] }
 0x7cd   : > { %8487 = vmatpush1.bf16.msra.mxu1 %v8486_v17  ;;  %v6525_v17 = vld [vmem:[#allocation13 + $0xd8] sm:$0xff] }
 0x7ce   : > { %8489 = vmatprep.subr.bf16.mxu1 %v8488_v23  ;;  %v10527_v23 = vpack.c.bf16 %v6525_v17, %v6524_v14  ;;  %v7516_v14 = vld [vmem:[%s10821_s9 + $0x90] sm:$0xff]  ;;  %v7517_v17 = vld [vmem:[%s10821_s9 + $0x98] sm:$0xff] }
 0x7d1   : > { %8491 = vmatpush1.bf16.msra.mxu1 %v8490_v42  ;;  %v6529_v42 = vld [vmem:[#allocation13 + $0xf8] sm:$0xff] }
 0x7d2   : > { %8493 = vmatprep.subr.bf16.mxu1 %v8492_v32  ;;  %v8542_v32 = vpack.c.bf16 %v6529_v42, %v6528_v40  ;;  %v7521_v42 = vld [vmem:[%s10821_s9 + $0xb0] sm:$0xff] }
 0x7d5   : > { %8495 = vmatpush1.bf16.msra.mxu1 %v8494_v59  ;;  %v8545_v59 = vpack.c.bf16 %v6531_v29, %v6530_v54  ;;  %v7523_v29 = vld [vmem:[%s10821_s9 + $0xc0] sm:$0xff] }
 0x7d8   : > { %7499 = vmatmul.mubr.msk.f32.vlgmr.msra.gmra.mrb[20].mxu1 %vm3865_vm6, %v6195_v1  ;;  %v6532_v1 = vld [vmem:[#allocation13 + $0x110] sm:$0xff] }
 0x8ab   : > { %v6264_v55 = vpop.f32.mrb[20].mxu1 }
 0x8ac   : > { %v8685_v3 = vadd.f32 %v6264_v55, %v10441_v57  ;;  %v6266_v16 = vpop.f32.mrb[21].mxu1  ;;  %v6425_v57 = vld [vmem:[#allocation13 + $0x10] sm:$0xff]  ;;  %v6533_v55 = vld [vmem:[#allocation13 + $0x118] sm:$0xff] }
 0x8ad   : > { %v8686_v5 = vadd.f32 %v6266_v16, %v10443_v22  ;;  %v10473_v22 = vpack.c.bf16 %v6426_v15, %v6425_v57  ;;  %v6534_v16 = vld [vmem:[#allocation13 + $0x120] sm:$0xff]  ;;  %v6765_v57 = vld [vmem:[%s10821_s9 + $0x8] sm:$0xff]  ;;  %v6766_v15 = vld [vmem:[%s10821_s9 + $0x10] sm:$0xff] }
 0x8ae   : > { %v8620_v21 = vpack.c.bf16 %v6767_v18, %v6766_v15  ;;  %v7532_v15 = vld [vmem:[%s10821_s9 + $0x100] sm:$0xff] }
 0x8af   : > { %6276 = vmatprep.subr.mxu0 %v8686_v5 }
 0x8b0   : > { %6277 = vmatpush1.msra.mxu0 %v8685_v3 }
 0x8b1   : > { %7500 = vmatmul.mubr.msk.f32.vlgmr.msra.gmra.mrb[12].mxu0 %vm6272_vm7, %v6271_v7  ;;  %6352 = vmatprep.subr.mxu0 %v8686_v5  ;;  %v6535_v5 = vld [vmem:[#allocation13 + $0x128] sm:$0xff] }
 0x8b2   : > { %6353 = vmatpush1.msra.mxu0 %v8685_v3  ;;  %6416 = vmatprep.mubr.f32.mxu0 %v9386_v0  ;;  %v8548_v3 = vpack.c.bf16 %v6533_v55, %v6532_v1  ;;  %v8551_v7 = vpack.c.bf16 %v6535_v5, %v6534_v16  ;;  %v7525_v55 = vld [vmem:[%s10821_s9 + $0xd0] sm:$0xff]  ;;  %v7527_v5 = vld [vmem:[%s10821_s9 + $0xe0] sm:$0xff] }
 0x8b3   : > { %8496 = vmatprep.subr.bf16.mxu0 %v9391_v60 }
 0x8b5   : > { %7501 = vmatmul.mubr.msk.f32.vlgmr.msra.gmra.mrb[14].mxu0 %vm6272_vm7, %v6348_v12  ;;  %v8554_v12 = vpack.c.bf16 %v6537_v9, %v6536_v8  ;;  %v7530_v9 = vld [vmem:[%s10821_s9 + $0xf0] sm:$0xff] }
 0x8b6   : > { %8498 = vmatpush1.bf16.msra.mxu0 %v10469_v13 }
 0x8b7   : > { %8499 = vmatprep.subr.bf16.mxu0 %v9391_v60 }
 0x8ba   : > { %8501 = vmatpush1.bf16.msra.mxu0 %v10473_v22 }
 0x8bb   : > { %8502 = vmatprep.subr.bf16.mxu0 %v9391_v60 }
 0x8be   : > { %8504 = vmatpush1.bf16.msra.mxu0 %v10477_v44 }
 0x8bf   : > { %8505 = vmatprep.subr.bf16.mxu0 %v9391_v60 }
 0x8c2   : > { %8507 = vmatpush1.bf16.msra.mxu0 %v10481_v25 }
 0x8c3   : > { %8508 = vmatprep.subr.bf16.mxu0 %v9391_v60 }
 0x8c6   : > { %8510 = vmatpush1.bf16.msra.mxu0 %v10485_v37 }
 0x8c7   : > { %8511 = vmatprep.subr.bf16.mxu0 %v9391_v60 }
 0x8ca   : > { %8513 = vmatpush1.bf16.msra.mxu0 %v10489_v39 }
 0x8cb   : > { %8514 = vmatprep.subr.bf16.mxu0 %v9391_v60 }
 0x8ce   : > { %8516 = vmatpush1.bf16.msra.mxu0 %v10493_v62 }
 0x8cf   : > { %8517 = vmatprep.subr.bf16.mxu0 %v9391_v60 }
 0x8d2   : > { %8519 = vmatpush1.bf16.msra.mxu0 %v10497_v47 }
 0x8d3   : > { %8520 = vmatprep.subr.bf16.mxu0 %v9391_v60 }
 0x8d6   : > { %8522 = vmatpush1.bf16.msra.mxu0 %v10501_v34 }
 0x8d7   : > { %8523 = vmatprep.subr.bf16.mxu0 %v9391_v60 }
 0x8da   : > { %8525 = vmatpush1.bf16.msra.mxu0 %v10505_v51 }
 0x8db   : > { %8526 = vmatprep.subr.bf16.mxu0 %v9391_v60 }
 0x984   : > { %v6342_v19 = vpop.f32.mrb[12].mxu0 }
 0x985   : > { %v6344_v56 = vpop.f32.mrb[13].mxu0 }
 0x986   : > { %7502 = vmatprep.mubr.msk.f32.mxu0 %vm6443_vm8, %v6344_v56 }
 0x987   : > { %6512 = vmatmul.mubr.f32.vlgmr.msra.gmra.mrb[16].mxu0 %v6342_v19 }
 0x988   : > { %8528 = vmatpush1.bf16.msra.mxu0 %v10510_v27  ;;  %7503 = vmatprep.mubr.msk.f32.mxu0 %vm6443_vm8, %v6344_v56  ;;  %v10517_v58 = vpop.f32.mrb[14].mxu0  ;;  %v7510_v56 = vld [vmem:[%s10821_s9 + $0x60] sm:$0xff] }
 0x989   : > { %8529 = vmatprep.subr.bf16.mxu0 %v9391_v60  ;;  %v10520_v11 = vpop.f32.mrb[15].mxu0  ;;  %v8635_v20 = vpack.c.bf16 %v7511_v10, %v7510_v56 }
 0x98c   : > { %8531 = vmatpush1.bf16.msra.mxu0 %v10515_v61 }
 0x98d   : > { %8532 = vmatprep.subr.bf16.mxu0 %v9391_v60 }
 0x990   : > { %8534 = vmatpush1.bf16.msra.mxu0 %v10523_v6 }
 0x991   : > { %8535 = vmatprep.subr.bf16.mxu0 %v9391_v60 }
 0x994   : > { %8537 = vmatpush1.bf16.msra.mxu0 %v10527_v23 }
 0x995   : > { %8538 = vmatprep.subr.bf16.mxu0 %v9391_v60 }
 0x998   : > { %8540 = vmatpush1.bf16.msra.mxu0 %v8539_v26 }
 0x999   : > { %8541 = vmatprep.subr.bf16.mxu0 %v9391_v60 }
 0x99c   : > { %8543 = vmatpush1.bf16.msra.mxu0 %v8542_v32 }
 0x99d   : > { %8544 = vmatprep.subr.bf16.mxu0 %v9391_v60 }
 0x9a0   : > { %8546 = vmatpush1.bf16.msra.mxu0 %v8545_v59 }
 0x9a1   : > { %8547 = vmatprep.subr.bf16.mxu0 %v9391_v60 }
 0x9a4   : > { %8549 = vmatpush1.bf16.msra.mxu0 %v8548_v3 }
 0x9a5   : > { %8550 = vmatprep.subr.bf16.mxu0 %v9391_v60 }
 0x9a8   : > { %8552 = vmatpush1.bf16.msra.mxu0 %v8551_v7 }
 0x9a9   : > { %8553 = vmatprep.subr.bf16.mxu0 %v9391_v60 }
 0x9ac   : > { %8555 = vmatpush1.bf16.msra.mxu0 %v8554_v12 }
 0x9ad   : > { %8556 = vmatprep.subr.bf16.mxu0 %v9391_v60 }
 0x9af   : > { %6603 = vmatmul.mubr.f32.vlgmr.msra.gmra.mrb[18].mxu0 %v6342_v19 }
 0x9b0   : > { %8558 = vmatpush1.bf16.msra.mxu0 %v10469_v13  ;;  %7504 = vmatprep.mubr.msk.f32.mxu0 %vm6443_vm8, %v10520_v11  ;;  %v6764_v13 = vld [vmem:[%s10821_s9] sm:$0xff] }
 0x9b1   : > { %8559 = vmatprep.subr.bf16.mxu0 %v9391_v60 }
 0x9b4   : > { %8561 = vmatpush1.bf16.msra.mxu0 %v10473_v22  ;;  %v8617_v22 = vpack.c.bf16 %v6765_v57, %v6764_v13 }
 0x9b5   : > { %8562 = vmatprep.subr.bf16.mxu0 %v9391_v60 }
 0x9b8   : > { %8564 = vmatpush1.bf16.msra.mxu0 %v10477_v44  ;;  %v6768_v44 = vld [vmem:[%s10821_s9 + $0x20] sm:$0xff] }
 0x9b9   : > { %8565 = vmatprep.subr.bf16.mxu0 %v9391_v60  ;;  %v8623_v30 = vpack.c.bf16 %v6769_v24, %v6768_v44  ;;  %v7535_v44 = vld [vmem:[%s10821_s9 + $0x118] sm:$0xff] }
 0x9bc   : > { %8567 = vmatpush1.bf16.msra.mxu0 %v10481_v25  ;;  %v6770_v25 = vld [vmem:[%s10821_s9 + $0x30] sm:$0xff] }
 0x9bd   : > { %8568 = vmatprep.subr.bf16.mxu0 %v9391_v60  ;;  %v8626_v35 = vpack.c.bf16 %v6771_v31, %v6770_v25  ;;  %v7537_v25 = vld [vmem:[%s10821_s9 + $0x128] sm:$0xff] }
 0x9c0   : > { %8570 = vmatpush1.bf16.msra.mxu0 %v10485_v37  ;;  %v6772_v37 = vld [vmem:[%s10821_s9 + $0x40] sm:$0xff] }
 0x9c1   : > { %8571 = vmatprep.subr.bf16.mxu0 %v9391_v60  ;;  %v8629_v38 = vpack.c.bf16 %v6773_v41, %v6772_v37  ;;  %v7539_v37 = vld [vmem:[%s10821_s9 + $0x138] sm:$0xff] }
 0x9c4   : > { %8573 = vmatpush1.bf16.msra.mxu0 %v10489_v39 }
 0x9c5   : > { %8574 = vmatprep.subr.bf16.mxu0 %v9391_v60 }
 0x9c8   : > { %8576 = vmatpush1.bf16.msra.mxu0 %v10493_v62 }
 0x9c9   : > { %8577 = vmatprep.subr.bf16.mxu0 %v9391_v60 }
 0x9cc   : > { %8579 = vmatpush1.bf16.msra.mxu0 %v10497_v47 }
 0x9cd   : > { %8580 = vmatprep.subr.bf16.mxu0 %v9391_v60 }
 0x9d0   : > { %8582 = vmatpush1.bf16.msra.mxu0 %v10501_v34 }
 0x9d1   : > { %8583 = vmatprep.subr.bf16.mxu0 %v9391_v60 }
 0x9d4   : > { %8585 = vmatpush1.bf16.msra.mxu0 %v10505_v51  ;;  %v7508_v51 = vld [vmem:[%s10821_s9 + $0x50] sm:$0xff] }
 0x9d5   : > { %8586 = vmatprep.subr.bf16.mxu0 %v9391_v60  ;;  %v8632_v19 = vpack.c.bf16 %v7509_v53, %v7508_v51 }
 0x9d7   : > { %6677 = vmatmul.mubr.f32.vlgmr.msra.gmra.mrb[20].mxu0 %v10517_v58 }
 0x9d8   : > { %8588 = vmatpush1.bf16.msra.mxu0 %v10510_v27  ;;  %7505 = vmatprep.mubr.msk.f32.mxu0 %vm6443_vm8, %v10520_v11  ;;  %v7515_v11 = vld [vmem:[%s10821_s9 + $0x88] sm:$0xff] }
 0x9d9   : > { %8589 = vmatprep.subr.bf16.mxu0 %v9391_v60 }
 0x9dc   : > { %8591 = vmatpush1.bf16.msra.mxu0 %v10515_v61  ;;  %v7512_v61 = vld [vmem:[%s10821_s9 + $0x70] sm:$0xff] }
 0x9dd   : > { %8592 = vmatprep.subr.bf16.mxu0 %v9391_v60 }
 0x9e0   : > { %8594 = vmatpush1.bf16.msra.mxu0 %v10523_v6  ;;  %v8641_v6 = vpack.c.bf16 %v7515_v11, %v7514_v2 }
 0x9e1   : > { %8595 = vmatprep.subr.bf16.mxu0 %v9391_v60 }
 0x9e4   : > { %8597 = vmatpush1.bf16.msra.mxu0 %v10527_v23  ;;  %v8644_v23 = vpack.c.bf16 %v7517_v17, %v7516_v14 }
 0x9e5   : > { %8598 = vmatprep.subr.bf16.mxu0 %v9391_v60 }
 0x9e8   : > { %8600 = vmatpush1.bf16.msra.mxu0 %v8539_v26  ;;  %v8647_v26 = vpack.c.bf16 %v7520_v52, %v7519_v28 }
 0x9e9   : > { %8601 = vmatprep.subr.bf16.mxu0 %v9391_v60 }
 0x9ec   : > { %8603 = vmatpush1.bf16.msra.mxu0 %v8542_v32  ;;  %v7522_v32 = vld [vmem:[%s10821_s9 + $0xb8] sm:$0xff] }
 0x9ed   : > { %8604 = vmatprep.subr.bf16.mxu0 %v9391_v60  ;;  %v8650_v54 = vpack.c.bf16 %v7522_v32, %v7521_v42 }
 0x9f0   : > { %8606 = vmatpush1.bf16.msra.mxu0 %v8545_v59  ;;  %v7524_v59 = vld [vmem:[%s10821_s9 + $0xc8] sm:$0xff] }
 0x9f1   : > { %8607 = vmatprep.subr.bf16.mxu0 %v9391_v60  ;;  %v8653_v1 = vpack.c.bf16 %v7524_v59, %v7523_v29 }
 0x9f4   : > { %8609 = vmatpush1.bf16.msra.mxu0 %v8548_v3  ;;  %v7526_v3 = vld [vmem:[%s10821_s9 + $0xd8] sm:$0xff] }
 0x9f5   : > { %8610 = vmatprep.subr.bf16.mxu0 %v9391_v60  ;;  %v8656_v16 = vpack.c.bf16 %v7526_v3, %v7525_v55 }
 0x9f8   : > { %8612 = vmatpush1.bf16.msra.mxu0 %v8551_v7  ;;  %v7528_v7 = vld [vmem:[%s10821_s9 + $0xe8] sm:$0xff] }
 0x9f9   : > { %8613 = vmatprep.subr.bf16.mxu0 %v9391_v60  ;;  %v8659_v8 = vpack.c.bf16 %v7528_v7, %v7527_v5 }
 0x9fc   : > { %8615 = vmatpush1.bf16.msra.mxu0 %v8554_v12  ;;  %v7531_v12 = vld [vmem:[%s10821_s9 + $0xf8] sm:$0xff] }
 0x9fd   : > { %8616 = vmatprep.subr.bf16.mxu0 %v9391_v60  ;;  %v8662_v13 = vpack.c.bf16 %v7531_v12, %v7530_v9 }
 0x9ff   : > { %6747 = vmatmul.mubr.f32.vlgmr.msra.gmra.mrb[22].mxu0 %v10517_v58  ;;  %v7513_v58 = vld [vmem:[%s10821_s9 + $0x78] sm:$0xff] }
 0xa00   : > { %8618 = vmatpush3.bf16.msra.mxu0 %v8617_v22  ;;  %7619 = vmatprep.mubr.msk.f32.mxu0 %vm9396_vm9, %v9386_v0  ;;  %v8638_v4 = vpack.c.bf16 %v7513_v58, %v7512_v61  ;;  %v7533_v22 = vld [vmem:[%s10821_s9 + $0x108] sm:$0xff] }
 0xa01   : > { %8619 = vmatprep.subr.bf16.mxu0 %v9391_v60  ;;  %v8665_v18 = vpack.c.bf16 %v7533_v22, %v7532_v15 }
 0xa04   : > { %8621 = vmatpush3.bf16.msra.mxu0 %v8620_v21  ;;  %v7534_v21 = vld [vmem:[%s10821_s9 + $0x110] sm:$0xff] }
 0xa05   : > { %8622 = vmatprep.subr.bf16.mxu0 %v9391_v60  ;;  %v8668_v24 = vpack.c.bf16 %v7535_v44, %v7534_v21 }
 0xa08   : > { %8624 = vmatpush3.bf16.msra.mxu0 %v8623_v30  ;;  %v7536_v30 = vld [vmem:[%s10821_s9 + $0x120] sm:$0xff] }
 0xa09   : > { %8625 = vmatprep.subr.bf16.mxu0 %v9391_v60  ;;  %v8671_v31 = vpack.c.bf16 %v7537_v25, %v7536_v30 }
 0xa0c   : > { %8627 = vmatpush3.bf16.msra.mxu0 %v8626_v35  ;;  %v7538_v35 = vld [vmem:[%s10821_s9 + $0x130] sm:$0xff] }
 0xa0d   : > { %8628 = vmatprep.subr.bf16.mxu0 %v9391_v60  ;;  %v8674_v41 = vpack.c.bf16 %v7539_v37, %v7538_v35 }
 0xa10   : > { %8630 = vmatpush3.bf16.msra.mxu0 %v8629_v38  ;;  %v7104_v38 = vld [vmem:[%s10823_s11] sm:$0xff] }
 0xa11   : > { %8631 = vmatprep.subr.bf16.mxu0 %v9391_v60 }
 0xa5a   : > { %v6513_v39 = vpop.f32.mrb[16].mxu0 }
 0xa5b   : > { %v6515_v45 = vpop.f32.mrb[17].mxu0 }
 0xa82   : > { %v6604_v43 = vpop.f32.mrb[18].mxu0 }
 0xa83   : > { %v6608_v62 = vmax.f32 %v6513_v39, %v6604_v43  ;;  %v6606_v33 = vpop.f32.mrb[19].mxu0  ;;  %v7105_v39 = vld [vmem:[%s10823_s11 + $0x8] sm:$0xff] }
 0xa84   : > { %v8677_v45 = vpack.c.bf16 %v7105_v39, %v7104_v38  ;;  %v7107_v33 = vld [vmem:[%s10823_s11 + $0x18] sm:$0xff] }
 0xaaa   : > { %v6678_v46 = vpop.f32.mrb[20].mxu0 }
 0xaab   : > { %v6680_v47 = vpop.f32.mrb[21].mxu0 }
 0xaac   : > { %v7108_v47 = vld [vmem:[%s10823_s11 + $0x20] sm:$0xff] }
 0xad2   : > { %v6748_v48 = vpop.f32.mrb[22].mxu0 }
 0xad3   : > { %v6752_v49 = vmax.f32 %v6678_v46, %v6748_v48  ;;  %v6750_v34 = vpop.f32.mrb[23].mxu0  ;;  %v7109_v48 = vld [vmem:[%s10823_s11 + $0x28] sm:$0xff] }
 0xad4   : > { %v7110_v34 = vld [vmem:[%s10823_s11 + $0x30] sm:$0x3] }
 0xad5   : > { %v6753_v36 = vmax.f32 %v6608_v62, %v6752_v49  ;;  %v7106_v62 = vld [vmem:[%s10823_s11 + $0x10] sm:$0xff]  ;;  %v8683_v49 = vpack.c.bf16 %v7109_v48, %v7108_v47 }
 0xad6   : > { %v8680_v46 = vpack.c.bf16 %v7107_v33, %v7106_v62 }
 0xad7   : > { %v6761_v63 = vadd.f32 %v7506_v50, %v6753_v36  ;;  %v6763_v50 = vld [vmem:[#allocation14] sm:$0x1] }
 0xad9   : > { %v10621_v27 = vmax.f32 %v6761_v63, 0.0  ;;  %v7111_v63 = vld [vmem:[#allocation16] sm:$0x1] }
 0xadb   : > { %7620 = vmatmul.mubr.msk.f32.vlgmr.msra.gmra.mrb[24].mxu0 %vm3865_vm6, %v10621_v27  ;;  %v6859_v40 = vrot.slane %v10621_v27, 1  ;;  %v6944_v57 = vrot.slane %v10621_v27, 2  ;;  %v7029_v43 = vrot.slane %v10621_v27, 3 }
 0xadc   : > { %8633 = vmatpush3.bf16.msra.mxu0 %v8632_v19  ;;  %7642 = vmatprep.mubr.msk.f32.mxu0 %vm9396_vm9, %v9386_v0 }
 0xadd   : > { %8634 = vmatprep.subr.bf16.mxu0 %v9391_v60 }
 0xae0   : > { %8636 = vmatpush3.bf16.msra.mxu0 %v8635_v20 }
 0xae1   : > { %8637 = vmatprep.subr.bf16.mxu0 %v9391_v60 }
 0xae4   : > { %8639 = vmatpush3.bf16.msra.mxu0 %v8638_v4 }
 0xae5   : > { %8640 = vmatprep.subr.bf16.mxu0 %v9391_v60 }
 0xae8   : > { %8642 = vmatpush3.bf16.msra.mxu0 %v8641_v6 }
 0xae9   : > { %8643 = vmatprep.subr.bf16.mxu0 %v9391_v60 }
 0xaec   : > { %8645 = vmatpush3.bf16.msra.mxu0 %v8644_v23 }
 0xaed   : > { %8646 = vmatprep.subr.bf16.mxu0 %v9391_v60 }
 0xaef   : > { %7643 = vmatmul.mubr.msk.f32.vlgmr.msra.gmra.mrb[24].mxu0 %vm3865_vm6, %v6859_v40 }
 0xaf0   : > { %8648 = vmatpush3.bf16.msra.mxu0 %v8647_v26  ;;  %7665 = vmatprep.mubr.msk.f32.mxu0 %vm9396_vm9, %v9386_v0 }
 0xaf1   : > { %8649 = vmatprep.subr.bf16.mxu0 %v9391_v60 }
 0xaf4   : > { %8651 = vmatpush3.bf16.msra.mxu0 %v8650_v54 }
 0xaf5   : > { %8652 = vmatprep.subr.bf16.mxu0 %v9391_v60 }
 0xaf8   : > { %8654 = vmatpush3.bf16.msra.mxu0 %v8653_v1 }
 0xaf9   : > { %8655 = vmatprep.subr.bf16.mxu0 %v9391_v60 }
 0xafc   : > { %8657 = vmatpush3.bf16.msra.mxu0 %v8656_v16 }
 0xafd   : > { %8658 = vmatprep.subr.bf16.mxu0 %v9391_v60 }
 0xb00   : > { %8660 = vmatpush3.bf16.msra.mxu0 %v8659_v8 }
 0xb01   : > { %8661 = vmatprep.subr.bf16.mxu0 %v9391_v60 }
 0xb03   : > { %7666 = vmatmul.mubr.msk.f32.vlgmr.msra.gmra.mrb[24].mxu0 %vm3865_vm6, %v6944_v57 }
 0xb04   : > { %8663 = vmatpush3.bf16.msra.mxu0 %v8662_v13  ;;  %7688 = vmatprep.mubr.msk.f32.mxu0 %vm9396_vm9, %v9386_v0 }
 0xb05   : > { %8664 = vmatprep.subr.bf16.mxu0 %v9391_v60 }
 0xb08   : > { %8666 = vmatpush3.bf16.msra.mxu0 %v8665_v18 }
 0xb09   : > { %8667 = vmatprep.subr.bf16.mxu0 %v9391_v60 }
 0xb0c   : > { %8669 = vmatpush3.bf16.msra.mxu0 %v8668_v24 }
 0xb0d   : > { %8670 = vmatprep.subr.bf16.mxu0 %v9391_v60 }
 0xb10   : > { %8672 = vmatpush3.bf16.msra.mxu0 %v8671_v31 }
 0xb11   : > { %8673 = vmatprep.subr.bf16.mxu0 %v9391_v60 }
 0xb14   : > { %8675 = vmatpush3.bf16.msra.mxu0 %v8674_v41 }
 0xb15   : > { %8676 = vmatprep.subr.bf16.mxu0 %v9391_v60 }
 0xb17   : > { %7689 = vmatmul.mubr.msk.f32.vlgmr.msra.gmra.mrb[24].mxu0 %vm3865_vm6, %v7029_v43 }
 0xb18   : > { %8678 = vmatpush3.bf16.msra.mxu0 %v8677_v45  ;;  %7705 = vmatprep.mubr.msk.f32.mxu0 %vm9396_vm9, %v9386_v0 }
 0xb19   : > { %8679 = vmatprep.subr.bf16.mxu0 %v9391_v60 }
 0xb1c   : > { %8681 = vmatpush3.bf16.msra.mxu0 %v8680_v46 }
 0xb1d   : > { %8682 = vmatprep.subr.bf16.mxu0 %v9391_v60 }
 0xb20   : > { %8684 = vmatpush3.bf16.msra.mxu0 %v8683_v49 }
 0xb21   : > { %7703 = vmatprep.subr.mxu0 %v9386_v0 }
 0xb24   : > { %7704 = vmatpush3.msk.msra.mxu0 %vm7116_vm10, %v7110_v34 }
 0xbea   : > { %v7098_v60 = vpop.f32.mrb[24].mxu0 }
 0xbeb   : > { %v8687_v36 = vadd.f32 %v7098_v60, %v6763_v50  ;;  %v7690_v51 = vpop.f32.mrb[25].mxu0 }
 0xbed   : > { %v7103_v53 = vmax.f32 %v8687_v36, 0.0 }
 0xbef   : > { %7706 = vmatmul.mubr.msk.f32.vlgmr.msra.gmra.mrb[26].mxu0 %vm7112_vm11, %v7103_v53 }
 0xcc2   : > { %v7186_v19 = vpop.f32.mrb[26].mxu0 }
 0xcc3   : > { %v7187_v27 = vadd.f32 %v7186_v19, %v7111_v63  ;;  %v7707_v0 = vpop.f32.mrb[27].mxu0 }
 0xcc5   : > { %v7191_v56 = vsel %vm7190_vm12, %v7187_v27, -inf }
 0xcc6   : > { %7192 = vmax.xlane.f32.xlu0 %v7191_v56 }
 0xd53   : > { %v7193_v10 = vpop.xlane.xlu0 %7192 }
 0xd54   : > { %v7194_v20 = vsub.f32 %v7187_v27, %v7193_v10 }
 0xd56   : > { %v7195_v61 = vmul.f32 1.442695, %v7194_v20 }
 0xd58   : > { %9031 = vpow2.f32 %v7195_v61 }
 0xd62   : > { %v9032_v58 = vpop.eup %9031 }
 0xd63   : > { %v7197_v4 = vsel %vm7190_vm12, %v9032_v58, 0.0 }
 0xd64   : > { %7198 = vadd.xlane.f32.xlu1 %v7197_v4 }
 0xdf1   : > { %v7199_v2 = vpop.xlane.xlu1 %7198 }
 0xdf2   : > { %9033 = vlog2.f32 %v7199_v2 }
 0xdfc   : > { %v9034_v11 = vpop.eup %9033 }
 0xdfd   : > { %v7201_v6 = vmul.f32 0.6931472, %v9034_v11 }
 0xdff   : > { %v7202_v14 = vadd.f32 %v7201_v6, %v7193_v10 }
 0xe01   : > { %v7203_v17 = vsub.f32 %v7187_v27, %v7202_v14 }
 0xe03   : > { %7204 = vst.msk [vmem:[%s555_s14] sm:$0x1] %vm7190_vm12, %v7203_v17 }
 0xe04   : > { %9300 = shalt.err (!%p9297_p9)
}
 0xe05   : > { %s9301_s24 = scalar_lea.hbm %s10769_s26, 16  ;;  %s9305_s21 = scalar_lea.hbm %s10874_s13, 32 }
 0xe06   : > { %p9302_p12 = scmp.ne.s32.totalorder %s10769_s26, %s9301_s24  ;;  %p9306_p3 = scmp.lt.u32.totalorder %s10769_s26, %s10874_s13 }
 0xe07   : > { %p9307_p4 = scmp.lt.u32.totalorder %s9305_s21, %s9301_s24  ;;  %p9309_p8 = scmp.lt.u32.totalorder %s9301_s24, %s10769_s26 }
 0xe08   : > { %p9303_p10 = pnand %p9302_p12, %p10875_p11 }
 0xe09   : > { %p9308_p7 = por %p9307_p4, %p9306_p3 }
 0xe0a   : > { %p9304_p2 = pneg %p9303_p10 }
 0xe0b   : > { %p9310_p13 = por %p9309_p8, %p9308_p7 }
 0xe0d   : > { %p9311_p1 = pnand %p9310_p13, %p9304_p2 }
 0xe0f   : > { %9314 = shalt.err (!%p9311_p1)
}
 0xe10   : > { %8920 = dma.vmem_to_hbm [thread:$0]  (%p10875_p11), %s10771_s15, 16, %s10769_s26, %s7206_s18  }
 0xe11 PF: > { %s10876_s16 = sld [smem:[#allocation27_spill]]  ;;  %s10877_s5 = sld [smem:[#allocation24_spill]] }
 0xe12   : > { %s10878_s14 = sld [smem:[#allocation31_spill]] }
 0xe17   : > { %p8972_p0 = scmp.ge.s32.totalorder %s10876_s16, 2  ;;  %s7230_s22 = sand.u32 1, %s10877_s5  }
 0xe18   : > { %p10879_p6 = scmp.ne.s32.totalorder %s10878_s14, 0  ;;  %s7231_s17 = scalar_lea.sflag [#allocation4], %s7230_s22 }
 0xe1a   : > { %p8951_p5 = pnand %p8972_p0, %p10879_p6 }
 0xe1c   : > { %9352 = dma.done.wait (!%p8951_p5), %s7231_s17, 16  }
 0xe1d   : > { %9354 = vsyncadd (!%p8951_p5), %s7231_s17, 4294967280  ;;  %s10880_s28 = sld [smem:[#allocation28_spill]]  ;;  %s10881_s25 = sld [smem:[#allocation25_spill]] }
 0xe1e   : > { %s10882_s26 = sld [smem:[#allocation26_spill]]  ;;  %s10883_s27 = sld [smem:[#allocation29_spill]] }
 0xe23   : > { %p28_p9 = scmp.ge.s32.totalorder %s10880_s28, 4  }
 0xe25   :  { %30 = sbr.rel (!%p28_p9) target bundleno = 12 (0xc), region = 199 }
 0xe2c   :  { %7235 = vsyncpa [#allocation3], 1 }
 0xe2d   :  { %7237 = vsyncpa [#allocation3 + $0x1], 1 }
 0xe2e   :  { %7238 = vsyncpa [#allocation6], 1 }
 0xe2f   :  { %7239 = vsyncpa [#allocation9], 1 }
 0xe30   :  { %7240 = vsyncpa [#allocation12], 1 }
 0xe31   :  { %7241 = vsyncpa [#allocation15], 1 }
 0xe32   :  { %7242 = vsyncpa [#allocation4], 1 }
 0xe33   :  { %7244 = vsyncpa [#allocation4 + $0x1], 1 }

</bundles_post_ra>
